<compile_context>
chip_gen: v7x
topology: tpu7x:2x2x1
jax: 0.10.0
libtpu: 0.0.40
codegen_flags: <defaults>
</compile_context>

<pallas_src>
import functools
import numpy as np

import jax
import jax.numpy as jnp
from jax.experimental import pallas as pl
from jax.experimental.pallas import tpu as pltpu

_LANE = 128
_INV_LN2 = float(1.0 / np.log(2.0))


def _round_up(x, m):
    return ((x + m - 1) // m) * m


# ---------------------------------------------------------------------------
# Pallas kernels
# ---------------------------------------------------------------------------
def _matmul_bias_act_kernel(a_ref, w_ref, b_ref, o_ref, *, act):
    # a: (tm, Kp) bf16, w: (Kp, 128) bf16, b: (1, 128) f32, o: (tm, 128) f32
    acc = jnp.dot(a_ref[...], w_ref[...], preferred_element_type=jnp.float32)
    acc = acc + b_ref[...]
    if act == "relu":
        acc = jnp.maximum(acc, 0.0)
    elif act == "softplus":
        acc = jnp.maximum(acc, 0.0) + jnp.log(1.0 + jnp.exp(-jnp.abs(acc)))
    o_ref[...] = acc


def _round_rate_kernel(y_ref, s_ref, yhat_ref, bits_ref, *, m_valid, tm):
    """Fused quantize + logistic-entropy rate, accumulated across grid axis 0."""
    i = pl.program_id(0)

    @pl.when(i == 0)
    def _():
        bits_ref[...] = jnp.zeros_like(bits_ref)

    y = y_ref[...]
    yq = jnp.round(y)
    yhat_ref[...] = yq

    s = jnp.maximum(s_ref[...], 1e-6)          # (tm,C) or (1,C) -> broadcasts
    up = 1.0 / (1.0 + jnp.exp(-(yq + 0.5) / s))
    lo = 1.0 / (1.0 + jnp.exp(-(yq - 0.5) / s))
    p = jnp.maximum(up - lo, 1e-9)
    bits = -jnp.log(p) * jnp.float32(_INV_LN2)

    # Mask rows beyond the real M (row padding); lane padding is inert because
    # padded scale==0 -> clamped 1e-6 -> p==1 -> 0 bits.
    row = i * tm + jax.lax.broadcasted_iota(jnp.int32, y.shape, 0)
    bits = jnp.where(row < m_valid, bits, 0.0)
    bits_ref[...] = bits_ref[...] + jnp.sum(bits)


def _sub_kernel(a_ref, b_ref, o_ref):
    o_ref[...] = a_ref[...] - b_ref[...]


def _add_clamp_kernel(a_ref, b_ref, o_ref):
    o_ref[...] = jnp.clip(a_ref[...] + b_ref[...], 0.0, 1.0)


def _warp_combine_kernel(v00, v01, v10, v11, w00, w01, w10, w11, o_ref):
    o_ref[...] = (v00[...] * w00[...] + v01[...] * w01[...]
                  + v10[...] * w10[...] + v11[...] * w11[...])


# ---------------------------------------------------------------------------
# Tiled fused matmul (the conv hot path)
# ---------------------------------------------------------------------------
def matmul_bias_act(a, w, b, act=None, tile_m=512):
    """a:(M,K) f32 @ w:(K,O) bf16 + b:(O,) f32, fused activation.

    K and O are zero-padded to multiples of 128 (lane-dense MXU passes and
    unmasked stores); M is padded to the row-tile. Grid is (M/tm, O/128),
    both axes parallel (2-TC sharding on v7x). K stays un-tiled (it is small:
    C*kh*kw), so no cross-step accumulator is needed.
    """
    m, k = a.shape
    k2, o = w.shape
    assert k == k2
    kp = _round_up(k, _LANE)
    op = _round_up(o, _LANE)
    tm = min(tile_m, _round_up(m, 8))
    mp = _round_up(m, tm)
    to = _LANE

    a_p = jnp.pad(a, ((0, mp - m), (0, kp - k))).astype(jnp.bfloat16)
    w_p = jnp.pad(w.astype(jnp.bfloat16), ((0, kp - k), (0, op - o)))
    b_p = jnp.pad(b.astype(jnp.float32), (0, op - o)).reshape(1, op)

    kern = functools.partial(_matmul_bias_act_kernel, act=act)
    out = pl.pallas_call(
        kern,
        out_shape=jax.ShapeDtypeStruct((mp, op), jnp.float32),
        grid=(mp // tm, op // to),
        in_specs=[
            pl.BlockSpec((tm, kp), lambda i, j: (i, 0)),
            pl.BlockSpec((kp, to), lambda i, j: (0, j)),
            pl.BlockSpec((1, to), lambda i, j: (0, j)),
        ],
        out_specs=pl.BlockSpec((tm, to), lambda i, j: (i, j)),
        compiler_params=pltpu.CompilerParams(
            dimension_semantics=("parallel", "parallel"),
            vmem_limit_bytes=48 * 1024 * 1024,   # safe on v7x (64 MiB phys)
        ),
    )(a_p, w_p, b_p)
    return out[:m, :o]


# ---------------------------------------------------------------------------
# Tiled elementwise wrapper (sub / add+clamp / warp combine)
# ---------------------------------------------------------------------------
def _ew_call(kernel, *xs, tile_rows=512):
    shape = xs[0].shape
    total = int(np.prod(shape))
    rows = -(-total // _LANE)
    tm = min(tile_rows, _round_up(rows, 8))
    rows_p = _round_up(rows, tm)

    def prep(x):
        flat = x.reshape(-1).astype(jnp.float32)
        flat = jnp.pad(flat, (0, rows_p * _LANE - total))
        return flat.reshape(rows_p, _LANE)

    x2 = [prep(x) for x in xs]
    out = pl.pallas_call(
        kernel,
        out_shape=jax.ShapeDtypeStruct((rows_p, _LANE), jnp.float32),
        grid=(rows_p // tm,),
        in_specs=[pl.BlockSpec((tm, _LANE), lambda i: (i, 0)) for _ in x2],
        out_specs=pl.BlockSpec((tm, _LANE), lambda i: (i, 0)),
        compiler_params=pltpu.CompilerParams(dimension_semantics=("parallel",)),
    )(*x2)
    return out.reshape(-1)[:total].reshape(shape)


def pallas_sub(a, b):
    return _ew_call(_sub_kernel, a, b)


def pallas_add_clamp(a, b):
    return _ew_call(_add_clamp_kernel, a, b)


# ---------------------------------------------------------------------------
# Fused round + rate (logistic entropy model), tiled reduction
# ---------------------------------------------------------------------------
def pallas_round_rate(y, scale, tile_m=256):
    """y: NHWC latent. scale: same-shape tensor OR per-channel (C,) vector.

    Returns (round(y), total bits = sum(-log2 p(round(y)))).
    """
    shape = y.shape
    c = shape[-1]
    m = int(np.prod(shape[:-1]))
    cp = _round_up(c, _LANE)
    tm = min(tile_m, _round_up(m, 8))
    mp = _round_up(m, tm)

    y2 = jnp.pad(y.reshape(m, c).astype(jnp.float32),
                 ((0, mp - m), (0, cp - c)))
    if scale.ndim == 1:
        # per-channel factorized scale: broadcast inside the kernel, never
        # materialized at latent size in HBM.
        s2 = jnp.pad(scale.reshape(1, c).astype(jnp.float32),
                     ((0, 0), (0, cp - c)))
        s_spec = pl.BlockSpec((1, cp), lambda i: (0, 0))
    else:
        s2 = jnp.pad(scale.reshape(m, c).astype(jnp.float32),
                     ((0, mp - m), (0, cp - c)))
        s_spec = pl.BlockSpec((tm, cp), lambda i: (i, 0))

    kern = functools.partial(_round_rate_kernel, m_valid=m, tm=tm)
    y_hat, bits = pl.pallas_call(
        kern,
        out_shape=(jax.ShapeDtypeStruct((mp, cp), jnp.float32),
                   jax.ShapeDtypeStruct((1, 1), jnp.float32)),
        grid=(mp // tm,),
        in_specs=[pl.BlockSpec((tm, cp), lambda i: (i, 0)), s_spec],
        out_specs=(pl.BlockSpec((tm, cp), lambda i: (i, 0)),
                   pl.BlockSpec((1, 1), lambda i: (0, 0))),
        compiler_params=pltpu.CompilerParams(dimension_semantics=("arbitrary",)),
    )(y2, s2)
    return y_hat[:m, :c].reshape(shape), bits[0, 0]


# ---------------------------------------------------------------------------
# Convolution via im2col (glue) + tiled Pallas matmul (hot path), NHWC layout
# ---------------------------------------------------------------------------
# TODO(synk): fuse the im2col window extraction into the Pallas kernel
# (tap-loop over a spatially tiled NHWC block) to remove the kh*kw HBM
# read-amplification; left as XLA glue here.
def im2col_nhwc(x, kh, kw, stride, pad):
    n, h, w, c = x.shape
    xp = jnp.pad(x, ((0, 0), (pad, pad), (pad, pad), (0, 0)))
    ho = (h + 2 * pad - kh) // stride + 1
    wo = (w + 2 * pad - kw) // stride + 1
    cols = []
    for dy in range(kh):
        for dx in range(kw):
            cols.append(xp[:, dy:dy + stride * ho:stride,
                           dx:dx + stride * wo:stride, :])
    cols = jnp.concatenate(cols, axis=-1)          # (N, Ho, Wo, kh*kw*C)
    return cols.reshape(n * ho * wo, kh * kw * c), ho, wo


def conv2d(x, p, *, stride=1, pad=1, act=None):
    """x: NHWC, p['w']: (kh*kw*C, O) bf16, p['b']: (O,) f32 -> NHWC output."""
    n, h, w, c = x.shape
    k_in, c_out = p["w"].shape
    kh = int(round(np.sqrt(k_in // c)))
    cols, ho, wo = im2col_nhwc(x, kh, kh, stride, pad)
    out = matmul_bias_act(cols, p["w"], p["b"], act=act)
    return out.reshape(n, ho, wo, c_out)


def upsample2x(x):
    # TODO(synk): fold nearest-neighbor upsample into the following conv's
    # addressing instead of materializing the 4x activation.
    return jnp.repeat(jnp.repeat(x, 2, axis=1), 2, axis=2)


# ---------------------------------------------------------------------------
# Parameters (deterministic synthetic init, weights stored bf16)
# ---------------------------------------------------------------------------
def _conv_params(key, c_in, k, c_out):
    kw_, kb_ = jax.random.split(key)
    fan_in = c_in * k * k
    w = (jax.random.normal(kw_, (fan_in, c_out), jnp.float32)
         / np.sqrt(fan_in)).astype(jnp.bfloat16)
    b = 0.01 * jax.random.normal(kb_, (c_out,), jnp.float32)
    return {"w": w, "b": b}


def init_video_codec_params(key, motion_latent=32, residual_latent=32,
                            motion_hyper=16, residual_hyper=16, mcn_base=16):
    keys = iter(jax.random.split(key, 32))

    def enc(c_in, lat):
        return {"c1": _conv_params(next(keys), c_in, 5, lat),
                "c2": _conv_params(next(keys), lat, 5, lat)}

    def dec(lat, c_out):
        return {"c1": _conv_params(next(keys), lat, 3, lat),
                "c2": _conv_params(next(keys), lat, 3, c_out)}

    def hyper(lat, hyp):
        return {"henc": _conv_params(next(keys), lat, 3, hyp),
                "hdec": _conv_params(next(keys), hyp, 3, lat),
                "factor_scale_raw": jnp.zeros((hyp,), jnp.float32)}

    return {
        "motion_encoder": enc(2, motion_latent),
        "motion_hyperprior": hyper(motion_latent, motion_hyper),
        "motion_decoder": dec(motion_latent, 2),
        "mcn": {"c1": _conv_params(next(keys), 3 + 2 + 3, 3, mcn_base),
                "c2": _conv_params(next(keys), mcn_base, 3, mcn_base),
                "c3": _conv_params(next(keys), mcn_base, 3, 3)},
        "residual_encoder": enc(3, residual_latent),
        "residual_hyperprior": hyper(residual_latent, residual_hyper),
        "residual_decoder": dec(residual_latent, 3),
    }


# ---------------------------------------------------------------------------
# Sub-modules (all NHWC internally)
# ---------------------------------------------------------------------------
def encoder_forward(p, x):
    h = conv2d(x, p["c1"], stride=2, pad=2, act="relu")
    return conv2d(h, p["c2"], stride=2, pad=2, act=None)


def decoder_forward(p, y):
    h = upsample2x(y)
    h = conv2d(h, p["c1"], stride=1, pad=1, act="relu")
    h = upsample2x(h)
    # final_activation=None in the reference module
    return conv2d(h, p["c2"], stride=1, pad=1, act=None)


def hyperprior_forward(p, y):
    # hyper analysis on |y|
    z = conv2d(jnp.abs(y), p["henc"], stride=2, pad=1, act=None)
    # factorized (per-channel logistic) model, round fused with rate
    fscale = jax.nn.softplus(p["factor_scale_raw"])            # (hyp,)
    z_hat, rate_hyper = pallas_round_rate(z, fscale)
    # hyper synthesis -> conditional scales for the main latents
    sigma = conv2d(upsample2x(z_hat), p["hdec"], stride=1, pad=1, act="softplus")
    y_hat, rate_main = pallas_round_rate(y, sigma)
    return y_hat, rate_main, rate_hyper


def warping_layer(frame, flow):
    """Bilinear backward warp (border padding): 4-tap gather (XLA glue) +
    fused Pallas weighted combine.  O(HW) memory / FLOPs."""
    n, h, w, c = frame.shape
    gy, gx = jnp.meshgrid(jnp.arange(h, dtype=jnp.float32),
                          jnp.arange(w, dtype=jnp.float32), indexing="ij")
    sx = jnp.clip(gx[None] + flow[..., 0], 0.0, w - 1.0)       # (N,H,W)
    sy = jnp.clip(gy[None] + flow[..., 1], 0.0, h - 1.0)

    x0 = jnp.floor(sx)
    y0 = jnp.floor(sy)
    x1 = jnp.minimum(x0 + 1.0, w - 1.0)
    y1 = jnp.minimum(y0 + 1.0, h - 1.0)
    wx1 = sx - x0
    wx0 = 1.0 - wx1
    wy1 = sy - y0
    wy0 = 1.0 - wy1

    x0i, x1i = x0.astype(jnp.int32), x1.astype(jnp.int32)
    y0i, y1i = y0.astype(jnp.int32), y1.astype(jnp.int32)
    flat = frame.reshape(n, h * w, c)

    def gather(yi, xi):
        idx = (yi * w + xi).reshape(n, h * w, 1)
        return jnp.take_along_axis(flat, idx, axis=1).reshape(n, h, w, c)

    v00, v01 = gather(y0i, x0i), gather(y0i, x1i)
    v10, v11 = gather(y1i, x0i), gather(y1i, x1i)

    def bc(wgt):
        return jnp.broadcast_to(wgt[..., None], v00.shape)

    return _ew_call(_warp_combine_kernel,
                    v00, v01, v10, v11,
                    bc(wy0 * wx0), bc(wy0 * wx1), bc(wy1 * wx0), bc(wy1 * wx1))


def mcn_forward(p, warped, flow_rec, frame1):
    x = jnp.concatenate([warped, flow_rec, frame1], axis=-1)   # channel concat
    h = conv2d(x, p["c1"], stride=1, pad=1, act="relu")
    h = conv2d(h, p["c2"], stride=1, pad=1, act="relu")
    return conv2d(h, p["c3"], stride=1, pad=1, act=None)


# ---------------------------------------------------------------------------
# VideoCodec.forward (NCHW at the boundary, NHWC inside)
# ---------------------------------------------------------------------------
def video_codec_forward(params, frame1, frame2, flow12):
    to_nhwc = lambda x: jnp.transpose(x, (0, 2, 3, 1))
    to_nchw = lambda x: jnp.transpose(x, (0, 3, 1, 2))
    f1, f2, fl = to_nhwc(frame1), to_nhwc(frame2), to_nhwc(flow12)

    y_m = encoder_forward(params["motion_encoder"], fl)
    y_m_hat, rate_motion, rate_hyper_motion = hyperprior_forward(
        params["motion_hyperprior"], y_m)
    flow_rec = decoder_forward(params["motion_decoder"], y_m_hat)

    warped_frame1 = warping_layer(f1, flow_rec)
    frame2_mc = mcn_forward(params["mcn"], warped_frame1, flow_rec, f1)

    residual = pallas_sub(f2, frame2_mc)
    y_r = encoder_forward(params["residual_encoder"], residual)
    y_r_hat, rate_residual, rate_hyper_residual = hyperprior_forward(
        params["residual_hyperprior"], y_r)
    residual_rec = decoder_forward(params["residual_decoder"], y_r_hat)

    frame2_rec = pallas_add_clamp(frame2_mc, residual_rec)

    return {
        "frame2_reconstructed": to_nchw(frame2_rec),
        "rate_motion": rate_motion,
        "rate_hyper_motion": rate_hyper_motion,
        "rate_residual": rate_residual,
        "rate_hyper_residual": rate_hyper_residual,
        "flow_reconstructed": to_nchw(flow_rec),
        "frame2_motion_compensated": to_nchw(frame2_mc),
        "residual_reconstructed": to_nchw(residual_rec),
    }
    # TODO(synk): compress_frame / decompress_frame use the `constriction`
    # range coder (bitstream I/O) and have no Pallas equivalent.


if __name__ == "__main__":
    key = jax.random.PRNGKey(0)
    kp_, k1, k2, k3 = jax.random.split(key, 4)
    params = init_video_codec_params(kp_)

    N, H, W = 2, 16, 16
    frame1 = jax.random.uniform(k1, (N, 3, H, W), jnp.float32)
    frame2 = jax.random.uniform(k2, (N, 3, H, W), jnp.float32)
    flow12 = 2.0 * jax.random.normal(k3, (N, 2, H, W), jnp.float32)

    out = jax.jit(video_codec_forward)(params, frame1, frame2, flow12)
    jax.block_until_ready(out)

    assert out["frame2_reconstructed"].shape == (N, 3, H, W)
    assert out["flow_reconstructed"].shape == (N, 2, H, W)
    assert out["frame2_motion_compensated"].shape == (N, 3, H, W)
    assert out["rate_motion"].shape == ()
    assert bool(jnp.all(jnp.isfinite(out["frame2_reconstructed"])))
    print("KERNEL_OK")
</pallas_src>

<mosaic_0001>
module attributes {stable_mosaic.version = 11 : i64} {
  func.func @_matmul_bias_act_kernel(%arg0: i32, %arg1: i32, %arg2: memref<128x128xbf16, #tpu.memory_space<vmem>>, %arg3: memref<128x128xbf16, #tpu.memory_space<vmem>>, %arg4: memref<1x128xf32, #tpu.memory_space<vmem>>, %arg5: memref<128x128xf32, #tpu.memory_space<vmem>>) attributes {dimension_semantics = [#tpu.dimension_semantics<parallel>, #tpu.dimension_semantics<parallel>], iteration_bounds = array<i64: 1, 1>, scalar_prefetch = 0 : i64, scratch_operands = 0 : i64, tpu.core_type = #tpu.core_type<tc>, window_params = [{transform_indices = @transform_0, window_bounds = array<i64: 128, 128>}, {transform_indices = @transform_1, window_bounds = array<i64: 128, 128>}, {transform_indices = @transform_2, window_bounds = array<i64: 1, 128>}, {transform_indices = @transform_3, window_bounds = array<i64: 128, 128>}]} {
    %c0 = arith.constant 0 : index
    %c0_0 = arith.constant 0 : index
    %0 = vector.load %arg2[%c0, %c0_0] : memref<128x128xbf16, #tpu.memory_space<vmem>>, vector<128x128xbf16>
    %c0_1 = arith.constant 0 : index
    %c0_2 = arith.constant 0 : index
    %1 = vector.load %arg3[%c0_1, %c0_2] : memref<128x128xbf16, #tpu.memory_space<vmem>>, vector<128x128xbf16>
    %cst = arith.constant dense<0.000000e+00> : vector<128x128xf32>
    %2 = tpu.matmul %0, %1, %cst {dimension_numbers = #tpu.dot_dimension_numbers<[1], [0], [0], [1], [0, 0, 1, 1], [], []>} : vector<128x128xbf16>, vector<128x128xbf16>, vector<128x128xf32> -> vector<128x128xf32>
    %c0_3 = arith.constant 0 : index
    %c0_4 = arith.constant 0 : index
    %3 = vector.load %arg4[%c0_3, %c0_4] : memref<1x128xf32, #tpu.memory_space<vmem>>, vector<1x128xf32>
    %4 = vector.broadcast %3 : vector<1x128xf32> to vector<128x128xf32>
    %5 = arith.addf %2, %4 : vector<128x128xf32>
    %cst_5 = arith.constant 0.000000e+00 : f32
    %6 = vector.broadcast %cst_5 : f32 to vector<128x128xf32>
    %7 = arith.maximumf %5, %6 : vector<128x128xf32>
    %c0_6 = arith.constant 0 : index
    %c0_7 = arith.constant 0 : index
    %8 = vector.load %arg5[%c0_6, %c0_7] : memref<128x128xf32, #tpu.memory_space<vmem>>, vector<128x128xf32>
    tpu.vector_store %arg5[%c0_6, %c0_7], %7 {strides = array<i32>} : memref<128x128xf32, #tpu.memory_space<vmem>>, vector<128x128xf32>,
    return
  }
  func.func @transform_0(%arg0: i32, %arg1: i32) -> (i32, i32) {
    %c0_i32 = arith.constant 0 : i32
    %c0_i32_0 = arith.constant 0 : i32
    return %arg0, %c0_i32 : i32, i32
  }
  func.func @transform_1(%arg0: i32, %arg1: i32) -> (i32, i32) {
    %c0_i32 = arith.constant 0 : i32
    %c0_i32_0 = arith.constant 0 : i32
    return %c0_i32, %arg1 : i32, i32
  }
  func.func @transform_2(%arg0: i32, %arg1: i32) -> (i32, i32) {
    %c0_i32 = arith.constant 0 : i32
    %c0_i32_0 = arith.constant 0 : i32
    return %c0_i32, %arg1 : i32, i32
  }
  func.func @transform_3(%arg0: i32, %arg1: i32) -> (i32, i32) {
    %c0_i32 = arith.constant 0 : i32
    return %arg0, %arg1 : i32, i32
  }
}

module attributes {stable_mosaic.version = 11 : i64} {
  func.func @_matmul_bias_act_kernel(%arg0: i32, %arg1: i32, %arg2: memref<32x896xbf16, #tpu.memory_space<vmem>>, %arg3: memref<896x128xbf16, #tpu.memory_space<vmem>>, %arg4: memref<1x128xf32, #tpu.memory_space<vmem>>, %arg5: memref<32x128xf32, #tpu.memory_space<vmem>>) attributes {dimension_semantics = [#tpu.dimension_semantics<parallel>, #tpu.dimension_semantics<parallel>], iteration_bounds = array<i64: 1, 1>, scalar_prefetch = 0 : i64, scratch_operands = 0 : i64, tpu.core_type = #tpu.core_type<tc>, window_params = [{transform_indices = @transform_0, window_bounds = array<i64: 32, 896>}, {transform_indices = @transform_1, window_bounds = array<i64: 896, 128>}, {transform_indices = @transform_2, window_bounds = array<i64: 1, 128>}, {transform_indices = @transform_3, window_bounds = array<i64: 32, 128>}]} {
    %c0 = arith.constant 0 : index
    %c0_0 = arith.constant 0 : index
    %0 = vector.load %arg2[%c0, %c0_0] : memref<32x896xbf16, #tpu.memory_space<vmem>>, vector<32x896xbf16>
    %c0_1 = arith.constant 0 : index
    %c0_2 = arith.constant 0 : index
    %1 = vector.load %arg3[%c0_1, %c0_2] : memref<896x128xbf16, #tpu.memory_space<vmem>>, vector<896x128xbf16>
    %cst = arith.constant dense<0.000000e+00> : vector<32x128xf32>
    %2 = tpu.matmul %0, %1, %cst {dimension_numbers = #tpu.dot_dimension_numbers<[1], [0], [0], [1], [0, 0, 1, 1], [], []>} : vector<32x896xbf16>, vector<896x128xbf16>, vector<32x128xf32> -> vector<32x128xf32>
    %c0_3 = arith.constant 0 : index
    %c0_4 = arith.constant 0 : index
    %3 = vector.load %arg4[%c0_3, %c0_4] : memref<1x128xf32, #tpu.memory_space<vmem>>, vector<1x128xf32>
    %4 = vector.broadcast %3 : vector<1x128xf32> to vector<32x128xf32>
    %5 = arith.addf %2, %4 : vector<32x128xf32>
    %c0_5 = arith.constant 0 : index
    %c0_6 = arith.constant 0 : index
    %6 = vector.load %arg5[%c0_5, %c0_6] : memref<32x128xf32, #tpu.memory_space<vmem>>, vector<32x128xf32>
    tpu.vector_store %arg5[%c0_5, %c0_6], %5 {strides = array<i32>} : memref<32x128xf32, #tpu.memory_space<vmem>>, vector<32x128xf32>,
    return
  }
  func.func @transform_0(%arg0: i32, %arg1: i32) -> (i32, i32) {
    %c0_i32 = arith.constant 0 : i32
    %c0_i32_0 = arith.constant 0 : i32
    return %arg0, %c0_i32 : i32, i32
  }
  func.func @transform_1(%arg0: i32, %arg1: i32) -> (i32, i32) {
    %c0_i32 = arith.constant 0 : i32
    %c0_i32_0 = arith.constant 0 : i32
    return %c0_i32, %arg1 : i32, i32
  }
  func.func @transform_2(%arg0: i32, %arg1: i32) -> (i32, i32) {
    %c0_i32 = arith.constant 0 : i32
    %c0_i32_0 = arith.constant 0 : i32
    return %c0_i32, %arg1 : i32, i32
  }
  func.func @transform_3(%arg0: i32, %arg1: i32) -> (i32, i32) {
    %c0_i32 = arith.constant 0 : i32
    return %arg0, %arg1 : i32, i32
  }
}

module attributes {stable_mosaic.version = 11 : i64} {
  func.func @_round_rate_kernel(%arg0: i32, %arg1: memref<8x128xf32, #tpu.memory_space<vmem>>, %arg2: memref<1x128xf32, #tpu.memory_space<vmem>>, %arg3: memref<8x128xf32, #tpu.memory_space<vmem>>, %arg4: memref<1x1xf32, #tpu.memory_space<vmem>>) attributes {dimension_semantics = [#tpu.dimension_semantics<arbitrary>], iteration_bounds = array<i64: 1>, scalar_prefetch = 0 : i64, scratch_operands = 0 : i64, tpu.core_type = #tpu.core_type<tc>, window_params = [{transform_indices = @transform_0, window_bounds = array<i64: 8, 128>}, {pipeline_mode = #tpu.pipeline_mode<synchronous>, transform_indices = @transform_1, window_bounds = array<i64: 1, 128>}, {transform_indices = @transform_2, window_bounds = array<i64: 8, 128>}, {pipeline_mode = #tpu.pipeline_mode<synchronous>, transform_indices = @transform_3, window_bounds = array<i64: 1, 1>}]} {
    %c0_i32 = arith.constant 0 : i32
    %0 = arith.cmpi eq, %arg0, %c0_i32 : i32
    %1 = arith.extui %0 : i1 to i32
    %c0_i32_0 = arith.constant 0 : i32
    %2 = arith.cmpi ne, %1, %c0_i32_0 : i32
    scf.if %2 {
      %cst_24 = arith.constant 0.000000e+00 : f32
      %55 = vector.broadcast %cst_24 : f32 to vector<1x1xf32>
      %c0_25 = arith.constant 0 : index
      %c0_26 = arith.constant 0 : index
      %56 = vector.load %arg4[%c0_25, %c0_26] : memref<1x1xf32, #tpu.memory_space<vmem>>, vector<1x1xf32>
      tpu.vector_store %arg4[%c0_25, %c0_26], %55 {strides = array<i32>} : memref<1x1xf32, #tpu.memory_space<vmem>>, vector<1x1xf32>,
    } else {
    }
    %c0 = arith.constant 0 : index
    %c0_1 = arith.constant 0 : index
    %3 = vector.load %arg1[%c0, %c0_1] : memref<8x128xf32, #tpu.memory_space<vmem>>, vector<8x128xf32>
    %4 = math.roundeven %3 : vector<8x128xf32>
    %c0_2 = arith.constant 0 : index
    %c0_3 = arith.constant 0 : index
    %5 = vector.load %arg3[%c0_2, %c0_3] : memref<8x128xf32, #tpu.memory_space<vmem>>, vector<8x128xf32>
    tpu.vector_store %arg3[%c0_2, %c0_3], %4 {strides = array<i32>} : memref<8x128xf32, #tpu.memory_space<vmem>>, vector<8x128xf32>,
    %c0_4 = arith.constant 0 : index
    %c0_5 = arith.constant 0 : index
    %6 = vector.load %arg2[%c0_4, %c0_5] : memref<1x128xf32, #tpu.memory_space<vmem>>, vector<1x128xf32>
    %cst = arith.constant 9.99999997E-7 : f32
    %7 = vector.broadcast %cst : f32 to vector<1x128xf32>
    %8 = arith.maximumf %6, %7 : vector<1x128xf32>
    %cst_6 = arith.constant 5.000000e-01 : f32
    %9 = vector.broadcast %cst_6 : f32 to vector<8x128xf32>
    %10 = arith.addf %4, %9 : vector<8x128xf32>
    %cst_7 = arith.constant 0.000000e+00 : f32
    %11 = vector.broadcast %cst_7 : f32 to vector<8x128xf32>
    %12 = arith.subf %11, %10 : vector<8x128xf32>
    %13 = vector.broadcast %8 : vector<1x128xf32> to vector<8x128xf32>
    %14 = arith.divf %12, %13 : vector<8x128xf32>
    %15 = math.exp %14 : vector<8x128xf32>
    %cst_8 = arith.constant 1.000000e+00 : f32
    %16 = vector.broadcast %cst_8 : f32 to vector<8x128xf32>
    %17 = arith.addf %16, %15 : vector<8x128xf32>
    %cst_9 = arith.constant 1.000000e+00 : f32
    %18 = vector.broadcast %cst_9 : f32 to vector<8x128xf32>
    %19 = arith.divf %18, %17 : vector<8x128xf32>
    %cst_10 = arith.constant 5.000000e-01 : f32
    %20 = vector.broadcast %cst_10 : f32 to vector<8x128xf32>
    %21 = arith.subf %4, %20 : vector<8x128xf32>
    %cst_11 = arith.constant 0.000000e+00 : f32
    %22 = vector.broadcast %cst_11 : f32 to vector<8x128xf32>
    %23 = arith.subf %22, %21 : vector<8x128xf32>
    %24 = vector.broadcast %8 : vector<1x128xf32> to vector<8x128xf32>
    %25 = arith.divf %23, %24 : vector<8x128xf32>
    %26 = math.exp %25 : vector<8x128xf32>
    %cst_12 = arith.constant 1.000000e+00 : f32
    %27 = vector.broadcast %cst_12 : f32 to vector<8x128xf32>
    %28 = arith.addf %27, %26 : vector<8x128xf32>
    %cst_13 = arith.constant 1.000000e+00 : f32
    %29 = vector.broadcast %cst_13 : f32 to vector<8x128xf32>
    %30 = arith.divf %29, %28 : vector<8x128xf32>
    %31 = arith.subf %19, %30 : vector<8x128xf32>
    %cst_14 = arith.constant 9.99999971E-10 : f32
    %32 = vector.broadcast %cst_14 : f32 to vector<8x128xf32>
    %33 = arith.maximumf %31, %32 : vector<8x128xf32>
    %34 = math.log %33 : vector<8x128xf32>
    %cst_15 = arith.constant 0.000000e+00 : f32
    %35 = vector.broadcast %cst_15 : f32 to vector<8x128xf32>
    %36 = arith.subf %35, %34 : vector<8x128xf32>
    %cst_16 = arith.constant 1.44269502 : f32
    %37 = vector.broadcast %cst_16 : f32 to vector<8x128xf32>
    %38 = arith.mulf %36, %37 : vector<8x128xf32>
    %c8_i32 = arith.constant 8 : i32
    %39 = arith.muli %arg0, %c8_i32 : i32
    %40 = tpu.iota {dimensions = array<i32: 0>} : vector<8x128xi32>
    %41 = vector.broadcast %39 : i32 to vector<8x128xi32>
    %42 = arith.addi %41, %40 : vector<8x128xi32>
    %c8_i32_17 = arith.constant 8 : i32
    %43 = vector.broadcast %c8_i32_17 : i32 to vector<8x128xi32>
    %44 = arith.cmpi slt, %42, %43 : vector<8x128xi32>
    %cst_18 = arith.constant 0.000000e+00 : f32
    %45 = vector.broadcast %cst_18 : f32 to vector<8x128xf32>
    %46 = arith.select %44, %38, %45 : vector<8x128xi1>, vector<8x128xf32>
    %c0_19 = arith.constant 0 : index
    %c0_20 = arith.constant 0 : index
    %47 = vector.load %arg4[%c0_19, %c0_20] : memref<1x1xf32, #tpu.memory_space<vmem>>, vector<1x1xf32>
    %48 = vector.shape_cast %46 : vector<8x128xf32> to vector<1x8x128xf32>
    %cst_21 = arith.constant dense<0.000000e+00> : vector<1xf32>
    %49 = vector.multi_reduction <add>, %48, %cst_21 [1, 2] : vector<1x8x128xf32> to vector<1xf32>
    %50 = vector.shape_cast %49 : vector<1xf32> to vector<1x1x1xf32>
    %51 = vector.extract %50[0, 0, 0] : f32 from vector<1x1x1xf32>
    %52 = vector.broadcast %51 : f32 to vector<1x1xf32>
    %53 = arith.addf %47, %52 : vector<1x1xf32>
    %c0_22 = arith.constant 0 : index
    %c0_23 = arith.constant 0 : index
    %54 = vector.load %arg4[%c0_22, %c0_23] : memref<1x1xf32, #tpu.memory_space<vmem>>, vector<1x1xf32>
    tpu.vector_store %arg4[%c0_22, %c0_23], %53 {strides = array<i32>} : memref<1x1xf32, #tpu.memory_space<vmem>>, vector<1x1xf32>,
    return
  }
  func.func @transform_0(%arg0: i32) -> (i32, i32) {
    %c0_i32 = arith.constant 0 : i32
    %c0_i32_0 = arith.constant 0 : i32
    return %arg0, %c0_i32 : i32, i32
  }
  func.func @transform_1(%arg0: i32) -> (i32, i32) {
    %c0_i32 = arith.constant 0 : i32
    %c0_i32_0 = arith.constant 0 : i32
    %c0_i32_1 = arith.constant 0 : i32
    return %c0_i32, %c0_i32_0 : i32, i32
  }
  func.func @transform_2(%arg0: i32) -> (i32, i32) {
    %c0_i32 = arith.constant 0 : i32
    %c0_i32_0 = arith.constant 0 : i32
    return %arg0, %c0_i32 : i32, i32
  }
  func.func @transform_3(%arg0: i32) -> (i32, i32) {
    %c0_i32 = arith.constant 0 : i32
    %c0_i32_0 = arith.constant 0 : i32
    %c0_i32_1 = arith.constant 0 : i32
    return %c0_i32, %c0_i32_0 : i32, i32
  }
}

module attributes {stable_mosaic.version = 11 : i64} {
  func.func @_matmul_bias_act_kernel(%arg0: i32, %arg1: i32, %arg2: memref<8x384xbf16, #tpu.memory_space<vmem>>, %arg3: memref<384x128xbf16, #tpu.memory_space<vmem>>, %arg4: memref<1x128xf32, #tpu.memory_space<vmem>>, %arg5: memref<8x128xf32, #tpu.memory_space<vmem>>) attributes {dimension_semantics = [#tpu.dimension_semantics<parallel>, #tpu.dimension_semantics<parallel>], iteration_bounds = array<i64: 1, 1>, scalar_prefetch = 0 : i64, scratch_operands = 0 : i64, tpu.core_type = #tpu.core_type<tc>, window_params = [{transform_indices = @transform_0, window_bounds = array<i64: 8, 384>}, {transform_indices = @transform_1, window_bounds = array<i64: 384, 128>}, {transform_indices = @transform_2, window_bounds = array<i64: 1, 128>}, {transform_indices = @transform_3, window_bounds = array<i64: 8, 128>}]} {
    %c0 = arith.constant 0 : index
    %c0_0 = arith.constant 0 : index
    %0 = vector.load %arg2[%c0, %c0_0] : memref<8x384xbf16, #tpu.memory_space<vmem>>, vector<8x384xbf16>
    %c0_1 = arith.constant 0 : index
    %c0_2 = arith.constant 0 : index
    %1 = vector.load %arg3[%c0_1, %c0_2] : memref<384x128xbf16, #tpu.memory_space<vmem>>, vector<384x128xbf16>
    %cst = arith.constant dense<0.000000e+00> : vector<8x128xf32>
    %2 = tpu.matmul %0, %1, %cst {dimension_numbers = #tpu.dot_dimension_numbers<[1], [0], [0], [1], [0, 0, 1, 1], [], []>} : vector<8x384xbf16>, vector<384x128xbf16>, vector<8x128xf32> -> vector<8x128xf32>
    %c0_3 = arith.constant 0 : index
    %c0_4 = arith.constant 0 : index
    %3 = vector.load %arg4[%c0_3, %c0_4] : memref<1x128xf32, #tpu.memory_space<vmem>>, vector<1x128xf32>
    %4 = vector.broadcast %3 : vector<1x128xf32> to vector<8x128xf32>
    %5 = arith.addf %2, %4 : vector<8x128xf32>
    %c0_5 = arith.constant 0 : index
    %c0_6 = arith.constant 0 : index
    %6 = vector.load %arg5[%c0_5, %c0_6] : memref<8x128xf32, #tpu.memory_space<vmem>>, vector<8x128xf32>
    tpu.vector_store %arg5[%c0_5, %c0_6], %5 {strides = array<i32>} : memref<8x128xf32, #tpu.memory_space<vmem>>, vector<8x128xf32>,
    return
  }
  func.func @transform_0(%arg0: i32, %arg1: i32) -> (i32, i32) {
    %c0_i32 = arith.constant 0 : i32
    %c0_i32_0 = arith.constant 0 : i32
    return %arg0, %c0_i32 : i32, i32
  }
  func.func @transform_1(%arg0: i32, %arg1: i32) -> (i32, i32) {
    %c0_i32 = arith.constant 0 : i32
    %c0_i32_0 = arith.constant 0 : i32
    return %c0_i32, %arg1 : i32, i32
  }
  func.func @transform_2(%arg0: i32, %arg1: i32) -> (i32, i32) {
    %c0_i32 = arith.constant 0 : i32
    %c0_i32_0 = arith.constant 0 : i32
    return %c0_i32, %arg1 : i32, i32
  }
  func.func @transform_3(%arg0: i32, %arg1: i32) -> (i32, i32) {
    %c0_i32 = arith.constant 0 : i32
    return %arg0, %arg1 : i32, i32
  }
}

module attributes {stable_mosaic.version = 11 : i64} {
  func.func @_matmul_bias_act_kernel(%arg0: i32, %arg1: i32, %arg2: memref<32x256xbf16, #tpu.memory_space<vmem>>, %arg3: memref<256x128xbf16, #tpu.memory_space<vmem>>, %arg4: memref<1x128xf32, #tpu.memory_space<vmem>>, %arg5: memref<32x128xf32, #tpu.memory_space<vmem>>) attributes {dimension_semantics = [#tpu.dimension_semantics<parallel>, #tpu.dimension_semantics<parallel>], iteration_bounds = array<i64: 1, 1>, scalar_prefetch = 0 : i64, scratch_operands = 0 : i64, tpu.core_type = #tpu.core_type<tc>, window_params = [{transform_indices = @transform_0, window_bounds = array<i64: 32, 256>}, {transform_indices = @transform_1, window_bounds = array<i64: 256, 128>}, {transform_indices = @transform_2, window_bounds = array<i64: 1, 128>}, {transform_indices = @transform_3, window_bounds = array<i64: 32, 128>}]} {
    %c0 = arith.constant 0 : index
    %c0_0 = arith.constant 0 : index
    %0 = vector.load %arg2[%c0, %c0_0] : memref<32x256xbf16, #tpu.memory_space<vmem>>, vector<32x256xbf16>
    %c0_1 = arith.constant 0 : index
    %c0_2 = arith.constant 0 : index
    %1 = vector.load %arg3[%c0_1, %c0_2] : memref<256x128xbf16, #tpu.memory_space<vmem>>, vector<256x128xbf16>
    %cst = arith.constant dense<0.000000e+00> : vector<32x128xf32>
    %2 = tpu.matmul %0, %1, %cst {dimension_numbers = #tpu.dot_dimension_numbers<[1], [0], [0], [1], [0, 0, 1, 1], [], []>} : vector<32x256xbf16>, vector<256x128xbf16>, vector<32x128xf32> -> vector<32x128xf32>
    %c0_3 = arith.constant 0 : index
    %c0_4 = arith.constant 0 : index
    %3 = vector.load %arg4[%c0_3, %c0_4] : memref<1x128xf32, #tpu.memory_space<vmem>>, vector<1x128xf32>
    %4 = vector.broadcast %3 : vector<1x128xf32> to vector<32x128xf32>
    %5 = arith.addf %2, %4 : vector<32x128xf32>
    %cst_5 = arith.constant 0.000000e+00 : f32
    %6 = vector.broadcast %cst_5 : f32 to vector<32x128xf32>
    %7 = arith.maximumf %5, %6 : vector<32x128xf32>
    %8 = math.absf %5 : vector<32x128xf32>
    %cst_6 = arith.constant 0.000000e+00 : f32
    %9 = vector.broadcast %cst_6 : f32 to vector<32x128xf32>
    %10 = arith.subf %9, %8 : vector<32x128xf32>
    %11 = math.exp %10 : vector<32x128xf32>
    %cst_7 = arith.constant 1.000000e+00 : f32
    %12 = vector.broadcast %cst_7 : f32 to vector<32x128xf32>
    %13 = arith.addf %12, %11 : vector<32x128xf32>
    %14 = math.log %13 : vector<32x128xf32>
    %15 = arith.addf %7, %14 : vector<32x128xf32>
    %c0_8 = arith.constant 0 : index
    %c0_9 = arith.constant 0 : index
    %16 = vector.load %arg5[%c0_8, %c0_9] : memref<32x128xf32, #tpu.memory_space<vmem>>, vector<32x128xf32>
    tpu.vector_store %arg5[%c0_8, %c0_9], %15 {strides = array<i32>} : memref<32x128xf32, #tpu.memory_space<vmem>>, vector<32x128xf32>,
    return
  }
  func.func @transform_0(%arg0: i32, %arg1: i32) -> (i32, i32) {
    %c0_i32 = arith.constant 0 : i32
    %c0_i32_0 = arith.constant 0 : i32
    return %arg0, %c0_i32 : i32, i32
  }
  func.func @transform_1(%arg0: i32, %arg1: i32) -> (i32, i32) {
    %c0_i32 = arith.constant 0 : i32
    %c0_i32_0 = arith.constant 0 : i32
    return %c0_i32, %arg1 : i32, i32
  }
  func.func @transform_2(%arg0: i32, %arg1: i32) -> (i32, i32) {
    %c0_i32 = arith.constant 0 : i32
    %c0_i32_0 = arith.constant 0 : i32
    return %c0_i32, %arg1 : i32, i32
  }
  func.func @transform_3(%arg0: i32, %arg1: i32) -> (i32, i32) {
    %c0_i32 = arith.constant 0 : i32
    return %arg0, %arg1 : i32, i32
  }
}

module attributes {stable_mosaic.version = 11 : i64} {
  func.func @_round_rate_kernel(%arg0: i32, %arg1: memref<32x128xf32, #tpu.memory_space<vmem>>, %arg2: memref<32x128xf32, #tpu.memory_space<vmem>>, %arg3: memref<32x128xf32, #tpu.memory_space<vmem>>, %arg4: memref<1x1xf32, #tpu.memory_space<vmem>>) attributes {dimension_semantics = [#tpu.dimension_semantics<arbitrary>], iteration_bounds = array<i64: 1>, scalar_prefetch = 0 : i64, scratch_operands = 0 : i64, tpu.core_type = #tpu.core_type<tc>, window_params = [{transform_indices = @transform_0, window_bounds = array<i64: 32, 128>}, {transform_indices = @transform_1, window_bounds = array<i64: 32, 128>}, {transform_indices = @transform_2, window_bounds = array<i64: 32, 128>}, {pipeline_mode = #tpu.pipeline_mode<synchronous>, transform_indices = @transform_3, window_bounds = array<i64: 1, 1>}]} {
    %c0_i32 = arith.constant 0 : i32
    %0 = arith.cmpi eq, %arg0, %c0_i32 : i32
    %1 = arith.extui %0 : i1 to i32
    %c0_i32_0 = arith.constant 0 : i32
    %2 = arith.cmpi ne, %1, %c0_i32_0 : i32
    scf.if %2 {
      %cst_24 = arith.constant 0.000000e+00 : f32
      %53 = vector.broadcast %cst_24 : f32 to vector<1x1xf32>
      %c0_25 = arith.constant 0 : index
      %c0_26 = arith.constant 0 : index
      %54 = vector.load %arg4[%c0_25, %c0_26] : memref<1x1xf32, #tpu.memory_space<vmem>>, vector<1x1xf32>
      tpu.vector_store %arg4[%c0_25, %c0_26], %53 {strides = array<i32>} : memref<1x1xf32, #tpu.memory_space<vmem>>, vector<1x1xf32>,
    } else {
    }
    %c0 = arith.constant 0 : index
    %c0_1 = arith.constant 0 : index
    %3 = vector.load %arg1[%c0, %c0_1] : memref<32x128xf32, #tpu.memory_space<vmem>>, vector<32x128xf32>
    %4 = math.roundeven %3 : vector<32x128xf32>
    %c0_2 = arith.constant 0 : index
    %c0_3 = arith.constant 0 : index
    %5 = vector.load %arg3[%c0_2, %c0_3] : memref<32x128xf32, #tpu.memory_space<vmem>>, vector<32x128xf32>
    tpu.vector_store %arg3[%c0_2, %c0_3], %4 {strides = array<i32>} : memref<32x128xf32, #tpu.memory_space<vmem>>, vector<32x128xf32>,
    %c0_4 = arith.constant 0 : index
    %c0_5 = arith.constant 0 : index
    %6 = vector.load %arg2[%c0_4, %c0_5] : memref<32x128xf32, #tpu.memory_space<vmem>>, vector<32x128xf32>
    %cst = arith.constant 9.99999997E-7 : f32
    %7 = vector.broadcast %cst : f32 to vector<32x128xf32>
    %8 = arith.maximumf %6, %7 : vector<32x128xf32>
    %cst_6 = arith.constant 5.000000e-01 : f32
    %9 = vector.broadcast %cst_6 : f32 to vector<32x128xf32>
    %10 = arith.addf %4, %9 : vector<32x128xf32>
    %cst_7 = arith.constant 0.000000e+00 : f32
    %11 = vector.broadcast %cst_7 : f32 to vector<32x128xf32>
    %12 = arith.subf %11, %10 : vector<32x128xf32>
    %13 = arith.divf %12, %8 : vector<32x128xf32>
    %14 = math.exp %13 : vector<32x128xf32>
    %cst_8 = arith.constant 1.000000e+00 : f32
    %15 = vector.broadcast %cst_8 : f32 to vector<32x128xf32>
    %16 = arith.addf %15, %14 : vector<32x128xf32>
    %cst_9 = arith.constant 1.000000e+00 : f32
    %17 = vector.broadcast %cst_9 : f32 to vector<32x128xf32>
    %18 = arith.divf %17, %16 : vector<32x128xf32>
    %cst_10 = arith.constant 5.000000e-01 : f32
    %19 = vector.broadcast %cst_10 : f32 to vector<32x128xf32>
    %20 = arith.subf %4, %19 : vector<32x128xf32>
    %cst_11 = arith.constant 0.000000e+00 : f32
    %21 = vector.broadcast %cst_11 : f32 to vector<32x128xf32>
    %22 = arith.subf %21, %20 : vector<32x128xf32>
    %23 = arith.divf %22, %8 : vector<32x128xf32>
    %24 = math.exp %23 : vector<32x128xf32>
    %cst_12 = arith.constant 1.000000e+00 : f32
    %25 = vector.broadcast %cst_12 : f32 to vector<32x128xf32>
    %26 = arith.addf %25, %24 : vector<32x128xf32>
    %cst_13 = arith.constant 1.000000e+00 : f32
    %27 = vector.broadcast %cst_13 : f32 to vector<32x128xf32>
    %28 = arith.divf %27, %26 : vector<32x128xf32>
    %29 = arith.subf %18, %28 : vector<32x128xf32>
    %cst_14 = arith.constant 9.99999971E-10 : f32
    %30 = vector.broadcast %cst_14 : f32 to vector<32x128xf32>
    %31 = arith.maximumf %29, %30 : vector<32x128xf32>
    %32 = math.log %31 : vector<32x128xf32>
    %cst_15 = arith.constant 0.000000e+00 : f32
    %33 = vector.broadcast %cst_15 : f32 to vector<32x128xf32>
    %34 = arith.subf %33, %32 : vector<32x128xf32>
    %cst_16 = arith.constant 1.44269502 : f32
    %35 = vector.broadcast %cst_16 : f32 to vector<32x128xf32>
    %36 = arith.mulf %34, %35 : vector<32x128xf32>
    %c32_i32 = arith.constant 32 : i32
    %37 = arith.muli %arg0, %c32_i32 : i32
    %38 = tpu.iota {dimensions = array<i32: 0>} : vector<32x128xi32>
    %39 = vector.broadcast %37 : i32 to vector<32x128xi32>
    %40 = arith.addi %39, %38 : vector<32x128xi32>
    %c32_i32_17 = arith.constant 32 : i32
    %41 = vector.broadcast %c32_i32_17 : i32 to vector<32x128xi32>
    %42 = arith.cmpi slt, %40, %41 : vector<32x128xi32>
    %cst_18 = arith.constant 0.000000e+00 : f32
    %43 = vector.broadcast %cst_18 : f32 to vector<32x128xf32>
    %44 = arith.select %42, %36, %43 : vector<32x128xi1>, vector<32x128xf32>
    %c0_19 = arith.constant 0 : index
    %c0_20 = arith.constant 0 : index
    %45 = vector.load %arg4[%c0_19, %c0_20] : memref<1x1xf32, #tpu.memory_space<vmem>>, vector<1x1xf32>
    %46 = vector.shape_cast %44 : vector<32x128xf32> to vector<1x32x128xf32>
    %cst_21 = arith.constant dense<0.000000e+00> : vector<1xf32>
    %47 = vector.multi_reduction <add>, %46, %cst_21 [1, 2] : vector<1x32x128xf32> to vector<1xf32>
    %48 = vector.shape_cast %47 : vector<1xf32> to vector<1x1x1xf32>
    %49 = vector.extract %48[0, 0, 0] : f32 from vector<1x1x1xf32>
    %50 = vector.broadcast %49 : f32 to vector<1x1xf32>
    %51 = arith.addf %45, %50 : vector<1x1xf32>
    %c0_22 = arith.constant 0 : index
    %c0_23 = arith.constant 0 : index
    %52 = vector.load %arg4[%c0_22, %c0_23] : memref<1x1xf32, #tpu.memory_space<vmem>>, vector<1x1xf32>
    tpu.vector_store %arg4[%c0_22, %c0_23], %51 {strides = array<i32>} : memref<1x1xf32, #tpu.memory_space<vmem>>, vector<1x1xf32>,
    return
  }
  func.func @transform_0(%arg0: i32) -> (i32, i32) {
    %c0_i32 = arith.constant 0 : i32
    %c0_i32_0 = arith.constant 0 : i32
    return %arg0, %c0_i32 : i32, i32
  }
  func.func @transform_1(%arg0: i32) -> (i32, i32) {
    %c0_i32 = arith.constant 0 : i32
    %c0_i32_0 = arith.constant 0 : i32
    return %arg0, %c0_i32 : i32, i32
  }
  func.func @transform_2(%arg0: i32) -> (i32, i32) {
    %c0_i32 = arith.constant 0 : i32
    %c0_i32_0 = arith.constant 0 : i32
    return %arg0, %c0_i32 : i32, i32
  }
  func.func @transform_3(%arg0: i32) -> (i32, i32) {
    %c0_i32 = arith.constant 0 : i32
    %c0_i32_0 = arith.constant 0 : i32
    %c0_i32_1 = arith.constant 0 : i32
    return %c0_i32, %c0_i32_0 : i32, i32
  }
}

module attributes {stable_mosaic.version = 11 : i64} {
  func.func @_matmul_bias_act_kernel(%arg0: i32, %arg1: i32, %arg2: memref<128x384xbf16, #tpu.memory_space<vmem>>, %arg3: memref<384x128xbf16, #tpu.memory_space<vmem>>, %arg4: memref<1x128xf32, #tpu.memory_space<vmem>>, %arg5: memref<128x128xf32, #tpu.memory_space<vmem>>) attributes {dimension_semantics = [#tpu.dimension_semantics<parallel>, #tpu.dimension_semantics<parallel>], iteration_bounds = array<i64: 1, 1>, scalar_prefetch = 0 : i64, scratch_operands = 0 : i64, tpu.core_type = #tpu.core_type<tc>, window_params = [{transform_indices = @transform_0, window_bounds = array<i64: 128, 384>}, {transform_indices = @transform_1, window_bounds = array<i64: 384, 128>}, {transform_indices = @transform_2, window_bounds = array<i64: 1, 128>}, {transform_indices = @transform_3, window_bounds = array<i64: 128, 128>}]} {
    %c0 = arith.constant 0 : index
    %c0_0 = arith.constant 0 : index
    %0 = vector.load %arg2[%c0, %c0_0] : memref<128x384xbf16, #tpu.memory_space<vmem>>, vector<128x384xbf16>
    %c0_1 = arith.constant 0 : index
    %c0_2 = arith.constant 0 : index
    %1 = vector.load %arg3[%c0_1, %c0_2] : memref<384x128xbf16, #tpu.memory_space<vmem>>, vector<384x128xbf16>
    %cst = arith.constant dense<0.000000e+00> : vector<128x128xf32>
    %2 = tpu.matmul %0, %1, %cst {dimension_numbers = #tpu.dot_dimension_numbers<[1], [0], [0], [1], [0, 0, 1, 1], [], []>} : vector<128x384xbf16>, vector<384x128xbf16>, vector<128x128xf32> -> vector<128x128xf32>
    %c0_3 = arith.constant 0 : index
    %c0_4 = arith.constant 0 : index
    %3 = vector.load %arg4[%c0_3, %c0_4] : memref<1x128xf32, #tpu.memory_space<vmem>>, vector<1x128xf32>
    %4 = vector.broadcast %3 : vector<1x128xf32> to vector<128x128xf32>
    %5 = arith.addf %2, %4 : vector<128x128xf32>
    %cst_5 = arith.constant 0.000000e+00 : f32
    %6 = vector.broadcast %cst_5 : f32 to vector<128x128xf32>
    %7 = arith.maximumf %5, %6 : vector<128x128xf32>
    %c0_6 = arith.constant 0 : index
    %c0_7 = arith.constant 0 : index
    %8 = vector.load %arg5[%c0_6, %c0_7] : memref<128x128xf32, #tpu.memory_space<vmem>>, vector<128x128xf32>
    tpu.vector_store %arg5[%c0_6, %c0_7], %7 {strides = array<i32>} : memref<128x128xf32, #tpu.memory_space<vmem>>, vector<128x128xf32>,
    return
  }
  func.func @transform_0(%arg0: i32, %arg1: i32) -> (i32, i32) {
    %c0_i32 = arith.constant 0 : i32
    %c0_i32_0 = arith.constant 0 : i32
    return %arg0, %c0_i32 : i32, i32
  }
  func.func @transform_1(%arg0: i32, %arg1: i32) -> (i32, i32) {
    %c0_i32 = arith.constant 0 : i32
    %c0_i32_0 = arith.constant 0 : i32
    return %c0_i32, %arg1 : i32, i32
  }
  func.func @transform_2(%arg0: i32, %arg1: i32) -> (i32, i32) {
    %c0_i32 = arith.constant 0 : i32
    %c0_i32_0 = arith.constant 0 : i32
    return %c0_i32, %arg1 : i32, i32
  }
  func.func @transform_3(%arg0: i32, %arg1: i32) -> (i32, i32) {
    %c0_i32 = arith.constant 0 : i32
    return %arg0, %arg1 : i32, i32
  }
}

module attributes {stable_mosaic.version = 11 : i64} {
  func.func @_matmul_bias_act_kernel(%arg0: i32, %arg1: i32, %arg2: memref<512x384xbf16, #tpu.memory_space<vmem>>, %arg3: memref<384x128xbf16, #tpu.memory_space<vmem>>, %arg4: memref<1x128xf32, #tpu.memory_space<vmem>>, %arg5: memref<512x128xf32, #tpu.memory_space<vmem>>) attributes {dimension_semantics = [#tpu.dimension_semantics<parallel>, #tpu.dimension_semantics<parallel>], iteration_bounds = array<i64: 1, 1>, scalar_prefetch = 0 : i64, scratch_operands = 0 : i64, tpu.core_type = #tpu.core_type<tc>, window_params = [{transform_indices = @transform_0, window_bounds = array<i64: 512, 384>}, {transform_indices = @transform_1, window_bounds = array<i64: 384, 128>}, {transform_indices = @transform_2, window_bounds = array<i64: 1, 128>}, {transform_indices = @transform_3, window_bounds = array<i64: 512, 128>}]} {
    %c0 = arith.constant 0 : index
    %c0_0 = arith.constant 0 : index
    %0 = vector.load %arg2[%c0, %c0_0] : memref<512x384xbf16, #tpu.memory_space<vmem>>, vector<512x384xbf16>
    %c0_1 = arith.constant 0 : index
    %c0_2 = arith.constant 0 : index
    %1 = vector.load %arg3[%c0_1, %c0_2] : memref<384x128xbf16, #tpu.memory_space<vmem>>, vector<384x128xbf16>
    %cst = arith.constant dense<0.000000e+00> : vector<512x128xf32>
    %2 = tpu.matmul %0, %1, %cst {dimension_numbers = #tpu.dot_dimension_numbers<[1], [0], [0], [1], [0, 0, 1, 1], [], []>} : vector<512x384xbf16>, vector<384x128xbf16>, vector<512x128xf32> -> vector<512x128xf32>
    %c0_3 = arith.constant 0 : index
    %c0_4 = arith.constant 0 : index
    %3 = vector.load %arg4[%c0_3, %c0_4] : memref<1x128xf32, #tpu.memory_space<vmem>>, vector<1x128xf32>
    %4 = vector.broadcast %3 : vector<1x128xf32> to vector<512x128xf32>
    %5 = arith.addf %2, %4 : vector<512x128xf32>
    %c0_5 = arith.constant 0 : index
    %c0_6 = arith.constant 0 : index
    %6 = vector.load %arg5[%c0_5, %c0_6] : memref<512x128xf32, #tpu.memory_space<vmem>>, vector<512x128xf32>
    tpu.vector_store %arg5[%c0_5, %c0_6], %5 {strides = array<i32>} : memref<512x128xf32, #tpu.memory_space<vmem>>, vector<512x128xf32>,
    return
  }
  func.func @transform_0(%arg0: i32, %arg1: i32) -> (i32, i32) {
    %c0_i32 = arith.constant 0 : i32
    %c0_i32_0 = arith.constant 0 : i32
    return %arg0, %c0_i32 : i32, i32
  }
  func.func @transform_1(%arg0: i32, %arg1: i32) -> (i32, i32) {
    %c0_i32 = arith.constant 0 : i32
    %c0_i32_0 = arith.constant 0 : i32
    return %c0_i32, %arg1 : i32, i32
  }
  func.func @transform_2(%arg0: i32, %arg1: i32) -> (i32, i32) {
    %c0_i32 = arith.constant 0 : i32
    %c0_i32_0 = arith.constant 0 : i32
    return %c0_i32, %arg1 : i32, i32
  }
  func.func @transform_3(%arg0: i32, %arg1: i32) -> (i32, i32) {
    %c0_i32 = arith.constant 0 : i32
    return %arg0, %arg1 : i32, i32
  }
}

module attributes {stable_mosaic.version = 11 : i64} {
  func.func @_warp_combine_kernel(%arg0: i32, %arg1: memref<16x128xf32, #tpu.memory_space<vmem>>, %arg2: memref<16x128xf32, #tpu.memory_space<vmem>>, %arg3: memref<16x128xf32, #tpu.memory_space<vmem>>, %arg4: memref<16x128xf32, #tpu.memory_space<vmem>>, %arg5: memref<16x128xf32, #tpu.memory_space<vmem>>, %arg6: memref<16x128xf32, #tpu.memory_space<vmem>>, %arg7: memref<16x128xf32, #tpu.memory_space<vmem>>, %arg8: memref<16x128xf32, #tpu.memory_space<vmem>>, %arg9: memref<16x128xf32, #tpu.memory_space<vmem>>) attributes {dimension_semantics = [#tpu.dimension_semantics<parallel>], iteration_bounds = array<i64: 1>, scalar_prefetch = 0 : i64, scratch_operands = 0 : i64, tpu.core_type = #tpu.core_type<tc>, window_params = [{transform_indices = @transform_0, window_bounds = array<i64: 16, 128>}, {transform_indices = @transform_1, window_bounds = array<i64: 16, 128>}, {transform_indices = @transform_2, window_bounds = array<i64: 16, 128>}, {transform_indices = @transform_3, window_bounds = array<i64: 16, 128>}, {transform_indices = @transform_4, window_bounds = array<i64: 16, 128>}, {transform_indices = @transform_5, window_bounds = array<i64: 16, 128>}, {transform_indices = @transform_6, window_bounds = array<i64: 16, 128>}, {transform_indices = @transform_7, window_bounds = array<i64: 16, 128>}, {transform_indices = @transform_8, window_bounds = array<i64: 16, 128>}]} {
    %c0 = arith.constant 0 : index
    %c0_0 = arith.constant 0 : index
    %0 = vector.load %arg1[%c0, %c0_0] : memref<16x128xf32, #tpu.memory_space<vmem>>, vector<16x128xf32>
    %c0_1 = arith.constant 0 : index
    %c0_2 = arith.constant 0 : index
    %1 = vector.load %arg5[%c0_1, %c0_2] : memref<16x128xf32, #tpu.memory_space<vmem>>, vector<16x128xf32>
    %2 = arith.mulf %0, %1 : vector<16x128xf32>
    %c0_3 = arith.constant 0 : index
    %c0_4 = arith.constant 0 : index
    %3 = vector.load %arg2[%c0_3, %c0_4] : memref<16x128xf32, #tpu.memory_space<vmem>>, vector<16x128xf32>
    %c0_5 = arith.constant 0 : index
    %c0_6 = arith.constant 0 : index
    %4 = vector.load %arg6[%c0_5, %c0_6] : memref<16x128xf32, #tpu.memory_space<vmem>>, vector<16x128xf32>
    %5 = arith.mulf %3, %4 : vector<16x128xf32>
    %6 = arith.addf %2, %5 : vector<16x128xf32>
    %c0_7 = arith.constant 0 : index
    %c0_8 = arith.constant 0 : index
    %7 = vector.load %arg3[%c0_7, %c0_8] : memref<16x128xf32, #tpu.memory_space<vmem>>, vector<16x128xf32>
    %c0_9 = arith.constant 0 : index
    %c0_10 = arith.constant 0 : index
    %8 = vector.load %arg7[%c0_9, %c0_10] : memref<16x128xf32, #tpu.memory_space<vmem>>, vector<16x128xf32>
    %9 = arith.mulf %7, %8 : vector<16x128xf32>
    %10 = arith.addf %6, %9 : vector<16x128xf32>
    %c0_11 = arith.constant 0 : index
    %c0_12 = arith.constant 0 : index
    %11 = vector.load %arg4[%c0_11, %c0_12] : memref<16x128xf32, #tpu.memory_space<vmem>>, vector<16x128xf32>
    %c0_13 = arith.constant 0 : index
    %c0_14 = arith.constant 0 : index
    %12 = vector.load %arg8[%c0_13, %c0_14] : memref<16x128xf32, #tpu.memory_space<vmem>>, vector<16x128xf32>
    %13 = arith.mulf %11, %12 : vector<16x128xf32>
    %14 = arith.addf %10, %13 : vector<16x128xf32>
    %c0_15 = arith.constant 0 : index
    %c0_16 = arith.constant 0 : index
    %15 = vector.load %arg9[%c0_15, %c0_16] : memref<16x128xf32, #tpu.memory_space<vmem>>, vector<16x128xf32>
    tpu.vector_store %arg9[%c0_15, %c0_16], %14 {strides = array<i32>} : memref<16x128xf32, #tpu.memory_space<vmem>>, vector<16x128xf32>,
    return
  }
  func.func @transform_0(%arg0: i32) -> (i32, i32) {
    %c0_i32 = arith.constant 0 : i32
    %c0_i32_0 = arith.constant 0 : i32
    return %arg0, %c0_i32 : i32, i32
  }
  func.func @transform_1(%arg0: i32) -> (i32, i32) {
    %c0_i32 = arith.constant 0 : i32
    %c0_i32_0 = arith.constant 0 : i32
    return %arg0, %c0_i32 : i32, i32
  }
  func.func @transform_2(%arg0: i32) -> (i32, i32) {
    %c0_i32 = arith.constant 0 : i32
    %c0_i32_0 = arith.constant 0 : i32
    return %arg0, %c0_i32 : i32, i32
  }
  func.func @transform_3(%arg0: i32) -> (i32, i32) {
    %c0_i32 = arith.constant 0 : i32
    %c0_i32_0 = arith.constant 0 : i32
    return %arg0, %c0_i32 : i32, i32
  }
  func.func @transform_4(%arg0: i32) -> (i32, i32) {
    %c0_i32 = arith.constant 0 : i32
    %c0_i32_0 = arith.constant 0 : i32
    return %arg0, %c0_i32 : i32, i32
  }
  func.func @transform_5(%arg0: i32) -> (i32, i32) {
    %c0_i32 = arith.constant 0 : i32
    %c0_i32_0 = arith.constant 0 : i32
    return %arg0, %c0_i32 : i32, i32
  }
  func.func @transform_6(%arg0: i32) -> (i32, i32) {
    %c0_i32 = arith.constant 0 : i32
    %c0_i32_0 = arith.constant 0 : i32
    return %arg0, %c0_i32 : i32, i32
  }
  func.func @transform_7(%arg0: i32) -> (i32, i32) {
    %c0_i32 = arith.constant 0 : i32
    %c0_i32_0 = arith.constant 0 : i32
    return %arg0, %c0_i32 : i32, i32
  }
  func.func @transform_8(%arg0: i32) -> (i32, i32) {
    %c0_i32 = arith.constant 0 : i32
    %c0_i32_0 = arith.constant 0 : i32
    return %arg0, %c0_i32 : i32, i32
  }
}

module attributes {stable_mosaic.version = 11 : i64} {
  func.func @_matmul_bias_act_kernel(%arg0: i32, %arg1: i32, %arg2: memref<512x128xbf16, #tpu.memory_space<vmem>>, %arg3: memref<128x128xbf16, #tpu.memory_space<vmem>>, %arg4: memref<1x128xf32, #tpu.memory_space<vmem>>, %arg5: memref<512x128xf32, #tpu.memory_space<vmem>>) attributes {dimension_semantics = [#tpu.dimension_semantics<parallel>, #tpu.dimension_semantics<parallel>], iteration_bounds = array<i64: 1, 1>, scalar_prefetch = 0 : i64, scratch_operands = 0 : i64, tpu.core_type = #tpu.core_type<tc>, window_params = [{transform_indices = @transform_0, window_bounds = array<i64: 512, 128>}, {transform_indices = @transform_1, window_bounds = array<i64: 128, 128>}, {transform_indices = @transform_2, window_bounds = array<i64: 1, 128>}, {transform_indices = @transform_3, window_bounds = array<i64: 512, 128>}]} {
    %c0 = arith.constant 0 : index
    %c0_0 = arith.constant 0 : index
    %0 = vector.load %arg2[%c0, %c0_0] : memref<512x128xbf16, #tpu.memory_space<vmem>>, vector<512x128xbf16>
    %c0_1 = arith.constant 0 : index
    %c0_2 = arith.constant 0 : index
    %1 = vector.load %arg3[%c0_1, %c0_2] : memref<128x128xbf16, #tpu.memory_space<vmem>>, vector<128x128xbf16>
    %cst = arith.constant dense<0.000000e+00> : vector<512x128xf32>
    %2 = tpu.matmul %0, %1, %cst {dimension_numbers = #tpu.dot_dimension_numbers<[1], [0], [0], [1], [0, 0, 1, 1], [], []>} : vector<512x128xbf16>, vector<128x128xbf16>, vector<512x128xf32> -> vector<512x128xf32>
    %c0_3 = arith.constant 0 : index
    %c0_4 = arith.constant 0 : index
    %3 = vector.load %arg4[%c0_3, %c0_4] : memref<1x128xf32, #tpu.memory_space<vmem>>, vector<1x128xf32>
    %4 = vector.broadcast %3 : vector<1x128xf32> to vector<512x128xf32>
    %5 = arith.addf %2, %4 : vector<512x128xf32>
    %cst_5 = arith.constant 0.000000e+00 : f32
    %6 = vector.broadcast %cst_5 : f32 to vector<512x128xf32>
    %7 = arith.maximumf %5, %6 : vector<512x128xf32>
    %c0_6 = arith.constant 0 : index
    %c0_7 = arith.constant 0 : index
    %8 = vector.load %arg5[%c0_6, %c0_7] : memref<512x128xf32, #tpu.memory_space<vmem>>, vector<512x128xf32>
    tpu.vector_store %arg5[%c0_6, %c0_7], %7 {strides = array<i32>} : memref<512x128xf32, #tpu.memory_space<vmem>>, vector<512x128xf32>,
    return
  }
  func.func @transform_0(%arg0: i32, %arg1: i32) -> (i32, i32) {
    %c0_i32 = arith.constant 0 : i32
    %c0_i32_0 = arith.constant 0 : i32
    return %arg0, %c0_i32 : i32, i32
  }
  func.func @transform_1(%arg0: i32, %arg1: i32) -> (i32, i32) {
    %c0_i32 = arith.constant 0 : i32
    %c0_i32_0 = arith.constant 0 : i32
    return %c0_i32, %arg1 : i32, i32
  }
  func.func @transform_2(%arg0: i32, %arg1: i32) -> (i32, i32) {
    %c0_i32 = arith.constant 0 : i32
    %c0_i32_0 = arith.constant 0 : i32
    return %c0_i32, %arg1 : i32, i32
  }
  func.func @transform_3(%arg0: i32, %arg1: i32) -> (i32, i32) {
    %c0_i32 = arith.constant 0 : i32
    return %arg0, %arg1 : i32, i32
  }
}

module attributes {stable_mosaic.version = 11 : i64} {
  func.func @_matmul_bias_act_kernel(%arg0: i32, %arg1: i32, %arg2: memref<512x256xbf16, #tpu.memory_space<vmem>>, %arg3: memref<256x128xbf16, #tpu.memory_space<vmem>>, %arg4: memref<1x128xf32, #tpu.memory_space<vmem>>, %arg5: memref<512x128xf32, #tpu.memory_space<vmem>>) attributes {dimension_semantics = [#tpu.dimension_semantics<parallel>, #tpu.dimension_semantics<parallel>], iteration_bounds = array<i64: 1, 1>, scalar_prefetch = 0 : i64, scratch_operands = 0 : i64, tpu.core_type = #tpu.core_type<tc>, window_params = [{transform_indices = @transform_0, window_bounds = array<i64: 512, 256>}, {transform_indices = @transform_1, window_bounds = array<i64: 256, 128>}, {transform_indices = @transform_2, window_bounds = array<i64: 1, 128>}, {transform_indices = @transform_3, window_bounds = array<i64: 512, 128>}]} {
    %c0 = arith.constant 0 : index
    %c0_0 = arith.constant 0 : index
    %0 = vector.load %arg2[%c0, %c0_0] : memref<512x256xbf16, #tpu.memory_space<vmem>>, vector<512x256xbf16>
    %c0_1 = arith.constant 0 : index
    %c0_2 = arith.constant 0 : index
    %1 = vector.load %arg3[%c0_1, %c0_2] : memref<256x128xbf16, #tpu.memory_space<vmem>>, vector<256x128xbf16>
    %cst = arith.constant dense<0.000000e+00> : vector<512x128xf32>
    %2 = tpu.matmul %0, %1, %cst {dimension_numbers = #tpu.dot_dimension_numbers<[1], [0], [0], [1], [0, 0, 1, 1], [], []>} : vector<512x256xbf16>, vector<256x128xbf16>, vector<512x128xf32> -> vector<512x128xf32>
    %c0_3 = arith.constant 0 : index
    %c0_4 = arith.constant 0 : index
    %3 = vector.load %arg4[%c0_3, %c0_4] : memref<1x128xf32, #tpu.memory_space<vmem>>, vector<1x128xf32>
    %4 = vector.broadcast %3 : vector<1x128xf32> to vector<512x128xf32>
    %5 = arith.addf %2, %4 : vector<512x128xf32>
    %cst_5 = arith.constant 0.000000e+00 : f32
    %6 = vector.broadcast %cst_5 : f32 to vector<512x128xf32>
    %7 = arith.maximumf %5, %6 : vector<512x128xf32>
    %c0_6 = arith.constant 0 : index
    %c0_7 = arith.constant 0 : index
    %8 = vector.load %arg5[%c0_6, %c0_7] : memref<512x128xf32, #tpu.memory_space<vmem>>, vector<512x128xf32>
    tpu.vector_store %arg5[%c0_6, %c0_7], %7 {strides = array<i32>} : memref<512x128xf32, #tpu.memory_space<vmem>>, vector<512x128xf32>,
    return
  }
  func.func @transform_0(%arg0: i32, %arg1: i32) -> (i32, i32) {
    %c0_i32 = arith.constant 0 : i32
    %c0_i32_0 = arith.constant 0 : i32
    return %arg0, %c0_i32 : i32, i32
  }
  func.func @transform_1(%arg0: i32, %arg1: i32) -> (i32, i32) {
    %c0_i32 = arith.constant 0 : i32
    %c0_i32_0 = arith.constant 0 : i32
    return %c0_i32, %arg1 : i32, i32
  }
  func.func @transform_2(%arg0: i32, %arg1: i32) -> (i32, i32) {
    %c0_i32 = arith.constant 0 : i32
    %c0_i32_0 = arith.constant 0 : i32
    return %c0_i32, %arg1 : i32, i32
  }
  func.func @transform_3(%arg0: i32, %arg1: i32) -> (i32, i32) {
    %c0_i32 = arith.constant 0 : i32
    return %arg0, %arg1 : i32, i32
  }
}

module attributes {stable_mosaic.version = 11 : i64} {
  func.func @_matmul_bias_act_kernel(%arg0: i32, %arg1: i32, %arg2: memref<512x256xbf16, #tpu.memory_space<vmem>>, %arg3: memref<256x128xbf16, #tpu.memory_space<vmem>>, %arg4: memref<1x128xf32, #tpu.memory_space<vmem>>, %arg5: memref<512x128xf32, #tpu.memory_space<vmem>>) attributes {dimension_semantics = [#tpu.dimension_semantics<parallel>, #tpu.dimension_semantics<parallel>], iteration_bounds = array<i64: 1, 1>, scalar_prefetch = 0 : i64, scratch_operands = 0 : i64, tpu.core_type = #tpu.core_type<tc>, window_params = [{transform_indices = @transform_0, window_bounds = array<i64: 512, 256>}, {transform_indices = @transform_1, window_bounds = array<i64: 256, 128>}, {transform_indices = @transform_2, window_bounds = array<i64: 1, 128>}, {transform_indices = @transform_3, window_bounds = array<i64: 512, 128>}]} {
    %c0 = arith.constant 0 : index
    %c0_0 = arith.constant 0 : index
    %0 = vector.load %arg2[%c0, %c0_0] : memref<512x256xbf16, #tpu.memory_space<vmem>>, vector<512x256xbf16>
    %c0_1 = arith.constant 0 : index
    %c0_2 = arith.constant 0 : index
    %1 = vector.load %arg3[%c0_1, %c0_2] : memref<256x128xbf16, #tpu.memory_space<vmem>>, vector<256x128xbf16>
    %cst = arith.constant dense<0.000000e+00> : vector<512x128xf32>
    %2 = tpu.matmul %0, %1, %cst {dimension_numbers = #tpu.dot_dimension_numbers<[1], [0], [0], [1], [0, 0, 1, 1], [], []>} : vector<512x256xbf16>, vector<256x128xbf16>, vector<512x128xf32> -> vector<512x128xf32>
    %c0_3 = arith.constant 0 : index
    %c0_4 = arith.constant 0 : index
    %3 = vector.load %arg4[%c0_3, %c0_4] : memref<1x128xf32, #tpu.memory_space<vmem>>, vector<1x128xf32>
    %4 = vector.broadcast %3 : vector<1x128xf32> to vector<512x128xf32>
    %5 = arith.addf %2, %4 : vector<512x128xf32>
    %c0_5 = arith.constant 0 : index
    %c0_6 = arith.constant 0 : index
    %6 = vector.load %arg5[%c0_5, %c0_6] : memref<512x128xf32, #tpu.memory_space<vmem>>, vector<512x128xf32>
    tpu.vector_store %arg5[%c0_5, %c0_6], %5 {strides = array<i32>} : memref<512x128xf32, #tpu.memory_space<vmem>>, vector<512x128xf32>,
    return
  }
  func.func @transform_0(%arg0: i32, %arg1: i32) -> (i32, i32) {
    %c0_i32 = arith.constant 0 : i32
    %c0_i32_0 = arith.constant 0 : i32
    return %arg0, %c0_i32 : i32, i32
  }
  func.func @transform_1(%arg0: i32, %arg1: i32) -> (i32, i32) {
    %c0_i32 = arith.constant 0 : i32
    %c0_i32_0 = arith.constant 0 : i32
    return %c0_i32, %arg1 : i32, i32
  }
  func.func @transform_2(%arg0: i32, %arg1: i32) -> (i32, i32) {
    %c0_i32 = arith.constant 0 : i32
    %c0_i32_0 = arith.constant 0 : i32
    return %c0_i32, %arg1 : i32, i32
  }
  func.func @transform_3(%arg0: i32, %arg1: i32) -> (i32, i32) {
    %c0_i32 = arith.constant 0 : i32
    return %arg0, %arg1 : i32, i32
  }
}

module attributes {stable_mosaic.version = 11 : i64} {
  func.func @_sub_kernel(%arg0: i32, %arg1: memref<16x128xf32, #tpu.memory_space<vmem>>, %arg2: memref<16x128xf32, #tpu.memory_space<vmem>>, %arg3: memref<16x128xf32, #tpu.memory_space<vmem>>) attributes {dimension_semantics = [#tpu.dimension_semantics<parallel>], iteration_bounds = array<i64: 1>, scalar_prefetch = 0 : i64, scratch_operands = 0 : i64, tpu.core_type = #tpu.core_type<tc>, window_params = [{transform_indices = @transform_0, window_bounds = array<i64: 16, 128>}, {transform_indices = @transform_1, window_bounds = array<i64: 16, 128>}, {transform_indices = @transform_2, window_bounds = array<i64: 16, 128>}]} {
    %c0 = arith.constant 0 : index
    %c0_0 = arith.constant 0 : index
    %0 = vector.load %arg1[%c0, %c0_0] : memref<16x128xf32, #tpu.memory_space<vmem>>, vector<16x128xf32>
    %c0_1 = arith.constant 0 : index
    %c0_2 = arith.constant 0 : index
    %1 = vector.load %arg2[%c0_1, %c0_2] : memref<16x128xf32, #tpu.memory_space<vmem>>, vector<16x128xf32>
    %2 = arith.subf %0, %1 : vector<16x128xf32>
    %c0_3 = arith.constant 0 : index
    %c0_4 = arith.constant 0 : index
    %3 = vector.load %arg3[%c0_3, %c0_4] : memref<16x128xf32, #tpu.memory_space<vmem>>, vector<16x128xf32>
    tpu.vector_store %arg3[%c0_3, %c0_4], %2 {strides = array<i32>} : memref<16x128xf32, #tpu.memory_space<vmem>>, vector<16x128xf32>,
    return
  }
  func.func @transform_0(%arg0: i32) -> (i32, i32) {
    %c0_i32 = arith.constant 0 : i32
    %c0_i32_0 = arith.constant 0 : i32
    return %arg0, %c0_i32 : i32, i32
  }
  func.func @transform_1(%arg0: i32) -> (i32, i32) {
    %c0_i32 = arith.constant 0 : i32
    %c0_i32_0 = arith.constant 0 : i32
    return %arg0, %c0_i32 : i32, i32
  }
  func.func @transform_2(%arg0: i32) -> (i32, i32) {
    %c0_i32 = arith.constant 0 : i32
    %c0_i32_0 = arith.constant 0 : i32
    return %arg0, %c0_i32 : i32, i32
  }
}

module attributes {stable_mosaic.version = 11 : i64} {
  func.func @_add_clamp_kernel(%arg0: i32, %arg1: memref<16x128xf32, #tpu.memory_space<vmem>>, %arg2: memref<16x128xf32, #tpu.memory_space<vmem>>, %arg3: memref<16x128xf32, #tpu.memory_space<vmem>>) attributes {dimension_semantics = [#tpu.dimension_semantics<parallel>], iteration_bounds = array<i64: 1>, scalar_prefetch = 0 : i64, scratch_operands = 0 : i64, tpu.core_type = #tpu.core_type<tc>, window_params = [{transform_indices = @transform_0, window_bounds = array<i64: 16, 128>}, {transform_indices = @transform_1, window_bounds = array<i64: 16, 128>}, {transform_indices = @transform_2, window_bounds = array<i64: 16, 128>}]} {
    %c0 = arith.constant 0 : index
    %c0_0 = arith.constant 0 : index
    %0 = vector.load %arg1[%c0, %c0_0] : memref<16x128xf32, #tpu.memory_space<vmem>>, vector<16x128xf32>
    %c0_1 = arith.constant 0 : index
    %c0_2 = arith.constant 0 : index
    %1 = vector.load %arg2[%c0_1, %c0_2] : memref<16x128xf32, #tpu.memory_space<vmem>>, vector<16x128xf32>
    %2 = arith.addf %0, %1 : vector<16x128xf32>
    %cst = arith.constant 0.000000e+00 : f32
    %cst_3 = arith.constant 1.000000e+00 : f32
    %3 = vector.broadcast %cst : f32 to vector<16x128xf32>
    %4 = arith.maximumf %3, %2 : vector<16x128xf32>
    %5 = vector.broadcast %cst_3 : f32 to vector<16x128xf32>
    %6 = arith.minimumf %5, %4 : vector<16x128xf32>
    %c0_4 = arith.constant 0 : index
    %c0_5 = arith.constant 0 : index
    %7 = vector.load %arg3[%c0_4, %c0_5] : memref<16x128xf32, #tpu.memory_space<vmem>>, vector<16x128xf32>
    tpu.vector_store %arg3[%c0_4, %c0_5], %6 {strides = array<i32>} : memref<16x128xf32, #tpu.memory_space<vmem>>, vector<16x128xf32>,
    return
  }
  func.func @transform_0(%arg0: i32) -> (i32, i32) {
    %c0_i32 = arith.constant 0 : i32
    %c0_i32_0 = arith.constant 0 : i32
    return %arg0, %c0_i32 : i32, i32
  }
  func.func @transform_1(%arg0: i32) -> (i32, i32) {
    %c0_i32 = arith.constant 0 : i32
    %c0_i32_0 = arith.constant 0 : i32
    return %arg0, %c0_i32 : i32, i32
  }
  func.func @transform_2(%arg0: i32) -> (i32, i32) {
    %c0_i32 = arith.constant 0 : i32
    %c0_i32_0 = arith.constant 0 : i32
    return %arg0, %c0_i32 : i32, i32
  }
}

</mosaic_0001>

<bundles_post_ra>
// kernel: video_codec_forward.22
= control target key start
LH: loop header
LB: loop body
LE: loop exit
PB: predicated region body
PF: predicated region fallthrough
CT: control target
= control target key end

     0   :  { %s499_s1 = inlined_call_operand.vmem [shape: bf16[128,128], index: 1, kind: input, shape index: {}]   ;;  %s500_s0 = inlined_call_operand.vmem [shape: bf16[128,128], index: 0, kind: input, shape index: {}]   ;;  %s501_s2 = inlined_call_operand.vmem [shape: f32[1,128], index: 2, kind: input, shape index: {}]   ;;  %s502_s3 = inlined_call_operand.vmem [shape: f32[128,128], index: 3, kind: output, shape index: {}]  }
   0x1   :  { %v364_v0 = vld [vmem:[%s499_s1] sm:$0xff]   ;;  %v365_v1 = vld [vmem:[%s499_s1 + $0x8] sm:$0xff]   ;;  %v366_v2 = vld [vmem:[%s499_s1 + $0x10] sm:$0xff]  }
   0x2   :  { %316 = vmatprep.subr.bf16.mxu0 %v364_v0  ;;  %348 = vmatprep.subr.bf16.mxu1 %v364_v0  ;;  %v367_v3 = vld [vmem:[%s499_s1 + $0x18] sm:$0xff]   ;;  %v372_v4 = vld [vmem:[%s500_s0] sm:$0xff]   ;;  %v369_v7 = vld [vmem:[%s499_s1 + $0x28] sm:$0xff]  }
   0x3   :  { %317 = vmatpush3.bf16.msra.mxu0 %v364_v0  ;;  %356 = vmatpush3.bf16.msra.mxu1 %v364_v0  ;;  %v373_v5 = vld [vmem:[%s500_s0 + $0x20] sm:$0xff]   ;;  %v370_v8 = vld [vmem:[%s499_s1 + $0x30] sm:$0xff]   ;;  %v371_v9 = vld [vmem:[%s499_s1 + $0x38] sm:$0xff]  }
   0x4   :  { %318 = vmatprep.subr.bf16.mxu0 %v365_v1  ;;  %349 = vmatprep.subr.bf16.mxu1 %v365_v1  ;;  %v368_v6 = vld [vmem:[%s499_s1 + $0x20] sm:$0xff]   ;;  %v374_v10 = vld [vmem:[%s500_s0 + $0x8] sm:$0xff]   ;;  %v376_v12 = vld [vmem:[%s500_s0 + $0x10] sm:$0xff]  }
   0x5   :  { %332 = vmatprep.mubr.bf16.mxu0 %v372_v4  ;;  %340 = vmatprep.mubr.bf16.mxu1 %v373_v5  ;;  %v375_v11 = vld [vmem:[%s500_s0 + $0x28] sm:$0xff]   ;;  %v377_v13 = vld [vmem:[%s500_s0 + $0x30] sm:$0xff]   ;;  %v378_v14 = vld [vmem:[%s500_s0 + $0x18] sm:$0xff]  }
   0x6   :  { %v379_v15 = vld [vmem:[%s500_s0 + $0x38] sm:$0xff]   ;;  %v283_v16 = vld [vmem:[%s501_s2] ss:$0 sm:$0xff] }
   0x7   :  { %319 = vmatpush3.bf16.msra.mxu0 %v365_v1  ;;  %357 = vmatpush3.bf16.msra.mxu1 %v365_v1 }
   0x8   :  { %320 = vmatprep.subr.bf16.mxu0 %v366_v2  ;;  %350 = vmatprep.subr.bf16.mxu1 %v366_v2 }
   0xb   :  { %321 = vmatpush3.bf16.msra.mxu0 %v366_v2  ;;  %358 = vmatpush3.bf16.msra.mxu1 %v366_v2 }
   0xc   :  { %322 = vmatprep.subr.bf16.mxu0 %v367_v3  ;;  %351 = vmatprep.subr.bf16.mxu1 %v367_v3 }
   0xf   :  { %323 = vmatpush3.bf16.msra.mxu0 %v367_v3  ;;  %359 = vmatpush3.bf16.msra.mxu1 %v367_v3 }
  0x10   :  { %324 = vmatprep.subr.bf16.mxu0 %v368_v6  ;;  %352 = vmatprep.subr.bf16.mxu1 %v368_v6 }
  0x13   :  { %325 = vmatpush3.bf16.msra.mxu0 %v368_v6  ;;  %360 = vmatpush3.bf16.msra.mxu1 %v368_v6 }
  0x14   :  { %326 = vmatprep.subr.bf16.mxu0 %v369_v7  ;;  %353 = vmatprep.subr.bf16.mxu1 %v369_v7 }
  0x17   :  { %327 = vmatpush3.bf16.msra.mxu0 %v369_v7  ;;  %361 = vmatpush3.bf16.msra.mxu1 %v369_v7 }
  0x18   :  { %328 = vmatprep.subr.bf16.mxu0 %v370_v8  ;;  %354 = vmatprep.subr.bf16.mxu1 %v370_v8 }
  0x1b   :  { %329 = vmatpush3.bf16.msra.mxu0 %v370_v8  ;;  %362 = vmatpush3.bf16.msra.mxu1 %v370_v8 }
  0x1c   :  { %330 = vmatprep.subr.bf16.mxu0 %v371_v9  ;;  %355 = vmatprep.subr.bf16.mxu1 %v371_v9 }
  0x1f   :  { %331 = vmatpush3.bf16.msra.mxu0 %v371_v9  ;;  %363 = vmatpush3.bf16.msra.mxu1 %v371_v9 }
  0x22   :  { %333 = vmatmul.mubr.bf16.vlgmr.msra.gmra.mrb[0].mxu0 %v374_v10  ;;  %341 = vmatmul.mubr.bf16.vlgmr.msra.gmra.mrb[0].mxu1 %v375_v11 }
  0x23   :  { %336 = vmatprep.mubr.bf16.mxu0 %v376_v12  ;;  %344 = vmatprep.mubr.bf16.mxu1 %v377_v13 }
  0x2a   :  { %337 = vmatmul.mubr.bf16.gmra.mrb[4].mxu0 %v378_v14  ;;  %345 = vmatmul.mubr.bf16.gmra.mrb[4].mxu1 %v379_v15 }
  0xf5   :  { %v334_v17 = vpop.f32.mrb[0].mxu0  ;;  %v342_v18 = vpop.f32.mrb[0].mxu1 }
  0xf6   :  { %v193_v19 = vadd.f32 %v334_v17, %v283_v16  ;;  %v225_v20 = vadd.f32 %v342_v18, %v283_v16  ;;  %v184_v21 = vpop.f32.mrb[1].mxu0  ;;  %v216_v22 = vpop.f32.mrb[1].mxu1 }
  0xf7   :  { %v185_v23 = vadd.f32 %v283_v16, %v184_v21  ;;  %v217_v24 = vadd.f32 %v283_v16, %v216_v22  ;;  %v335_v25 = vpop.f32.mrb[2].mxu0  ;;  %v343_v26 = vpop.f32.mrb[2].mxu1 }
  0xf8   :  { %v249_v27 = vmax.f32 %v193_v19, 0.0  ;;  %v257_v28 = vmax.f32 %v225_v20, 0.0  ;;  %v196_v29 = vadd.f32 %v335_v25, %v283_v16  ;;  %v228_v30 = vadd.f32 %v343_v26, %v283_v16  ;;  %v187_v31 = vpop.f32.mrb[3].mxu0  ;;  %v219_v32 = vpop.f32.mrb[3].mxu1 }
  0xf9   :  { %v247_v33 = vmax.f32 %v185_v23, 0.0  ;;  %v255_v34 = vmax.f32 %v217_v24, 0.0  ;;  %v188_v35 = vadd.f32 %v283_v16, %v187_v31  ;;  %v220_v36 = vadd.f32 %v283_v16, %v219_v32 }
  0xfa   :  { %265 = vst [vmem:[%s502_s3 + $0x10] sm:$0xff] %v249_v27  ;;  %273 = vst [vmem:[%s502_s3 + $0x50] sm:$0xff] %v257_v28  ;;  %v250_v37 = vmax.f32 %v196_v29, 0.0  ;;  %v258_v38 = vmax.f32 %v228_v30, 0.0 }
  0xfb   :  { %263 = vst [vmem:[%s502_s3] sm:$0xff] %v247_v33  ;;  %271 = vst [vmem:[%s502_s3 + $0x40] sm:$0xff] %v255_v34  ;;  %v248_v39 = vmax.f32 %v188_v35, 0.0  ;;  %v256_v40 = vmax.f32 %v220_v36, 0.0 }
  0xfc   :  { %266 = vst [vmem:[%s502_s3 + $0x18] sm:$0xff] %v250_v37  ;;  %274 = vst [vmem:[%s502_s3 + $0x58] sm:$0xff] %v258_v38 }
  0xfd   :  { %264 = vst [vmem:[%s502_s3 + $0x8] sm:$0xff] %v248_v39  ;;  %272 = vst [vmem:[%s502_s3 + $0x48] sm:$0xff] %v256_v40  ;;  %v338_v41 = vpop.f32.mrb[4].mxu0  ;;  %v346_v42 = vpop.f32.mrb[4].mxu1 }
  0xfe   :  { %v209_v43 = vadd.f32 %v338_v41, %v283_v16  ;;  %v241_v44 = vadd.f32 %v346_v42, %v283_v16  ;;  %v200_v45 = vpop.f32.mrb[5].mxu0  ;;  %v232_v46 = vpop.f32.mrb[5].mxu1 }
  0xff   :  { %v201_v47 = vadd.f32 %v283_v16, %v200_v45  ;;  %v233_v48 = vadd.f32 %v283_v16, %v232_v46  ;;  %v339_v49 = vpop.f32.mrb[6].mxu0  ;;  %v347_v50 = vpop.f32.mrb[6].mxu1 }
 0x100   :  { %v253_v51 = vmax.f32 %v209_v43, 0.0  ;;  %v261_v52 = vmax.f32 %v241_v44, 0.0  ;;  %v212_v53 = vadd.f32 %v339_v49, %v283_v16  ;;  %v244_v54 = vadd.f32 %v347_v50, %v283_v16  ;;  %v203_v55 = vpop.f32.mrb[7].mxu0  ;;  %v235_v56 = vpop.f32.mrb[7].mxu1 }
 0x101   :  { %v251_v57 = vmax.f32 %v201_v47, 0.0  ;;  %v259_v58 = vmax.f32 %v233_v48, 0.0  ;;  %v204_v59 = vadd.f32 %v283_v16, %v203_v55  ;;  %v236_v60 = vadd.f32 %v283_v16, %v235_v56 }
 0x102   :  { %269 = vst [vmem:[%s502_s3 + $0x30] sm:$0xff] %v253_v51  ;;  %277 = vst [vmem:[%s502_s3 + $0x70] sm:$0xff] %v261_v52  ;;  %v254_v61 = vmax.f32 %v212_v53, 0.0  ;;  %v262_v62 = vmax.f32 %v244_v54, 0.0 }
 0x103   :  { %267 = vst [vmem:[%s502_s3 + $0x20] sm:$0xff] %v251_v57  ;;  %275 = vst [vmem:[%s502_s3 + $0x60] sm:$0xff] %v259_v58  ;;  %v252_v63 = vmax.f32 %v204_v59, 0.0  ;;  %v260_v0 = vmax.f32 %v236_v60, 0.0 }
 0x104   :  { %270 = vst [vmem:[%s502_s3 + $0x38] sm:$0xff] %v254_v61  ;;  %278 = vst [vmem:[%s502_s3 + $0x78] sm:$0xff] %v262_v62 }
 0x105   :  { %268 = vst [vmem:[%s502_s3 + $0x28] sm:$0xff] %v252_v63  ;;  %276 = vst [vmem:[%s502_s3 + $0x68] sm:$0xff] %v260_v0 }

// kernel: video_codec_forward.23
= control target key start
LH: loop header
LB: loop body
LE: loop exit
PB: predicated region body
PF: predicated region fallthrough
CT: control target
= control target key end

     0   :  { %s1268_s1 = inlined_call_operand.vmem [shape: bf16[896,128], index: 1, kind: input, shape index: {}]   ;;  %s1269_s0 = inlined_call_operand.vmem [shape: bf16[32,896], index: 0, kind: input, shape index: {}]   ;;  %s1270_s2 = inlined_call_operand.vmem [shape: f32[1,128], index: 2, kind: input, shape index: {}]   ;;  %s1271_s3 = inlined_call_operand.vmem [shape: f32[32,128], index: 3, kind: output, shape index: {}]  }
   0x1   :  { %v947_v0 = vld [vmem:[%s1268_s1 + $0x40] sm:$0xff]   ;;  %v951_v4 = vld [vmem:[%s1268_s1 + $0x48] sm:$0xff]   ;;  %v955_v8 = vld [vmem:[%s1268_s1 + $0x50] sm:$0xff]  }
   0x2   :  { %v948_v1 = vld [vmem:[%s1268_s1] sm:$0xff]   ;;  %833 = vmatprep.subr.bf16.mxu0 %v947_v0  ;;  %v952_v5 = vld [vmem:[%s1268_s1 + $0x8] sm:$0xff]   ;;  %v956_v9 = vld [vmem:[%s1268_s1 + $0x10] sm:$0xff]  }
   0x3   :  { %v949_v2 = vld [vmem:[%s1268_s1 + $0xc0] sm:$0xff]   ;;  %834 = vmatpush3.bf16.msra.mxu0 %v948_v1  ;;  %v953_v6 = vld [vmem:[%s1268_s1 + $0xc8] sm:$0xff]   ;;  %v957_v10 = vld [vmem:[%s1268_s1 + $0xd0] sm:$0xff]  }
   0x4   :  { %v950_v3 = vld [vmem:[%s1268_s1 + $0x80] sm:$0xff]   ;;  %861 = vmatprep.subr.bf16.mxu1 %v949_v2  ;;  %835 = vmatprep.subr.bf16.mxu0 %v951_v4  ;;  %v954_v7 = vld [vmem:[%s1268_s1 + $0x88] sm:$0xff]   ;;  %v958_v11 = vld [vmem:[%s1268_s1 + $0x90] sm:$0xff]  }
   0x5   :  { %862 = vmatpush3.bf16.msra.mxu1 %v950_v3  ;;  %v959_v12 = vld [vmem:[%s1268_s1 + $0x58] sm:$0xff]   ;;  %v963_v16 = vld [vmem:[%s1268_s1 + $0x60] sm:$0xff]   ;;  %v967_v20 = vld [vmem:[%s1268_s1 + $0x68] sm:$0xff]  }
   0x6   :  { %863 = vmatprep.subr.bf16.mxu1 %v953_v6  ;;  %v960_v13 = vld [vmem:[%s1268_s1 + $0x18] sm:$0xff]   ;;  %v964_v17 = vld [vmem:[%s1268_s1 + $0x20] sm:$0xff]   ;;  %v968_v21 = vld [vmem:[%s1268_s1 + $0x28] sm:$0xff]  }
   0x7   :  { %836 = vmatpush3.bf16.msra.mxu0 %v952_v5  ;;  %v961_v14 = vld [vmem:[%s1268_s1 + $0xd8] sm:$0xff]   ;;  %v965_v18 = vld [vmem:[%s1268_s1 + $0xe0] sm:$0xff]   ;;  %v969_v22 = vld [vmem:[%s1268_s1 + $0xe8] sm:$0xff]  }
   0x8   :  { %837 = vmatprep.subr.bf16.mxu0 %v955_v8  ;;  %v962_v15 = vld [vmem:[%s1268_s1 + $0x98] sm:$0xff]   ;;  %v966_v19 = vld [vmem:[%s1268_s1 + $0xa0] sm:$0xff]   ;;  %v970_v23 = vld [vmem:[%s1268_s1 + $0xa8] sm:$0xff]  }
   0x9   :  { %864 = vmatpush3.bf16.msra.mxu1 %v954_v7  ;;  %v971_v24 = vld [vmem:[%s1268_s1 + $0x70] sm:$0xff]   ;;  %v975_v28 = vld [vmem:[%s1268_s1 + $0x78] sm:$0xff]   ;;  %v980_v32 = vld [vmem:[%s1269_s0 + $0x4] ss:$28 sps:$4 sm:$0xff]  }
   0xa   :  { %865 = vmatprep.subr.bf16.mxu1 %v957_v10  ;;  %v972_v25 = vld [vmem:[%s1268_s1 + $0x30] sm:$0xff]   ;;  %v976_v29 = vld [vmem:[%s1268_s1 + $0x38] sm:$0xff]   ;;  %590 = vmatprep.mubr.bf16.mxu0 %v980_v32  ;;  %v982_v34 = vld [vmem:[%s1268_s1 + $0x140] sm:$0xff]  }
   0xb   :  { %838 = vmatpush3.bf16.msra.mxu0 %v956_v9  ;;  %v973_v26 = vld [vmem:[%s1268_s1 + $0xf0] sm:$0xff]   ;;  %v977_v30 = vld [vmem:[%s1268_s1 + $0xf8] sm:$0xff]   ;;  %v983_v35 = vld [vmem:[%s1269_s0 + $0x8] ss:$28 sps:$4 sm:$0xff]  }
   0xc   :  { %839 = vmatprep.subr.bf16.mxu0 %v959_v12  ;;  %v974_v27 = vld [vmem:[%s1268_s1 + $0xb0] sm:$0xff]   ;;  %v978_v31 = vld [vmem:[%s1269_s0] ss:$28 sps:$4 sm:$0xff]   ;;  %v985_v36 = vld [vmem:[%s1269_s0 + $0xc] ss:$28 sps:$4 sm:$0xff]  }
   0xd   :  { %866 = vmatpush3.bf16.msra.mxu1 %v958_v11  ;;  %v981_v33 = vld [vmem:[%s1268_s1 + $0xb8] sm:$0xff]   ;;  %v986_v37 = vld [vmem:[%s1268_s1 + $0x100] sm:$0xff]   ;;  %639 = vmatprep.mubr.bf16.mxu1 %v985_v36  ;;  %v987_v38 = vld [vmem:[%s1268_s1 + $0x148] sm:$0xff]  }
   0xe   :  { %867 = vmatprep.subr.bf16.mxu1 %v961_v14  ;;  %v988_v39 = vld [vmem:[%s1268_s1 + $0x180] sm:$0xff]   ;;  %v989_v40 = vld [vmem:[%s1268_s1 + $0x108] sm:$0xff]   ;;  %v990_v41 = vld [vmem:[%s1268_s1 + $0x150] sm:$0xff]  }
   0xf   :  { %840 = vmatpush3.bf16.msra.mxu0 %v960_v13  ;;  %v991_v42 = vld [vmem:[%s1268_s1 + $0x188] sm:$0xff]   ;;  %v992_v43 = vld [vmem:[%s1268_s1 + $0x110] sm:$0xff]   ;;  %v993_v44 = vld [vmem:[%s1268_s1 + $0x158] sm:$0xff]  }
  0x10   :  { %841 = vmatprep.subr.bf16.mxu0 %v963_v16  ;;  %v994_v45 = vld [vmem:[%s1268_s1 + $0x190] sm:$0xff]   ;;  %v995_v46 = vld [vmem:[%s1268_s1 + $0x118] sm:$0xff]   ;;  %v996_v47 = vld [vmem:[%s1268_s1 + $0x160] sm:$0xff]  }
  0x11   :  { %868 = vmatpush3.bf16.msra.mxu1 %v962_v15  ;;  %v997_v48 = vld [vmem:[%s1268_s1 + $0x198] sm:$0xff]   ;;  %v998_v49 = vld [vmem:[%s1268_s1 + $0x120] sm:$0xff]   ;;  %v1001_v51 = vld [vmem:[%s1268_s1 + $0x168] sm:$0xff]  }
  0x12   :  { %869 = vmatprep.subr.bf16.mxu1 %v965_v18  ;;  %v999_v50 = vld [vmem:[%s1269_s0 + $0x3c] ss:$28 sps:$4 sm:$0xff]   ;;  %v1002_v52 = vld [vmem:[%s1268_s1 + $0x1a0] sm:$0xff]   ;;  %v1004_v54 = vld [vmem:[%s1268_s1 + $0x128] sm:$0xff]  }
  0x13   :  { %842 = vmatpush3.bf16.msra.mxu0 %v964_v17  ;;  %v1003_v53 = vld [vmem:[%s1269_s0 + $0x38] ss:$28 sps:$4 sm:$0xff]   ;;  %v1005_v55 = vld [vmem:[%s1269_s0 + $0x44] ss:$28 sps:$4 sm:$0xff]   ;;  %v1009_v58 = vld [vmem:[%s1268_s1 + $0x1a8] sm:$0xff]  }
  0x14   :  { %843 = vmatprep.subr.bf16.mxu0 %v967_v20  ;;  %v1007_v56 = vld [vmem:[%s1269_s0 + $0x40] ss:$28 sps:$4 sm:$0xff]   ;;  %v1008_v57 = vld [vmem:[%s1268_s1 + $0x170] sm:$0xff]   ;;  %v1020_v3 = vld [vmem:[%s1269_s0 + $0x4c] ss:$28 sps:$4 sm:$0xff]  }
  0x15   :  { %870 = vmatpush3.bf16.msra.mxu1 %v966_v19  ;;  %v1010_v59 = vld [vmem:[%s1268_s1 + $0x130] sm:$0xff]   ;;  %v1011_v60 = vld [vmem:[%s1268_s1 + $0x178] sm:$0xff]   ;;  %v1022_v5 = vld [vmem:[%s1269_s0 + $0x48] ss:$28 sps:$4 sm:$0xff]  }
  0x16   :  { %871 = vmatprep.subr.bf16.mxu1 %v969_v22  ;;  %v1012_v61 = vld [vmem:[%s1268_s1 + $0x1b0] sm:$0xff]   ;;  %v1013_v62 = vld [vmem:[%s1268_s1 + $0x138] sm:$0xff]   ;;  %v762_v7 = vld [vmem:[%s1270_s2] ss:$0 sm:$0xff] }
  0x17   :  { %844 = vmatpush3.bf16.msra.mxu0 %v968_v21  ;;  %v1016_v63 = vld [vmem:[%s1269_s0 + $0x14] ss:$28 sps:$4 sm:$0xff]   ;;  %v1017_v0 = vld [vmem:[%s1268_s1 + $0x1b8] sm:$0xff]  }
  0x18   :  { %845 = vmatprep.subr.bf16.mxu0 %v971_v24  ;;  %v1018_v1 = vld [vmem:[%s1269_s0 + $0x18] ss:$28 sps:$4 sm:$0xff]   ;;  %v1014_v2 = vld [vmem:[%s1269_s0 + $0x10] ss:$28 sps:$4 sm:$0xff]  }
  0x19   :  { %872 = vmatpush3.bf16.msra.mxu1 %v970_v23  ;;  %v1019_v4 = vld [vmem:[%s1269_s0 + $0x50] ss:$28 sps:$4 sm:$0xff]  }
  0x1a   :  { %873 = vmatprep.subr.bf16.mxu1 %v973_v26 }
  0x1b   :  { %846 = vmatpush3.bf16.msra.mxu0 %v972_v25 }
  0x1c   :  { %847 = vmatprep.subr.bf16.mxu0 %v975_v28 }
  0x1d   :  { %874 = vmatpush3.bf16.msra.mxu1 %v974_v27 }
  0x1e   :  { %875 = vmatprep.subr.bf16.mxu1 %v977_v30 }
  0x1f   :  { %848 = vmatpush3.bf16.msra.mxu0 %v976_v29 }
  0x20   :  { %889 = vmatprep.subr.bf16.mxu0 %v982_v34 }
  0x21   :  { %876 = vmatpush3.bf16.msra.mxu1 %v981_v33 }
  0x22   :  { %591 = vmatmul.mubr.bf16.vlgmr.msra.gmra.mrb[0].mxu0 %v978_v31  ;;  %927 = vmatprep.subr.bf16.mxu1 %v988_v39 }
  0x23   :  { %890 = vmatpush3.bf16.msra.mxu0 %v986_v37  ;;  %598 = vmatprep.mubr.bf16.mxu0 %v999_v50 }
  0x24   :  { %640 = vmatmul.mubr.bf16.vlgmr.msra.gmra.mrb[0].mxu1 %v983_v35  ;;  %891 = vmatprep.subr.bf16.mxu0 %v987_v38 }
  0x25   :  { %928 = vmatpush3.bf16.msra.mxu1 %v988_v39  ;;  %647 = vmatprep.mubr.bf16.mxu1 %v1005_v55 }
  0x26   :  { %929 = vmatprep.subr.bf16.mxu1 %v991_v42 }
  0x27   :  { %892 = vmatpush3.bf16.msra.mxu0 %v989_v40 }
  0x28   :  { %893 = vmatprep.subr.bf16.mxu0 %v990_v41 }
  0x29   :  { %930 = vmatpush3.bf16.msra.mxu1 %v991_v42 }
  0x2a   :  { %931 = vmatprep.subr.bf16.mxu1 %v994_v45  ;;  %599 = vmatmul.mubr.bf16.gmra.mrb[4].mxu0 %v1003_v53 }
  0x2b   :  { %894 = vmatpush3.bf16.msra.mxu0 %v992_v43  ;;  %688 = vmatprep.mubr.bf16.mxu0 %v1016_v63 }
  0x2c   :  { %895 = vmatprep.subr.bf16.mxu0 %v993_v44  ;;  %648 = vmatmul.mubr.bf16.gmra.mrb[4].mxu1 %v1007_v56 }
  0x2d   :  { %932 = vmatpush3.bf16.msra.mxu1 %v994_v45  ;;  %943 = vmatprep.mubr.bf16.mxu1 %v1018_v1 }
  0x2e   :  { %933 = vmatprep.subr.bf16.mxu1 %v997_v48 }
  0x2f   :  { %896 = vmatpush3.bf16.msra.mxu0 %v995_v46 }
  0x30   :  { %897 = vmatprep.subr.bf16.mxu0 %v996_v47 }
  0x31   :  { %934 = vmatpush3.bf16.msra.mxu1 %v997_v48 }
  0x32   :  { %935 = vmatprep.subr.bf16.mxu1 %v1002_v52 }
  0x33   :  { %898 = vmatpush3.bf16.msra.mxu0 %v998_v49 }
  0x34   :  { %899 = vmatprep.subr.bf16.mxu0 %v1001_v51 }
  0x35   :  { %936 = vmatpush3.bf16.msra.mxu1 %v1002_v52 }
  0x36   :  { %937 = vmatprep.subr.bf16.mxu1 %v1009_v58 }
  0x37   :  { %900 = vmatpush3.bf16.msra.mxu0 %v1004_v54 }
  0x38   :  { %901 = vmatprep.subr.bf16.mxu0 %v1008_v57 }
  0x39   :  { %938 = vmatpush3.bf16.msra.mxu1 %v1009_v58 }
  0x3a   :  { %939 = vmatprep.subr.bf16.mxu1 %v1012_v61 }
  0x3b   :  { %902 = vmatpush3.bf16.msra.mxu0 %v1010_v59 }
  0x3c   :  { %903 = vmatprep.subr.bf16.mxu0 %v1011_v60 }
  0x3d   :  { %940 = vmatpush3.bf16.msra.mxu1 %v1012_v61 }
  0x3e   :  { %941 = vmatprep.subr.bf16.mxu1 %v1017_v0 }
  0x3f   :  { %904 = vmatpush3.bf16.msra.mxu0 %v1013_v62 }
  0x41   :  { %942 = vmatpush3.bf16.msra.mxu1 %v1017_v0 }
  0x42   :  { %689 = vmatmul.mubr.bf16.vlgmr.msra.gmra.mrb[8].mxu0 %v1014_v2 }
  0x43   :  { %696 = vmatprep.mubr.bf16.mxu0 %v1020_v3 }
  0x44   :  { %944 = vmatmul.mubr.bf16.vlgmr.msra.gmra.mrb[8].mxu1 %v1019_v4 }
  0x4a   :  { %697 = vmatmul.mubr.bf16.gmra.mrb[12].mxu0 %v1022_v5 }
  0xf5   :  { %v849_v6 = vpop.f32.mrb[0].mxu0 }
  0xf6   :  { %v850_v8 = vpop.f32.mrb[1].mxu0 }
  0xf7   :  { %v851_v9 = vadd.f32 %v850_v8, %v849_v6  ;;  %v852_v10 = vpop.f32.mrb[2].mxu0  ;;  %v877_v11 = vpop.f32.mrb[0].mxu1 }
  0xf8   :  { %v853_v12 = vpop.f32.mrb[3].mxu0  ;;  %v878_v15 = vpop.f32.mrb[1].mxu1 }
  0xf9   :  { %v593_v13 = vadd.f32 %v851_v9, %v762_v7  ;;  %v854_v14 = vadd.f32 %v853_v12, %v852_v10  ;;  %v879_v16 = vadd.f32 %v878_v15, %v877_v11  ;;  %v880_v17 = vpop.f32.mrb[2].mxu1 }
  0xfa   :  { %v881_v19 = vpop.f32.mrb[3].mxu1 }
  0xfb   :  { %v596_v18 = vadd.f32 %v854_v14, %v762_v7  ;;  %v642_v20 = vadd.f32 %v879_v16, %v593_v13  ;;  %v882_v21 = vadd.f32 %v881_v19, %v880_v17 }
  0xfd   :  { %v645_v22 = vadd.f32 %v882_v21, %v596_v18  ;;  %v855_v23 = vpop.f32.mrb[4].mxu0 }
  0xfe   :  { %v856_v24 = vpop.f32.mrb[5].mxu0 }
  0xff   :  { %v857_v25 = vadd.f32 %v856_v24, %v855_v23  ;;  %v858_v26 = vpop.f32.mrb[6].mxu0  ;;  %v883_v27 = vpop.f32.mrb[4].mxu1 }
 0x100   :  { %v859_v28 = vpop.f32.mrb[7].mxu0  ;;  %v884_v31 = vpop.f32.mrb[5].mxu1 }
 0x101   :  { %v601_v29 = vadd.f32 %v857_v25, %v762_v7  ;;  %v860_v30 = vadd.f32 %v859_v28, %v858_v26  ;;  %v885_v32 = vadd.f32 %v884_v31, %v883_v27  ;;  %v886_v33 = vpop.f32.mrb[6].mxu1 }
 0x102   :  { %v887_v35 = vpop.f32.mrb[7].mxu1 }
 0x103   :  { %v604_v34 = vadd.f32 %v860_v30, %v762_v7  ;;  %v650_v36 = vadd.f32 %v885_v32, %v601_v29  ;;  %v888_v37 = vadd.f32 %v887_v35, %v886_v33 }
 0x105   :  { %v653_v38 = vadd.f32 %v888_v37, %v604_v34 }
 0x115   :  { %v905_v39 = vpop.f32.mrb[8].mxu0 }
 0x116   :  { %v906_v40 = vpop.f32.mrb[9].mxu0 }
 0x117   :  { %v907_v41 = vadd.f32 %v906_v40, %v905_v39  ;;  %v908_v42 = vpop.f32.mrb[10].mxu0  ;;  %v945_v44 = vpop.f32.mrb[8].mxu1 }
 0x118   :  { %v909_v43 = vpop.f32.mrb[11].mxu0  ;;  %v739_v47 = vpop.f32.mrb[9].mxu1 }
 0x119   :  { %v910_v45 = vadd.f32 %v909_v43, %v908_v42  ;;  %v691_v46 = vadd.f32 %v907_v41, %v642_v20  ;;  %v946_v48 = vpop.f32.mrb[10].mxu1 }
 0x11a   :  { %v742_v51 = vpop.f32.mrb[11].mxu1 }
 0x11b   :  { %v740_v49 = vadd.f32 %v739_v47, %v691_v46  ;;  %v694_v50 = vadd.f32 %v910_v45, %v645_v22 }
 0x11d   :  { %754 = vst [vmem:[%s1271_s3] sm:$0xff] %v740_v49  ;;  %v743_v52 = vadd.f32 %v742_v51, %v694_v50  ;;  %v911_v53 = vpop.f32.mrb[12].mxu0 }
 0x11e   :  { %v912_v54 = vpop.f32.mrb[13].mxu0 }
 0x11f   :  { %755 = vst [vmem:[%s1271_s3 + $0x8] sm:$0xff] %v743_v52  ;;  %v913_v55 = vadd.f32 %v912_v54, %v911_v53  ;;  %v914_v56 = vpop.f32.mrb[14].mxu0 }
 0x120   :  { %v915_v57 = vpop.f32.mrb[15].mxu0 }
 0x121   :  { %v699_v58 = vadd.f32 %v913_v55, %v650_v36  ;;  %v916_v59 = vadd.f32 %v915_v57, %v914_v56 }
 0x123   :  { %v748_v60 = vadd.f32 %v945_v44, %v699_v58  ;;  %v702_v61 = vadd.f32 %v916_v59, %v653_v38 }
 0x125   :  { %756 = vst [vmem:[%s1271_s3 + $0x10] sm:$0xff] %v748_v60  ;;  %v751_v62 = vadd.f32 %v946_v48, %v702_v61 }
 0x127   :  { %757 = vst [vmem:[%s1271_s3 + $0x18] sm:$0xff] %v751_v62 }

// kernel: video_codec_forward.25
= control target key start
LH: loop header
LB: loop body
LE: loop exit
PB: predicated region body
PF: predicated region fallthrough
CT: control target
= control target key end

     0   :  { %v28_v2 = vlaneseq  ;;  %s180_s0 = inlined_call_operand.vmem [shape: f32[8,128], index: 0, kind: input, shape index: {}]   ;;  %s181_s1 = inlined_call_operand.vmem [shape: f32[1,128], index: 1, kind: input, shape index: {}]   ;;  %s182_s2 = inlined_call_operand.vmem [shape: f32[8,128], index: 2, kind: output, shape index: {0}]   ;;  %s183_s3 = inlined_call_operand.hbm [shape: f32[1,1], index: 3, kind: output, shape index: {1}]  }
   0x1   :  { %v20_v0 = vld [vmem:[%s180_s0] sm:$0xff] }
   0x2   :  { %v23_v1 = vld [vmem:[%s181_s1] sm:$0x1] }
   0x3   :  { %9 = vsyncpa [#allocation3], 0  ;;  %v94_v3 = vround.rtne.f32 %v20_v0  ;;  %v24_v4 = vmax.f32 %v23_v1, 1e-06  ;;  %v29_v5 = vshrl.u32 %v28_v2, 7  ;;  %vm18_vm0 = vcmask 0  }
   0x4   :  { %v135_v29 = vmov 0.0   ;;  %s136_s0 = smov [#allocation2]  }
   0x5   :  { %22 = vst [vmem:[%s182_s2] sm:$0xff] %v94_v3  ;;  %v30_v6 = vsub.s32 0, %v29_v5  ;;  %v25_v8 = vadd.f32 0.5, %v94_v3  ;;  %v93_v9 = vadd.f32 -0.5, %v94_v3  ;;  %19 = vst.msk [vmem:[#allocation2] sm:$0x1] %vm18_vm0, %v135_v29  ;;  %s83_s1 = sshll.u32 %s136_s0, 4  ;;  %s84_s1 = int_to_ptr.vmem [resolvable:$true] %s83_s1 }
   0x6   :  { %s111_s18 = scalar_lea.vmem %s84_s1, 16  ;;  %s115_s19 = scalar_lea.vmem %s84_s1, 32 }
   0x7   :  { %v31_v7 = vrot.slane %v24_v4, %v30_v6  ;;  %v26_v10 = vsub.f32 0.0, %v25_v8  ;;  %v41_v11 = vsub.f32 0.0, %v93_v9  ;;  %p112_p0 = scmp.ne.s32.totalorder %s84_s1, %s111_s18  ;;  %p116_p1 = scmp.lt.s32.totalorder %s84_s1, %s84_s1 }
   0x8   :  { %p117_p2 = scmp.lt.s32.totalorder %s115_s19, %s111_s18 }
   0x9   :  { %99 = vrcp.f32 %v31_v7 }
   0xa   :  { %p118_p3 = por %p117_p2, %p116_p1 }
   0xc   :  { %v61_v37 = vld [vmem:[#allocation2] sm:$0x1]  ;;  %p119_p4 = pnand %p118_p3, %p112_p0 }
  0x13   :  { %v100_v12 = vpop.eup %99 }
  0x14   :  { %v34_v13 = vmul.f32 %v100_v12, %v26_v10  ;;  %v42_v14 = vmul.f32 %v100_v12, %v41_v11 }
  0x16   :  { %v35_v15 = vmul.f32 1.442695, %v34_v13  ;;  %v43_v16 = vmul.f32 1.442695, %v42_v14 }
  0x18   :  { %101 = vpow2.f32 %v35_v15 }
  0x19   :  { %103 = vpow2.f32 %v43_v16 }
  0x22   :  { %v102_v17 = vpop.eup %101 }
  0x23   :  { %v104_v18 = vpop.eup %103  ;;  %v37_v19 = vadd.f32 1.0, %v102_v17 }
  0x24   :  { %v45_v20 = vadd.f32 1.0, %v104_v18 }
  0x25   :  { %105 = vrcp.f32 %v37_v19 }
  0x26   :  { %107 = vrcp.f32 %v45_v20 }
  0x2f   :  { %v106_v21 = vpop.eup %105 }
  0x30   :  { %v108_v22 = vpop.eup %107 }
  0x31   :  { %v48_v23 = vsub.f32 %v106_v21, %v108_v22 }
  0x33   :  { %v49_v24 = vmax.f32 %v48_v23, 1e-09 }
  0x35   :  { %109 = vlog2.f32 %v49_v24 }
  0x3f   :  { %v110_v25 = vpop.eup %109 }
  0x40   :  { %v51_v26 = vmul.f32 0.6931472, %v110_v25 }
  0x42   :  { %v52_v27 = vsub.f32 0.0, %v51_v26 }
  0x44   :  { %v53_v28 = vmul.f32 1.442695, %v52_v27 }
  0x46   :  { %62 = vadd.xlane.f32.xlu0 %v53_v28 }
  0xd3   :  { %v63_v30 = vpop.xlane.xlu0 %62 }
  0xd4   :  { %v64_v31 = vrot.slane %v63_v30, 4 }
  0xd6   :  { %v65_v32 = vadd.f32 %v64_v31, %v63_v30 }
  0xd8   :  { %v66_v33 = vrot.slane %v65_v32, 2 }
  0xda   :  { %v67_v34 = vadd.f32 %v66_v33, %v65_v32 }
  0xdc   :  { %v68_v35 = vrot.slane %v67_v34, 1 }
  0xde   :  { %v69_v36 = vadd.f32 %v68_v35, %v67_v34 }
  0xe0   :  { %95 = vpush %v69_v36 }
 0x111   :  { %s96_s2 = spop %95 }
 0x112   :  { %v71_v38 = vstv %s96_s2 }
 0x113   :  { %v72_v39 = vadd.f32 %v71_v38, %v61_v37 }
 0x115   :  { %74 = vst.msk [vmem:[#allocation2] sm:$0x1] %vm18_vm0, %v72_v39 }
 0x116   :  { %122 = shalt.err (!%p119_p4)
}
 0x117   :  { %s123_s22 = scalar_lea.hbm %s183_s3, 16 }
 0x118   :  { %p124_p5 = scmp.ne.s32.totalorder %s183_s3, %s123_s22  ;;  %p127_p6 = scmp.lt.u32.totalorder %s123_s22, %s183_s3 }
 0x11a   :  { %p129_p7 = pnand %p127_p6, %p124_p5 }
 0x11c   :  { %132 = shalt.err (!%p129_p7)
}
 0x11d   :  { %86 = dma.vmem_to_hbm [thread:$0]  %s84_s1, 16, %s183_s3, [#allocation3]  }
 0x11e   :  { %133 = dma.done.wait [#allocation3], 16  }
 0x11f   :  { %134 = vsyncadd [#allocation3], 4294967280 }
 0x120   :  { %92 = vsyncpa [#allocation3], 1 }

// kernel: video_codec_forward.24
= control target key start
LH: loop header
LB: loop body
LE: loop exit
PB: predicated region body
PF: predicated region fallthrough
CT: control target
= control target key end

     0   :  { %v420_v1 = vmov 0.0   ;;  %vm421_vm0 = vmmov 0   ;;  %s526_s1 = inlined_call_operand.vmem [shape: bf16[384,128], index: 1, kind: input, shape index: {}]   ;;  %s527_s0 = inlined_call_operand.vmem [shape: bf16[8,384], index: 0, kind: input, shape index: {}]   ;;  %s528_s2 = inlined_call_operand.vmem [shape: f32[1,128], index: 2, kind: input, shape index: {}]   ;;  %s529_s3 = inlined_call_operand.vmem [shape: f32[8,128], index: 3, kind: output, shape index: {}]  }
   0x1   :  { %v393_v0 = vld [vmem:[%s526_s1 + $0x40] sm:$0xff]   ;;  %371 = vmatprep.subr.bf16.mxu1 %v420_v1  ;;  %387 = vmatprep.mubr.msk.bf16.mxu1 %vm421_vm0, %v420_v1  ;;  %v396_v4 = vld [vmem:[%s526_s1 + $0x48] sm:$0xff]   ;;  %v399_v7 = vld [vmem:[%s526_s1 + $0x50] sm:$0xff]  }
   0x2   :  { %v394_v2 = vld [vmem:[%s526_s1] sm:$0xff]   ;;  %340 = vmatprep.subr.bf16.mxu0 %v393_v0  ;;  %v397_v5 = vld [vmem:[%s526_s1 + $0x8] sm:$0xff]   ;;  %v400_v8 = vld [vmem:[%s526_s1 + $0x10] sm:$0xff]  }
   0x3   :  { %v395_v3 = vld [vmem:[%s526_s1 + $0x80] sm:$0xff]   ;;  %341 = vmatpush3.bf16.msra.mxu0 %v394_v2  ;;  %v398_v6 = vld [vmem:[%s526_s1 + $0x88] sm:$0xff]   ;;  %v401_v9 = vld [vmem:[%s526_s1 + $0x90] sm:$0xff]  }
   0x4   :  { %372 = vmatpush3.bf16.msra.mxu1 %v395_v3  ;;  %342 = vmatprep.subr.bf16.mxu0 %v396_v4  ;;  %v402_v10 = vld [vmem:[%s526_s1 + $0x58] sm:$0xff]   ;;  %v405_v13 = vld [vmem:[%s526_s1 + $0x60] sm:$0xff]   ;;  %v408_v16 = vld [vmem:[%s526_s1 + $0x68] sm:$0xff]  }
   0x5   :  { %373 = vmatprep.subr.bf16.mxu1 %v420_v1  ;;  %v403_v11 = vld [vmem:[%s526_s1 + $0x18] sm:$0xff]   ;;  %v406_v14 = vld [vmem:[%s526_s1 + $0x20] sm:$0xff]   ;;  %v409_v17 = vld [vmem:[%s526_s1 + $0x28] sm:$0xff]  }
   0x6   :  { %v404_v12 = vld [vmem:[%s526_s1 + $0x98] sm:$0xff]   ;;  %v407_v15 = vld [vmem:[%s526_s1 + $0xa0] sm:$0xff]   ;;  %v410_v18 = vld [vmem:[%s526_s1 + $0xa8] sm:$0xff]  }
   0x7   :  { %343 = vmatpush3.bf16.msra.mxu0 %v397_v5  ;;  %v411_v19 = vld [vmem:[%s526_s1 + $0x70] sm:$0xff]   ;;  %v15_v22 = vld [vmem:[%s527_s0] sm:$0xff]  ;;  %v414_v23 = vld [vmem:[%s526_s1 + $0x78] sm:$0xff]  }
   0x8   :  { %374 = vmatpush3.bf16.msra.mxu1 %v398_v6  ;;  %344 = vmatprep.subr.bf16.mxu0 %v399_v7  ;;  %v412_v20 = vld [vmem:[%s526_s1 + $0x30] sm:$0xff]   ;;  %v314_v24 = vcombine.high %v15_v22, %v15_v22  ;;  %v415_v25 = vld [vmem:[%s526_s1 + $0x38] sm:$0xff]   ;;  %v313_v27 = vcombine.low %v15_v22, %v15_v22  ;;  %v418_v28 = vld [vmem:[%s527_s0 + $0x8] ss:$0 sps:$4 sm:$0xff]  }
   0x9   :  { %375 = vmatprep.subr.bf16.mxu1 %v420_v1  ;;  %v413_v21 = vld [vmem:[%s526_s1 + $0xb0] sm:$0xff]   ;;  %v419_v26 = vld [vmem:[%s526_s1 + $0xb8] sm:$0xff]   ;;  %v312_v31 = vld [vmem:[%s528_s2] ss:$0 sm:$0xff] }
   0xa   :  { %259 = vmatprep.mubr.bf16.mxu0 %v314_v24 }
   0xb   :  { %345 = vmatpush3.bf16.msra.mxu0 %v400_v8 }
   0xc   :  { %376 = vmatpush3.bf16.msra.mxu1 %v401_v9  ;;  %346 = vmatprep.subr.bf16.mxu0 %v402_v10 }
   0xd   :  { %377 = vmatprep.subr.bf16.mxu1 %v420_v1 }
   0xf   :  { %347 = vmatpush3.bf16.msra.mxu0 %v403_v11 }
  0x10   :  { %378 = vmatpush3.bf16.msra.mxu1 %v404_v12  ;;  %348 = vmatprep.subr.bf16.mxu0 %v405_v13 }
  0x11   :  { %379 = vmatprep.subr.bf16.mxu1 %v420_v1 }
  0x13   :  { %349 = vmatpush3.bf16.msra.mxu0 %v406_v14 }
  0x14   :  { %380 = vmatpush3.bf16.msra.mxu1 %v407_v15  ;;  %350 = vmatprep.subr.bf16.mxu0 %v408_v16 }
  0x15   :  { %381 = vmatprep.subr.bf16.mxu1 %v420_v1 }
  0x17   :  { %351 = vmatpush3.bf16.msra.mxu0 %v409_v17 }
  0x18   :  { %382 = vmatpush3.bf16.msra.mxu1 %v410_v18  ;;  %352 = vmatprep.subr.bf16.mxu0 %v411_v19 }
  0x19   :  { %383 = vmatprep.subr.bf16.mxu1 %v420_v1 }
  0x1b   :  { %353 = vmatpush3.bf16.msra.mxu0 %v412_v20 }
  0x1c   :  { %384 = vmatpush3.bf16.msra.mxu1 %v413_v21  ;;  %354 = vmatprep.subr.bf16.mxu0 %v414_v23 }
  0x1d   :  { %385 = vmatprep.subr.bf16.mxu1 %v420_v1 }
  0x1f   :  { %355 = vmatpush3.bf16.msra.mxu0 %v415_v25 }
  0x20   :  { %386 = vmatpush3.bf16.msra.mxu1 %v419_v26 }
  0x22   :  { %260 = vmatmul.mubr.bf16.vlgmr.msra.gmra.mrb[0].mxu0 %v313_v27 }
  0x23   :  { %388 = vmatmul.mubr.bf16.vlgmr.msra.gmra.mrb[0].mxu1 %v418_v28 }
  0xf5   :  { %v356_v29 = vpop.f32.mrb[0].mxu0 }
  0xf6   :  { %v357_v30 = vpop.f32.mrb[1].mxu0  ;;  %v301_v32 = vpop.f32.mrb[0].mxu1 }
  0xf7   :  { %v358_v33 = vadd.f32 %v357_v30, %v356_v29  ;;  %v359_v34 = vpop.f32.mrb[2].mxu0  ;;  %v389_v35 = vpop.f32.mrb[1].mxu1 }
  0xf8   :  { %v360_v36 = vpop.f32.mrb[3].mxu0  ;;  %v304_v37 = vpop.f32.mrb[2].mxu1 }
  0xf9   :  { %v262_v38 = vadd.f32 %v358_v33, %v312_v31  ;;  %v390_v39 = vpop.f32.mrb[3].mxu1 }
  0xfb   :  { %v302_v40 = vadd.f32 %v301_v32, %v262_v38 }
  0xfd   :  { %307 = vst [vmem:[%s529_s3] sm:$0xff] %v302_v40 }

// kernel: video_codec_forward.26
= control target key start
LH: loop header
LB: loop body
LE: loop exit
PB: predicated region body
PF: predicated region fallthrough
CT: control target
= control target key end

     0   :  { %s465_s1 = inlined_call_operand.vmem [shape: bf16[256,128], index: 1, kind: input, shape index: {}]   ;;  %s466_s0 = inlined_call_operand.vmem [shape: bf16[32,256], index: 0, kind: input, shape index: {}]   ;;  %s467_s2 = inlined_call_operand.vmem [shape: f32[1,128], index: 2, kind: input, shape index: {}]   ;;  %s468_s3 = inlined_call_operand.vmem [shape: f32[32,128], index: 3, kind: output, shape index: {}]  }
   0x1   :  { %v332_v0 = vld [vmem:[%s465_s1 + $0x40] sm:$0xff]   ;;  %v334_v2 = vld [vmem:[%s465_s1 + $0x48] sm:$0xff]   ;;  %v336_v4 = vld [vmem:[%s465_s1 + $0x50] sm:$0xff]  }
   0x2   :  { %v333_v1 = vld [vmem:[%s465_s1] sm:$0xff]   ;;  %288 = vmatprep.subr.bf16.mxu0 %v332_v0  ;;  %316 = vmatprep.subr.bf16.mxu1 %v332_v0  ;;  %v335_v3 = vld [vmem:[%s465_s1 + $0x8] sm:$0xff]   ;;  %v337_v5 = vld [vmem:[%s465_s1 + $0x10] sm:$0xff]  }
   0x3   :  { %289 = vmatpush3.bf16.msra.mxu0 %v333_v1  ;;  %324 = vmatpush3.bf16.msra.mxu1 %v333_v1  ;;  %v338_v6 = vld [vmem:[%s465_s1 + $0x58] sm:$0xff]   ;;  %v340_v8 = vld [vmem:[%s465_s1 + $0x60] sm:$0xff]   ;;  %v342_v10 = vld [vmem:[%s465_s1 + $0x68] sm:$0xff]  }
   0x4   :  { %290 = vmatprep.subr.bf16.mxu0 %v334_v2  ;;  %317 = vmatprep.subr.bf16.mxu1 %v334_v2  ;;  %v339_v7 = vld [vmem:[%s465_s1 + $0x18] sm:$0xff]   ;;  %v341_v9 = vld [vmem:[%s465_s1 + $0x20] sm:$0xff]   ;;  %v343_v13 = vld [vmem:[%s465_s1 + $0x28] sm:$0xff]  }
   0x5   :  { %v350_v11 = vld [vmem:[%s466_s0 + $0x4] ss:$8 sps:$4 sm:$0xff]   ;;  %v353_v12 = vld [vmem:[%s466_s0 + $0x14] ss:$8 sps:$4 sm:$0xff]   ;;  %v348_v18 = vld [vmem:[%s466_s0] ss:$8 sps:$4 sm:$0xff]  }
   0x6   :  { %v344_v14 = vld [vmem:[%s465_s1 + $0x70] sm:$0xff]   ;;  %206 = vmatprep.mubr.bf16.mxu0 %v350_v11  ;;  %214 = vmatprep.mubr.bf16.mxu1 %v353_v12  ;;  %v346_v16 = vld [vmem:[%s465_s1 + $0x78] sm:$0xff]   ;;  %v267_v22 = vld [vmem:[%s467_s2] ss:$0 sm:$0xff] }
   0x7   :  { %291 = vmatpush3.bf16.msra.mxu0 %v335_v3  ;;  %325 = vmatpush3.bf16.msra.mxu1 %v335_v3  ;;  %v345_v15 = vld [vmem:[%s465_s1 + $0x30] sm:$0xff]   ;;  %v347_v17 = vld [vmem:[%s465_s1 + $0x38] sm:$0xff]  }
   0x8   :  { %292 = vmatprep.subr.bf16.mxu0 %v336_v4  ;;  %318 = vmatprep.subr.bf16.mxu1 %v336_v4  ;;  %v351_v19 = vld [vmem:[%s466_s0 + $0x10] ss:$8 sps:$4 sm:$0xff]  }
   0xb   :  { %293 = vmatpush3.bf16.msra.mxu0 %v337_v5  ;;  %326 = vmatpush3.bf16.msra.mxu1 %v337_v5 }
   0xc   :  { %294 = vmatprep.subr.bf16.mxu0 %v338_v6  ;;  %319 = vmatprep.subr.bf16.mxu1 %v338_v6 }
   0xf   :  { %295 = vmatpush3.bf16.msra.mxu0 %v339_v7  ;;  %327 = vmatpush3.bf16.msra.mxu1 %v339_v7 }
  0x10   :  { %296 = vmatprep.subr.bf16.mxu0 %v340_v8  ;;  %320 = vmatprep.subr.bf16.mxu1 %v340_v8 }
  0x13   :  { %297 = vmatpush3.bf16.msra.mxu0 %v341_v9  ;;  %328 = vmatpush3.bf16.msra.mxu1 %v341_v9 }
  0x14   :  { %298 = vmatprep.subr.bf16.mxu0 %v342_v10  ;;  %321 = vmatprep.subr.bf16.mxu1 %v342_v10 }
  0x17   :  { %299 = vmatpush3.bf16.msra.mxu0 %v343_v13  ;;  %329 = vmatpush3.bf16.msra.mxu1 %v343_v13 }
  0x18   :  { %300 = vmatprep.subr.bf16.mxu0 %v344_v14  ;;  %322 = vmatprep.subr.bf16.mxu1 %v344_v14 }
  0x1b   :  { %301 = vmatpush3.bf16.msra.mxu0 %v345_v15  ;;  %330 = vmatpush3.bf16.msra.mxu1 %v345_v15 }
  0x1c   :  { %302 = vmatprep.subr.bf16.mxu0 %v346_v16  ;;  %323 = vmatprep.subr.bf16.mxu1 %v346_v16 }
  0x1f   :  { %303 = vmatpush3.bf16.msra.mxu0 %v347_v17  ;;  %331 = vmatpush3.bf16.msra.mxu1 %v347_v17 }
  0x22   :  { %207 = vmatmul.mubr.bf16.vlgmr.msra.gmra.mrb[0].mxu0 %v348_v18  ;;  %215 = vmatmul.mubr.bf16.vlgmr.msra.gmra.mrb[0].mxu1 %v351_v19 }
  0xf5   :  { %v304_v20 = vpop.f32.mrb[0].mxu0  ;;  %v310_v21 = vpop.f32.mrb[0].mxu1 }
  0xf6   :  { %v305_v23 = vpop.f32.mrb[1].mxu0  ;;  %v311_v24 = vpop.f32.mrb[1].mxu1 }
  0xf7   :  { %v306_v25 = vadd.f32 %v305_v23, %v304_v20  ;;  %v312_v26 = vadd.f32 %v311_v24, %v310_v21  ;;  %v307_v27 = vpop.f32.mrb[2].mxu0  ;;  %v313_v28 = vpop.f32.mrb[2].mxu1 }
  0xf8   :  { %v308_v29 = vpop.f32.mrb[3].mxu0  ;;  %v314_v30 = vpop.f32.mrb[3].mxu1 }
  0xf9   :  { %v209_v31 = vadd.f32 %v306_v25, %v267_v22  ;;  %v217_v32 = vadd.f32 %v312_v26, %v267_v22  ;;  %v309_v33 = vadd.f32 %v308_v29, %v307_v27  ;;  %v315_v34 = vadd.f32 %v314_v30, %v313_v28 }
  0xfb   :  { %v227_v35 = vand.u32 2147483647, %v209_v31  ;;  %v229_v36 = vand.u32 2147483647, %v217_v32  ;;  %v212_v37 = vadd.f32 %v309_v33, %v267_v22  ;;  %v220_v38 = vadd.f32 %v315_v34, %v267_v22 }
  0xfc   :  { %v223_v59 = vmax.f32 %v209_v31, 0.0  ;;  %v225_v61 = vmax.f32 %v217_v32, 0.0 }
  0xfd   :  { %v231_v39 = vsub.f32 0.0, %v227_v35  ;;  %v233_v40 = vsub.f32 0.0, %v229_v36  ;;  %v228_v41 = vand.u32 2147483647, %v212_v37  ;;  %v230_v42 = vand.u32 2147483647, %v220_v38 }
  0xfe   :  { %v224_v3 = vmax.f32 %v212_v37, 0.0  ;;  %v226_v5 = vmax.f32 %v220_v38, 0.0 }
  0xff   :  { %v235_v43 = vmul.f32 1.442695, %v231_v39  ;;  %v239_v44 = vmul.f32 1.442695, %v233_v40  ;;  %v232_v45 = vsub.f32 0.0, %v228_v41  ;;  %v234_v46 = vsub.f32 0.0, %v230_v42 }
 0x101   :  { %354 = vpow2.f32 %v235_v43  ;;  %v237_v47 = vmul.f32 1.442695, %v232_v45  ;;  %v241_v48 = vmul.f32 1.442695, %v234_v46 }
 0x102   :  { %356 = vpow2.f32 %v239_v44 }
 0x103   :  { %358 = vpow2.f32 %v237_v47 }
 0x104   :  { %360 = vpow2.f32 %v241_v48 }
 0x10b   :  { %v355_v49 = vpop.eup %354 }
 0x10c   :  { %v357_v50 = vpop.eup %356  ;;  %v243_v51 = vadd.f32 1.0, %v355_v49 }
 0x10d   :  { %v245_v52 = vadd.f32 1.0, %v357_v50  ;;  %v359_v53 = vpop.eup %358 }
 0x10e   :  { %362 = vlog2.f32 %v243_v51  ;;  %v361_v54 = vpop.eup %360  ;;  %v244_v55 = vadd.f32 1.0, %v359_v53 }
 0x10f   :  { %364 = vlog2.f32 %v245_v52  ;;  %v246_v56 = vadd.f32 1.0, %v361_v54 }
 0x110   :  { %366 = vlog2.f32 %v244_v55 }
 0x111   :  { %368 = vlog2.f32 %v246_v56 }
 0x118   :  { %v363_v57 = vpop.eup %362 }
 0x119   :  { %v365_v58 = vpop.eup %364  ;;  %v248_v60 = vmul.f32 0.6931472, %v363_v57 }
 0x11a   :  { %v252_v62 = vmul.f32 0.6931472, %v365_v58  ;;  %v367_v63 = vpop.eup %366 }
 0x11b   :  { %v255_v0 = vadd.f32 %v248_v60, %v223_v59  ;;  %v369_v1 = vpop.eup %368  ;;  %v250_v4 = vmul.f32 0.6931472, %v367_v63 }
 0x11c   :  { %v257_v2 = vadd.f32 %v252_v62, %v225_v61  ;;  %v254_v6 = vmul.f32 0.6931472, %v369_v1 }
 0x11d   :  { %259 = vst [vmem:[%s468_s3] sm:$0xff] %v255_v0  ;;  %v256_v7 = vadd.f32 %v250_v4, %v224_v3 }
 0x11e   :  { %261 = vst [vmem:[%s468_s3 + $0x10] sm:$0xff] %v257_v2  ;;  %v258_v8 = vadd.f32 %v254_v6, %v226_v5 }
 0x11f   :  { %260 = vst [vmem:[%s468_s3 + $0x8] sm:$0xff] %v256_v7 }
 0x120   :  { %262 = vst [vmem:[%s468_s3 + $0x18] sm:$0xff] %v258_v8 }

// kernel: video_codec_forward.27
= control target key start
LH: loop header
LB: loop body
LE: loop exit
PB: predicated region body
PF: predicated region fallthrough
CT: control target
= control target key end

     0   :  { %s342_s0 = inlined_call_operand.vmem [shape: f32[32,128], index: 0, kind: input, shape index: {}]   ;;  %s343_s1 = inlined_call_operand.vmem [shape: f32[32,128], index: 1, kind: input, shape index: {}]   ;;  %s344_s2 = inlined_call_operand.vmem [shape: f32[32,128], index: 2, kind: output, shape index: {0}]   ;;  %s345_s3 = inlined_call_operand.hbm [shape: f32[1,1], index: 3, kind: output, shape index: {1}]  }
   0x1   :  { %v20_v0 = vld [vmem:[%s342_s0] sm:$0xff]  ;;  %v21_v1 = vld [vmem:[%s342_s0 + $0x8] sm:$0xff]  ;;  %v22_v2 = vld [vmem:[%s342_s0 + $0x10] sm:$0xff] }
   0x2   :  { %v23_v3 = vld [vmem:[%s342_s0 + $0x18] sm:$0xff]  ;;  %v190_v4 = vround.rtne.f32 %v20_v0  ;;  %v191_v5 = vround.rtne.f32 %v21_v1  ;;  %v192_v6 = vround.rtne.f32 %v22_v2  ;;  %v32_v7 = vld [vmem:[%s343_s1] sm:$0xff]  ;;  %v33_v8 = vld [vmem:[%s343_s1 + $0x8] sm:$0xff] }
   0x3   :  { %v193_v9 = vround.rtne.f32 %v23_v3  ;;  %v34_v10 = vld [vmem:[%s343_s1 + $0x10] sm:$0xff]  ;;  %v35_v11 = vld [vmem:[%s343_s1 + $0x18] sm:$0xff]  ;;  %v36_v12 = vmax.f32 %v32_v7, 1e-06  ;;  %v37_v13 = vmax.f32 %v33_v8, 1e-06 }
   0x4   :  { %28 = vst [vmem:[%s344_s2] sm:$0xff] %v190_v4  ;;  %29 = vst [vmem:[%s344_s2 + $0x8] sm:$0xff] %v191_v5  ;;  %v38_v14 = vmax.f32 %v34_v10, 1e-06  ;;  %v39_v15 = vmax.f32 %v35_v11, 1e-06 }
   0x5   :  { %30 = vst [vmem:[%s344_s2 + $0x10] sm:$0xff] %v192_v6  ;;  %31 = vst [vmem:[%s344_s2 + $0x18] sm:$0xff] %v193_v9  ;;  %198 = vrcp.f32 %v36_v12 }
   0x6   :  { %9 = vsyncpa [#allocation3], 0  ;;  %200 = vrcp.f32 %v37_v13  ;;  %v40_v16 = vadd.f32 0.5, %v190_v4  ;;  %v186_v17 = vadd.f32 -0.5, %v190_v4  ;;  %v41_v18 = vadd.f32 0.5, %v191_v5  ;;  %s271_s1 = smov [#allocation2]  }
   0x7   :  { %202 = vrcp.f32 %v38_v14  ;;  %v187_v19 = vadd.f32 -0.5, %v191_v5  ;;  %v42_v20 = vadd.f32 0.5, %v192_v6  ;;  %v188_v21 = vadd.f32 -0.5, %v192_v6  ;;  %s176_s2 = sshll.u32 %s271_s1, 4  ;;  %s177_s2 = int_to_ptr.vmem [resolvable:$true] %s176_s2 }
   0x8   :  { %204 = vrcp.f32 %v39_v15  ;;  %v43_v22 = vadd.f32 0.5, %v193_v9  ;;  %v189_v23 = vadd.f32 -0.5, %v193_v9  ;;  %v44_v24 = vsub.f32 0.0, %v40_v16  ;;  %s246_s9 = scalar_lea.vmem %s177_s2, 16  ;;  %s250_s10 = scalar_lea.vmem %s177_s2, 32 }
   0x9   :  { %v80_v25 = vsub.f32 0.0, %v186_v17  ;;  %v45_v26 = vsub.f32 0.0, %v41_v18  ;;  %v81_v27 = vsub.f32 0.0, %v187_v19  ;;  %v46_v28 = vsub.f32 0.0, %v42_v20  ;;  %p247_p0 = scmp.ne.s32.totalorder %s177_s2, %s246_s9  ;;  %p251_p1 = scmp.lt.s32.totalorder %s177_s2, %s177_s2 }
   0xa   :  { %v82_v29 = vsub.f32 0.0, %v188_v21  ;;  %v47_v31 = vsub.f32 0.0, %v43_v22  ;;  %v83_v32 = vsub.f32 0.0, %v189_v23  ;;  %vm18_vm0 = vcmask 0   ;;  %p252_p2 = scmp.lt.s32.totalorder %s250_s10, %s246_s9 }
   0xc   :  { %p253_p3 = por %p252_p2, %p251_p1 }
   0xe   :  { %p254_p4 = pnand %p253_p3, %p247_p0 }
   0xf   :  { %v199_v30 = vpop.eup %198 }
  0x10   :  { %v201_v33 = vpop.eup %200  ;;  %v49_v34 = vmul.f32 %v199_v30, %v44_v24  ;;  %v84_v35 = vmul.f32 %v199_v30, %v80_v25 }
  0x11   :  { %v203_v36 = vpop.eup %202  ;;  %v51_v37 = vmul.f32 %v201_v33, %v45_v26  ;;  %v85_v38 = vmul.f32 %v201_v33, %v81_v27 }
  0x12   :  { %v205_v39 = vpop.eup %204  ;;  %v53_v40 = vmul.f32 %v203_v36, %v46_v28  ;;  %v56_v41 = vmul.f32 1.442695, %v49_v34  ;;  %v86_v42 = vmul.f32 %v203_v36, %v82_v29  ;;  %v88_v47 = vmul.f32 1.442695, %v84_v35 }
  0x13   :  { %v55_v43 = vmul.f32 %v205_v39, %v47_v31  ;;  %v58_v44 = vmul.f32 1.442695, %v51_v37  ;;  %v87_v45 = vmul.f32 %v205_v39, %v83_v32  ;;  %v90_v49 = vmul.f32 1.442695, %v85_v38 }
  0x14   :  { %206 = vpow2.f32 %v56_v41  ;;  %v60_v46 = vmul.f32 1.442695, %v53_v40  ;;  %v92_v50 = vmul.f32 1.442695, %v86_v42  ;;  %v270_v39 = vmov 0.0  }
  0x15   :  { %208 = vpow2.f32 %v58_v44  ;;  %v62_v48 = vmul.f32 1.442695, %v55_v43  ;;  %v94_v51 = vmul.f32 1.442695, %v87_v45  ;;  %19 = vst.msk [vmem:[#allocation2] sm:$0x1] %vm18_vm0, %v270_v39 }
  0x16   :  { %210 = vpow2.f32 %v60_v46 }
  0x17   :  { %212 = vpow2.f32 %v62_v48 }
  0x18   :  { %214 = vpow2.f32 %v88_v47 }
  0x19   :  { %216 = vpow2.f32 %v90_v49 }
  0x1a   :  { %218 = vpow2.f32 %v92_v50 }
  0x1b   :  { %220 = vpow2.f32 %v94_v51 }
  0x1c   :  { %v151_v47 = vld [vmem:[#allocation2] sm:$0x1] }
  0x1e   :  { %v207_v52 = vpop.eup %206 }
  0x1f   :  { %v209_v53 = vpop.eup %208  ;;  %v64_v54 = vadd.f32 1.0, %v207_v52 }
  0x20   :  { %v211_v55 = vpop.eup %210  ;;  %v65_v56 = vadd.f32 1.0, %v209_v53 }
  0x21   :  { %v213_v57 = vpop.eup %212  ;;  %v66_v58 = vadd.f32 1.0, %v211_v55  ;;  %222 = vrcp.f32 %v64_v54 }
  0x22   :  { %v215_v59 = vpop.eup %214  ;;  %v67_v60 = vadd.f32 1.0, %v213_v57  ;;  %224 = vrcp.f32 %v65_v56 }
  0x23   :  { %v217_v61 = vpop.eup %216  ;;  %226 = vrcp.f32 %v66_v58  ;;  %v96_v62 = vadd.f32 1.0, %v215_v59 }
  0x24   :  { %v219_v63 = vpop.eup %218  ;;  %228 = vrcp.f32 %v67_v60  ;;  %v97_v0 = vadd.f32 1.0, %v217_v61 }
  0x25   :  { %v221_v1 = vpop.eup %220  ;;  %v98_v2 = vadd.f32 1.0, %v219_v63  ;;  %230 = vrcp.f32 %v96_v62 }
  0x26   :  { %v99_v3 = vadd.f32 1.0, %v221_v1  ;;  %232 = vrcp.f32 %v97_v0 }
  0x27   :  { %234 = vrcp.f32 %v98_v2 }
  0x28   :  { %236 = vrcp.f32 %v99_v3 }
  0x2b   :  { %v223_v4 = vpop.eup %222 }
  0x2c   :  { %v225_v5 = vpop.eup %224 }
  0x2d   :  { %v227_v6 = vpop.eup %226 }
  0x2e   :  { %v229_v7 = vpop.eup %228 }
  0x2f   :  { %v231_v8 = vpop.eup %230 }
  0x30   :  { %v233_v9 = vpop.eup %232  ;;  %v108_v10 = vsub.f32 %v223_v4, %v231_v8 }
  0x31   :  { %v235_v11 = vpop.eup %234  ;;  %v109_v12 = vsub.f32 %v225_v5, %v233_v9 }
  0x32   :  { %v237_v13 = vpop.eup %236  ;;  %v110_v14 = vsub.f32 %v227_v6, %v235_v11  ;;  %v112_v15 = vmax.f32 %v108_v10, 1e-09 }
  0x33   :  { %v111_v16 = vsub.f32 %v229_v7, %v237_v13  ;;  %v113_v17 = vmax.f32 %v109_v12, 1e-09 }
  0x34   :  { %v114_v18 = vmax.f32 %v110_v14, 1e-09  ;;  %238 = vlog2.f32 %v112_v15 }
  0x35   :  { %v115_v19 = vmax.f32 %v111_v16, 1e-09  ;;  %240 = vlog2.f32 %v113_v17 }
  0x36   :  { %242 = vlog2.f32 %v114_v18 }
  0x37   :  { %244 = vlog2.f32 %v115_v19 }
  0x3e   :  { %v239_v20 = vpop.eup %238 }
  0x3f   :  { %v241_v21 = vpop.eup %240  ;;  %v117_v22 = vmul.f32 0.6931472, %v239_v20 }
  0x40   :  { %v243_v23 = vpop.eup %242  ;;  %v119_v24 = vmul.f32 0.6931472, %v241_v21 }
  0x41   :  { %v245_v25 = vpop.eup %244  ;;  %v121_v26 = vmul.f32 0.6931472, %v243_v23  ;;  %v124_v27 = vsub.f32 0.0, %v117_v22 }
  0x42   :  { %v123_v28 = vmul.f32 0.6931472, %v245_v25  ;;  %v125_v29 = vsub.f32 0.0, %v119_v24 }
  0x43   :  { %v126_v30 = vsub.f32 0.0, %v121_v26  ;;  %v128_v31 = vmul.f32 1.442695, %v124_v27 }
  0x44   :  { %v127_v32 = vsub.f32 0.0, %v123_v28  ;;  %v129_v33 = vmul.f32 1.442695, %v125_v29 }
  0x45   :  { %v130_v34 = vmul.f32 1.442695, %v126_v30 }
  0x46   :  { %v131_v35 = vmul.f32 1.442695, %v127_v32  ;;  %v152_v36 = vadd.f32 %v129_v33, %v128_v31 }
  0x48   :  { %v153_v37 = vadd.f32 %v152_v36, %v130_v34 }
  0x4a   :  { %v154_v38 = vadd.f32 %v153_v37, %v131_v35 }
  0x4c   :  { %155 = vadd.xlane.f32.xlu0 %v154_v38 }
  0xd9   :  { %v156_v40 = vpop.xlane.xlu0 %155 }
  0xda   :  { %v157_v41 = vrot.slane %v156_v40, 4 }
  0xdc   :  { %v158_v42 = vadd.f32 %v157_v41, %v156_v40 }
  0xde   :  { %v159_v43 = vrot.slane %v158_v42, 2 }
  0xe0   :  { %v160_v44 = vadd.f32 %v159_v43, %v158_v42 }
  0xe2   :  { %v161_v45 = vrot.slane %v160_v44, 1 }
  0xe4   :  { %v162_v46 = vadd.f32 %v161_v45, %v160_v44 }
  0xe6   :  { %194 = vpush %v162_v46 }
 0x117   :  { %s195_s8 = spop %194 }
 0x118   :  { %v164_v48 = vstv %s195_s8 }
 0x119   :  { %v165_v49 = vadd.f32 %v164_v48, %v151_v47 }
 0x11b   :  { %167 = vst.msk [vmem:[#allocation2] sm:$0x1] %vm18_vm0, %v165_v49 }
 0x11c   :  { %257 = shalt.err (!%p254_p4)
}
 0x11d   :  { %s258_s13 = scalar_lea.hbm %s345_s3, 16 }
 0x11e   :  { %p259_p5 = scmp.ne.s32.totalorder %s345_s3, %s258_s13  ;;  %p262_p6 = scmp.lt.u32.totalorder %s258_s13, %s345_s3 }
 0x120   :  { %p264_p7 = pnand %p262_p6, %p259_p5 }
 0x122   :  { %267 = shalt.err (!%p264_p7)
}
 0x123   :  { %179 = dma.vmem_to_hbm [thread:$0]  %s177_s2, 16, %s345_s3, [#allocation3]  }
 0x124   :  { %268 = dma.done.wait [#allocation3], 16  }
 0x125   :  { %269 = vsyncadd [#allocation3], 4294967280 }
 0x126   :  { %185 = vsyncpa [#allocation3], 1 }

// kernel: video_codec_forward.28
= control target key start
LH: loop header
LB: loop body
LE: loop exit
PB: predicated region body
PF: predicated region fallthrough
CT: control target
= control target key end

     0   :  { %s1057_s1 = inlined_call_operand.vmem [shape: bf16[384,128], index: 1, kind: input, shape index: {}]   ;;  %s1058_s0 = inlined_call_operand.vmem [shape: bf16[128,384], index: 0, kind: input, shape index: {}]   ;;  %s1059_s2 = inlined_call_operand.vmem [shape: f32[1,128], index: 2, kind: input, shape index: {}]   ;;  %s1060_s3 = inlined_call_operand.vmem [shape: f32[128,128], index: 3, kind: output, shape index: {}]  }
   0x1   :  { %v765_v0 = vld [vmem:[%s1057_s1 + $0x40] sm:$0xff]   ;;  %v767_v2 = vld [vmem:[%s1057_s1 + $0x48] sm:$0xff]   ;;  %v770_v5 = vld [vmem:[%s1057_s1 + $0x50] sm:$0xff]  }
   0x2   :  { %v766_v1 = vld [vmem:[%s1057_s1] sm:$0xff]   ;;  %653 = vmatprep.subr.bf16.mxu0 %v765_v0  ;;  %v769_v4 = vld [vmem:[%s1057_s1 + $0x8] sm:$0xff]   ;;  %v772_v7 = vld [vmem:[%s1057_s1 + $0x10] sm:$0xff]  }
   0x3   :  { %654 = vmatpush3.bf16.msra.mxu0 %v766_v1  ;;  %v768_v3 = vld [vmem:[%s1057_s1 + $0x80] sm:$0xff]   ;;  %v771_v6 = vld [vmem:[%s1057_s1 + $0x88] sm:$0xff]   ;;  %v773_v8 = vld [vmem:[%s1057_s1 + $0x58] sm:$0xff]  }
   0x4   :  { %655 = vmatprep.subr.bf16.mxu0 %v767_v2  ;;  %733 = vmatprep.subr.bf16.mxu1 %v768_v3  ;;  %v774_v9 = vld [vmem:[%s1057_s1 + $0x90] sm:$0xff]   ;;  %v775_v10 = vld [vmem:[%s1057_s1 + $0x18] sm:$0xff]   ;;  %v776_v11 = vld [vmem:[%s1057_s1 + $0x60] sm:$0xff]  }
   0x5   :  { %734 = vmatpush3.bf16.msra.mxu1 %v768_v3  ;;  %v777_v12 = vld [vmem:[%s1057_s1 + $0x98] sm:$0xff]   ;;  %v778_v13 = vld [vmem:[%s1057_s1 + $0x20] sm:$0xff]   ;;  %v779_v15 = vld [vmem:[%s1057_s1 + $0x68] sm:$0xff]  }
   0x6   :  { %735 = vmatprep.subr.bf16.mxu1 %v771_v6  ;;  %v780_v14 = vld [vmem:[%s1057_s1 + $0xa0] sm:$0xff]   ;;  %v781_v16 = vld [vmem:[%s1057_s1 + $0x28] sm:$0xff]   ;;  %v782_v18 = vld [vmem:[%s1057_s1 + $0x70] sm:$0xff]  }
   0x7   :  { %656 = vmatpush3.bf16.msra.mxu0 %v769_v4  ;;  %v783_v17 = vld [vmem:[%s1057_s1 + $0xa8] sm:$0xff]   ;;  %v784_v19 = vld [vmem:[%s1057_s1 + $0x30] sm:$0xff]   ;;  %v785_v20 = vld [vmem:[%s1057_s1 + $0x78] sm:$0xff]  }
   0x8   :  { %657 = vmatprep.subr.bf16.mxu0 %v770_v5  ;;  %v786_v21 = vld [vmem:[%s1057_s1 + $0xb0] sm:$0xff]   ;;  %v787_v23 = vld [vmem:[%s1057_s1 + $0x38] sm:$0xff]   ;;  %v788_v26 = vld [vmem:[%s1058_s0] ss:$12 sps:$4 sm:$0xff]  }
   0x9   :  { %736 = vmatpush3.bf16.msra.mxu1 %v771_v6  ;;  %v790_v22 = vld [vmem:[%s1058_s0 + $0x4] ss:$12 sps:$4 sm:$0xff]   ;;  %v792_v24 = vld [vmem:[%s1058_s0 + $0x8] ss:$12 sps:$4 sm:$0xff]   ;;  %v791_v25 = vld [vmem:[%s1057_s1 + $0xb8] sm:$0xff]  }
   0xa   :  { %737 = vmatprep.subr.bf16.mxu1 %v774_v9  ;;  %406 = vmatprep.mubr.bf16.mxu0 %v790_v22  ;;  %v794_v27 = vld [vmem:[%s1058_s0 + $0x1c] ss:$12 sps:$4 sm:$0xff]   ;;  %v793_v28 = vld [vmem:[%s1058_s0 + $0x20] ss:$12 sps:$4 sm:$0xff]   ;;  %v800_v29 = vld [vmem:[%s1058_s0 + $0x38] ss:$12 sps:$4 sm:$0xff]  }
   0xb   :  { %658 = vmatpush3.bf16.msra.mxu0 %v772_v7  ;;  %749 = vmatprep.mubr.bf16.mxu1 %v792_v24  ;;  %v796_v30 = vld [vmem:[%s1058_s0 + $0x18] ss:$12 sps:$4 sm:$0xff]   ;;  %v797_v31 = vld [vmem:[%s1058_s0 + $0x34] ss:$12 sps:$4 sm:$0xff]   ;;  %v801_v32 = vld [vmem:[%s1058_s0 + $0x50] ss:$12 sps:$4 sm:$0xff]  }
   0xc   :  { %659 = vmatprep.subr.bf16.mxu0 %v773_v8  ;;  %v808_v33 = vld [vmem:[%s1058_s0 + $0x68] ss:$12 sps:$4 sm:$0xff]   ;;  %v799_v34 = vld [vmem:[%s1058_s0 + $0x30] ss:$12 sps:$4 sm:$0xff]   ;;  %v802_v35 = vld [vmem:[%s1058_s0 + $0x4c] ss:$12 sps:$4 sm:$0xff]  }
   0xd   :  { %738 = vmatpush3.bf16.msra.mxu1 %v774_v9  ;;  %v809_v36 = vld [vmem:[%s1058_s0 + $0x80] ss:$12 sps:$4 sm:$0xff]   ;;  %v816_v37 = vld [vmem:[%s1058_s0 + $0x98] ss:$12 sps:$4 sm:$0xff]   ;;  %v804_v38 = vld [vmem:[%s1058_s0 + $0x48] ss:$12 sps:$4 sm:$0xff]  }
   0xe   :  { %739 = vmatprep.subr.bf16.mxu1 %v777_v12  ;;  %v805_v39 = vld [vmem:[%s1058_s0 + $0x64] ss:$12 sps:$4 sm:$0xff]   ;;  %v807_v41 = vld [vmem:[%s1058_s0 + $0x60] ss:$12 sps:$4 sm:$0xff]   ;;  %v810_v42 = vld [vmem:[%s1058_s0 + $0x7c] ss:$12 sps:$4 sm:$0xff]  }
   0xf   :  { %660 = vmatpush3.bf16.msra.mxu0 %v775_v10  ;;  %v817_v40 = vld [vmem:[%s1058_s0 + $0xb0] ss:$12 sps:$4 sm:$0xff]   ;;  %v812_v43 = vld [vmem:[%s1058_s0 + $0x78] ss:$12 sps:$4 sm:$0xff]   ;;  %v813_v44 = vld [vmem:[%s1058_s0 + $0x94] ss:$12 sps:$4 sm:$0xff]  }
  0x10   :  { %661 = vmatprep.subr.bf16.mxu0 %v776_v11  ;;  %v815_v45 = vld [vmem:[%s1058_s0 + $0x90] ss:$12 sps:$4 sm:$0xff]   ;;  %v818_v46 = vld [vmem:[%s1058_s0 + $0xac] ss:$12 sps:$4 sm:$0xff]   ;;  %v820_v47 = vld [vmem:[%s1058_s0 + $0xa8] ss:$12 sps:$4 sm:$0xff]  }
  0x11   :  { %740 = vmatpush3.bf16.msra.mxu1 %v777_v12  ;;  %v988_v50 = vld [vmem:[%s1059_s2] ss:$0 sm:$0xff] }
  0x12   :  { %741 = vmatprep.subr.bf16.mxu1 %v780_v14 }
  0x13   :  { %662 = vmatpush3.bf16.msra.mxu0 %v778_v13 }
  0x14   :  { %663 = vmatprep.subr.bf16.mxu0 %v779_v15 }
  0x15   :  { %742 = vmatpush3.bf16.msra.mxu1 %v780_v14 }
  0x16   :  { %743 = vmatprep.subr.bf16.mxu1 %v783_v17 }
  0x17   :  { %664 = vmatpush3.bf16.msra.mxu0 %v781_v16 }
  0x18   :  { %665 = vmatprep.subr.bf16.mxu0 %v782_v18 }
  0x19   :  { %744 = vmatpush3.bf16.msra.mxu1 %v783_v17 }
  0x1a   :  { %745 = vmatprep.subr.bf16.mxu1 %v786_v21 }
  0x1b   :  { %666 = vmatpush3.bf16.msra.mxu0 %v784_v19 }
  0x1c   :  { %667 = vmatprep.subr.bf16.mxu0 %v785_v20 }
  0x1d   :  { %746 = vmatpush3.bf16.msra.mxu1 %v786_v21 }
  0x1e   :  { %747 = vmatprep.subr.bf16.mxu1 %v791_v25 }
  0x1f   :  { %668 = vmatpush3.bf16.msra.mxu0 %v787_v23 }
  0x21   :  { %748 = vmatpush3.bf16.msra.mxu1 %v791_v25 }
  0x22   :  { %407 = vmatmul.mubr.bf16.vlgmr.msra.gmra.mrb[0].mxu0 %v788_v26 }
  0x23   :  { %414 = vmatprep.mubr.bf16.mxu0 %v794_v27 }
  0x24   :  { %750 = vmatmul.mubr.bf16.vlgmr.msra.gmra.mrb[0].mxu1 %v793_v28 }
  0x25   :  { %753 = vmatprep.mubr.bf16.mxu1 %v800_v29 }
  0x2a   :  { %415 = vmatmul.mubr.bf16.gmra.mrb[4].mxu0 %v796_v30 }
  0x2b   :  { %422 = vmatprep.mubr.bf16.mxu0 %v797_v31 }
  0x2c   :  { %754 = vmatmul.mubr.bf16.gmra.mrb[4].mxu1 %v801_v32 }
  0x2d   :  { %757 = vmatprep.mubr.bf16.mxu1 %v808_v33 }
  0x32   :  { %423 = vmatmul.mubr.bf16.gmra.mrb[8].mxu0 %v799_v34 }
  0x33   :  { %430 = vmatprep.mubr.bf16.mxu0 %v802_v35 }
  0x34   :  { %758 = vmatmul.mubr.bf16.gmra.mrb[8].mxu1 %v809_v36 }
  0x35   :  { %761 = vmatprep.mubr.bf16.mxu1 %v816_v37 }
  0x3a   :  { %431 = vmatmul.mubr.bf16.gmra.mrb[12].mxu0 %v804_v38 }
  0x3b   :  { %438 = vmatprep.mubr.bf16.mxu0 %v805_v39 }
  0x3c   :  { %762 = vmatmul.mubr.bf16.gmra.mrb[12].mxu1 %v817_v40 }
  0x42   :  { %439 = vmatmul.mubr.bf16.gmra.mrb[16].mxu0 %v807_v41 }
  0x43   :  { %446 = vmatprep.mubr.bf16.mxu0 %v810_v42 }
  0x4a   :  { %447 = vmatmul.mubr.bf16.gmra.mrb[20].mxu0 %v812_v43 }
  0x4b   :  { %454 = vmatprep.mubr.bf16.mxu0 %v813_v44 }
  0x52   :  { %455 = vmatmul.mubr.bf16.gmra.mrb[24].mxu0 %v815_v45 }
  0x53   :  { %462 = vmatprep.mubr.bf16.mxu0 %v818_v46 }
  0x5a   :  { %463 = vmatmul.mubr.bf16.gmra.mrb[28].mxu0 %v820_v47 }
  0xf5   :  { %v669_v48 = vpop.f32.mrb[0].mxu0 }
  0xf6   :  { %v670_v49 = vpop.f32.mrb[1].mxu0 }
  0xf7   :  { %v671_v51 = vadd.f32 %v670_v49, %v669_v48  ;;  %v672_v52 = vpop.f32.mrb[2].mxu0  ;;  %v751_v54 = vpop.f32.mrb[0].mxu1 }
  0xf8   :  { %v673_v53 = vpop.f32.mrb[3].mxu0  ;;  %v505_v57 = vpop.f32.mrb[1].mxu1 }
  0xf9   :  { %v674_v55 = vadd.f32 %v673_v53, %v672_v52  ;;  %v409_v56 = vadd.f32 %v671_v51, %v988_v50  ;;  %v752_v58 = vpop.f32.mrb[2].mxu1 }
  0xfa   :  { %v508_v61 = vpop.f32.mrb[3].mxu1 }
  0xfb   :  { %v506_v59 = vadd.f32 %v505_v57, %v409_v56  ;;  %v412_v60 = vadd.f32 %v674_v55, %v988_v50 }
  0xfd   :  { %v568_v62 = vmax.f32 %v506_v59, 0.0  ;;  %v509_v63 = vadd.f32 %v508_v61, %v412_v60  ;;  %v675_v0 = vpop.f32.mrb[4].mxu0 }
  0xfe   :  { %v676_v1 = vpop.f32.mrb[5].mxu0 }
  0xff   :  { %584 = vst [vmem:[%s1060_s3] sm:$0xff] %v568_v62  ;;  %v569_v2 = vmax.f32 %v509_v63, 0.0  ;;  %v677_v3 = vadd.f32 %v676_v1, %v675_v0  ;;  %v678_v4 = vpop.f32.mrb[6].mxu0  ;;  %v755_v6 = vpop.f32.mrb[4].mxu1 }
 0x100   :  { %v679_v5 = vpop.f32.mrb[7].mxu0  ;;  %v521_v9 = vpop.f32.mrb[5].mxu1 }
 0x101   :  { %585 = vst [vmem:[%s1060_s3 + $0x8] sm:$0xff] %v569_v2  ;;  %v417_v7 = vadd.f32 %v677_v3, %v988_v50  ;;  %v680_v8 = vadd.f32 %v679_v5, %v678_v4  ;;  %v756_v10 = vpop.f32.mrb[6].mxu1 }
 0x102   :  { %v524_v13 = vpop.f32.mrb[7].mxu1 }
 0x103   :  { %v514_v11 = vadd.f32 %v751_v54, %v417_v7  ;;  %v420_v12 = vadd.f32 %v680_v8, %v988_v50 }
 0x105   :  { %v570_v14 = vmax.f32 %v514_v11, 0.0  ;;  %v517_v15 = vadd.f32 %v752_v58, %v420_v12  ;;  %v681_v16 = vpop.f32.mrb[8].mxu0 }
 0x106   :  { %v682_v17 = vpop.f32.mrb[9].mxu0 }
 0x107   :  { %586 = vst [vmem:[%s1060_s3 + $0x10] sm:$0xff] %v570_v14  ;;  %v571_v18 = vmax.f32 %v517_v15, 0.0  ;;  %v683_v19 = vadd.f32 %v682_v17, %v681_v16  ;;  %v684_v20 = vpop.f32.mrb[10].mxu0  ;;  %v759_v22 = vpop.f32.mrb[8].mxu1 }
 0x108   :  { %v685_v21 = vpop.f32.mrb[11].mxu0  ;;  %v537_v25 = vpop.f32.mrb[9].mxu1 }
 0x109   :  { %587 = vst [vmem:[%s1060_s3 + $0x18] sm:$0xff] %v571_v18  ;;  %v686_v23 = vadd.f32 %v685_v21, %v684_v20  ;;  %v425_v24 = vadd.f32 %v683_v19, %v988_v50  ;;  %v760_v26 = vpop.f32.mrb[10].mxu1 }
 0x10a   :  { %v540_v29 = vpop.f32.mrb[11].mxu1 }
 0x10b   :  { %v522_v27 = vadd.f32 %v521_v9, %v425_v24  ;;  %v428_v28 = vadd.f32 %v686_v23, %v988_v50 }
 0x10d   :  { %v572_v30 = vmax.f32 %v522_v27, 0.0  ;;  %v525_v31 = vadd.f32 %v524_v13, %v428_v28  ;;  %v687_v32 = vpop.f32.mrb[12].mxu0 }
 0x10e   :  { %v688_v33 = vpop.f32.mrb[13].mxu0 }
 0x10f   :  { %588 = vst [vmem:[%s1060_s3 + $0x20] sm:$0xff] %v572_v30  ;;  %v573_v34 = vmax.f32 %v525_v31, 0.0  ;;  %v689_v35 = vadd.f32 %v688_v33, %v687_v32  ;;  %v690_v36 = vpop.f32.mrb[14].mxu0  ;;  %v1011_v38 = vpop.f32.mrb[12].mxu1 }
 0x110   :  { %v691_v37 = vpop.f32.mrb[15].mxu0  ;;  %v553_v41 = vpop.f32.mrb[13].mxu1 }
 0x111   :  { %589 = vst [vmem:[%s1060_s3 + $0x28] sm:$0xff] %v573_v34  ;;  %v433_v39 = vadd.f32 %v689_v35, %v988_v50  ;;  %v692_v40 = vadd.f32 %v691_v37, %v690_v36  ;;  %v764_v42 = vpop.f32.mrb[14].mxu1 }
 0x112   :  { %v556_v45 = vpop.f32.mrb[15].mxu1 }
 0x113   :  { %v530_v43 = vadd.f32 %v755_v6, %v433_v39  ;;  %v436_v44 = vadd.f32 %v692_v40, %v988_v50 }
 0x115   :  { %v574_v46 = vmax.f32 %v530_v43, 0.0  ;;  %v533_v47 = vadd.f32 %v756_v10, %v436_v44  ;;  %v693_v48 = vpop.f32.mrb[16].mxu0 }
 0x116   :  { %v694_v49 = vpop.f32.mrb[17].mxu0 }
 0x117   :  { %590 = vst [vmem:[%s1060_s3 + $0x30] sm:$0xff] %v574_v46  ;;  %v575_v51 = vmax.f32 %v533_v47, 0.0  ;;  %v695_v52 = vadd.f32 %v694_v49, %v693_v48  ;;  %v696_v53 = vpop.f32.mrb[18].mxu0 }
 0x118   :  { %v697_v54 = vpop.f32.mrb[19].mxu0 }
 0x119   :  { %591 = vst [vmem:[%s1060_s3 + $0x38] sm:$0xff] %v575_v51  ;;  %v698_v55 = vadd.f32 %v697_v54, %v696_v53  ;;  %v441_v56 = vadd.f32 %v695_v52, %v988_v50 }
 0x11b   :  { %v538_v57 = vadd.f32 %v537_v25, %v441_v56  ;;  %v444_v58 = vadd.f32 %v698_v55, %v988_v50 }
 0x11d   :  { %v576_v59 = vmax.f32 %v538_v57, 0.0  ;;  %v541_v60 = vadd.f32 %v540_v29, %v444_v58  ;;  %v699_v61 = vpop.f32.mrb[20].mxu0 }
 0x11e   :  { %v700_v62 = vpop.f32.mrb[21].mxu0 }
 0x11f   :  { %592 = vst [vmem:[%s1060_s3 + $0x40] sm:$0xff] %v576_v59  ;;  %v577_v63 = vmax.f32 %v541_v60, 0.0  ;;  %v701_v0 = vadd.f32 %v700_v62, %v699_v61  ;;  %v702_v1 = vpop.f32.mrb[22].mxu0 }
 0x120   :  { %v703_v2 = vpop.f32.mrb[23].mxu0 }
 0x121   :  { %593 = vst [vmem:[%s1060_s3 + $0x48] sm:$0xff] %v577_v63  ;;  %v449_v3 = vadd.f32 %v701_v0, %v988_v50  ;;  %v704_v4 = vadd.f32 %v703_v2, %v702_v1 }
 0x123   :  { %v546_v5 = vadd.f32 %v759_v22, %v449_v3  ;;  %v452_v6 = vadd.f32 %v704_v4, %v988_v50 }
 0x125   :  { %v578_v7 = vmax.f32 %v546_v5, 0.0  ;;  %v549_v8 = vadd.f32 %v760_v26, %v452_v6  ;;  %v705_v9 = vpop.f32.mrb[24].mxu0 }
 0x126   :  { %v706_v10 = vpop.f32.mrb[25].mxu0 }
 0x127   :  { %594 = vst [vmem:[%s1060_s3 + $0x50] sm:$0xff] %v578_v7  ;;  %v579_v11 = vmax.f32 %v549_v8, 0.0  ;;  %v707_v12 = vadd.f32 %v706_v10, %v705_v9  ;;  %v708_v13 = vpop.f32.mrb[26].mxu0 }
 0x128   :  { %v709_v14 = vpop.f32.mrb[27].mxu0 }
 0x129   :  { %595 = vst [vmem:[%s1060_s3 + $0x58] sm:$0xff] %v579_v11  ;;  %v710_v15 = vadd.f32 %v709_v14, %v708_v13  ;;  %v457_v16 = vadd.f32 %v707_v12, %v988_v50 }
 0x12b   :  { %v554_v17 = vadd.f32 %v553_v41, %v457_v16  ;;  %v460_v18 = vadd.f32 %v710_v15, %v988_v50 }
 0x12d   :  { %v580_v19 = vmax.f32 %v554_v17, 0.0  ;;  %v557_v20 = vadd.f32 %v556_v45, %v460_v18  ;;  %v711_v21 = vpop.f32.mrb[28].mxu0 }
 0x12e   :  { %v712_v22 = vpop.f32.mrb[29].mxu0 }
 0x12f   :  { %596 = vst [vmem:[%s1060_s3 + $0x60] sm:$0xff] %v580_v19  ;;  %v581_v23 = vmax.f32 %v557_v20, 0.0  ;;  %v713_v24 = vadd.f32 %v712_v22, %v711_v21  ;;  %v714_v25 = vpop.f32.mrb[30].mxu0 }
 0x130   :  { %v715_v26 = vpop.f32.mrb[31].mxu0 }
 0x131   :  { %597 = vst [vmem:[%s1060_s3 + $0x68] sm:$0xff] %v581_v23  ;;  %v465_v27 = vadd.f32 %v713_v24, %v988_v50  ;;  %v716_v28 = vadd.f32 %v715_v26, %v714_v25 }
 0x133   :  { %v562_v29 = vadd.f32 %v1011_v38, %v465_v27  ;;  %v468_v30 = vadd.f32 %v716_v28, %v988_v50 }
 0x135   :  { %v582_v31 = vmax.f32 %v562_v29, 0.0  ;;  %v565_v32 = vadd.f32 %v764_v42, %v468_v30 }
 0x137   :  { %598 = vst [vmem:[%s1060_s3 + $0x70] sm:$0xff] %v582_v31  ;;  %v583_v33 = vmax.f32 %v565_v32, 0.0 }
 0x139   :  { %599 = vst [vmem:[%s1060_s3 + $0x78] sm:$0xff] %v583_v33 }

// kernel: video_codec_forward.29
= control target key start
LH: loop header
LB: loop body
LE: loop exit
PB: predicated region body
PF: predicated region fallthrough
CT: control target
= control target key end

     0   :  { %v1926_v0 = vmov 0   ;;  %s2714_s1 = inlined_call_operand.vmem [shape: bf16[384,128], index: 1, kind: input, shape index: {}]   ;;  %s2715_s0 = inlined_call_operand.vmem [shape: bf16[512,384], index: 0, kind: input, shape index: {}]   ;;  %s2716_s2 = inlined_call_operand.vmem [shape: f32[1,128], index: 2, kind: input, shape index: {}]   ;;  %s2717_s3 = inlined_call_operand.vmem [shape: f32[512,128], index: 3, kind: output, shape index: {}]  }
   0x1   :  { %854 = vmatprep.subr.bf16.mxu0 %v1926_v0  ;;  %1741 = vmatprep.subr.bf16.mxu1 %v1926_v0  ;;  %v1774_v1 = vld [vmem:[%s2714_s1] sm:$0xff]   ;;  %v1775_v2 = vld [vmem:[%s2714_s1 + $0x8] sm:$0xff]   ;;  %v1776_v3 = vld [vmem:[%s2714_s1 + $0x10] sm:$0xff]  }
   0x2   :  { %855 = vmatpush1.bf16.msra.mxu0 %v1774_v1  ;;  %1757 = vmatpush1.bf16.msra.mxu1 %v1774_v1  ;;  %v1777_v4 = vld [vmem:[%s2714_s1 + $0x18] sm:$0xff]   ;;  %v1778_v5 = vld [vmem:[%s2714_s1 + $0x20] sm:$0xff]   ;;  %v1779_v7 = vld [vmem:[%s2714_s1 + $0x28] sm:$0xff]  }
   0x3   :  { %856 = vmatprep.subr.bf16.mxu0 %v1926_v0  ;;  %1742 = vmatprep.subr.bf16.mxu1 %v1926_v0  ;;  %v1792_v6 = vld [vmem:[%s2715_s0 + $0x4] ss:$12 sps:$4 sm:$0xff]   ;;  %v1781_v10 = vld [vmem:[%s2714_s1 + $0x38] sm:$0xff]   ;;  %v1783_v12 = vld [vmem:[%s2714_s1 + $0x48] sm:$0xff]  }
   0x4   :  { %v1795_v8 = vld [vmem:[%s2715_s0 + $0x244] ss:$12 sps:$4 sm:$0xff]   ;;  %886 = vmatprep.mubr.bf16.mxu0 %v1792_v6  ;;  %v1785_v14 = vld [vmem:[%s2714_s1 + $0x58] sm:$0xff]   ;;  %v1787_v16 = vld [vmem:[%s2714_s1 + $0x68] sm:$0xff]  }
   0x5   :  { %1078 = vmatprep.mubr.bf16.mxu1 %v1795_v8  ;;  %v1780_v9 = vld [vmem:[%s2714_s1 + $0x30] sm:$0xff]   ;;  %v1782_v11 = vld [vmem:[%s2714_s1 + $0x40] sm:$0xff]   ;;  %v1789_v18 = vld [vmem:[%s2714_s1 + $0x78] sm:$0xff]  }
   0x6   :  { %857 = vmatpush1.bf16.msra.mxu0 %v1775_v2  ;;  %1758 = vmatpush1.bf16.msra.mxu1 %v1775_v2  ;;  %v1784_v13 = vld [vmem:[%s2714_s1 + $0x50] sm:$0xff]   ;;  %v1786_v15 = vld [vmem:[%s2714_s1 + $0x60] sm:$0xff]   ;;  %v1797_v22 = vld [vmem:[%s2715_s0 + $0x1c] ss:$12 sps:$4 sm:$0xff]  }
   0x7   :  { %858 = vmatprep.subr.bf16.mxu0 %v1926_v0  ;;  %1743 = vmatprep.subr.bf16.mxu1 %v1926_v0  ;;  %v1788_v17 = vld [vmem:[%s2714_s1 + $0x70] sm:$0xff]   ;;  %v1796_v19 = vld [vmem:[%s2714_s1 + $0x80] sm:$0xff]   ;;  %v1799_v23 = vld [vmem:[%s2715_s0 + $0x25c] ss:$12 sps:$4 sm:$0xff]  }
   0x8   :  { %v1790_v20 = vld [vmem:[%s2715_s0] ss:$12 sps:$4 sm:$0xff]   ;;  %v1810_v25 = vld [vmem:[%s2714_s1 + $0x90] sm:$0xff]   ;;  %v1801_v26 = vld [vmem:[%s2715_s0 + $0x18] ss:$12 sps:$4 sm:$0xff]  }
   0x9   :  { %v1793_v21 = vld [vmem:[%s2715_s0 + $0x240] ss:$12 sps:$4 sm:$0xff]   ;;  %v1802_v27 = vld [vmem:[%s2715_s0 + $0x258] ss:$12 sps:$4 sm:$0xff]   ;;  %v1808_v31 = vld [vmem:[%s2715_s0 + $0x30] ss:$12 sps:$4 sm:$0xff]  }
   0xa   :  { %859 = vmatpush1.bf16.msra.mxu0 %v1776_v3  ;;  %1759 = vmatpush1.bf16.msra.mxu1 %v1776_v3  ;;  %v1803_v24 = vld [vmem:[%s2714_s1 + $0x88] sm:$0xff]   ;;  %v1804_v28 = vld [vmem:[%s2715_s0 + $0x34] ss:$12 sps:$4 sm:$0xff]   ;;  %v1817_v30 = vld [vmem:[%s2714_s1 + $0x98] sm:$0xff]  }
   0xb   :  { %860 = vmatprep.subr.bf16.mxu0 %v1926_v0  ;;  %1744 = vmatprep.subr.bf16.mxu1 %v1926_v0  ;;  %v1806_v29 = vld [vmem:[%s2715_s0 + $0x274] ss:$12 sps:$4 sm:$0xff]   ;;  %v1809_v33 = vld [vmem:[%s2715_s0 + $0x270] ss:$12 sps:$4 sm:$0xff]   ;;  %v1811_v34 = vld [vmem:[%s2715_s0 + $0x4c] ss:$12 sps:$4 sm:$0xff]  }
   0xc   :  { %v1824_v32 = vld [vmem:[%s2714_s1 + $0xa0] sm:$0xff]   ;;  %v1813_v35 = vld [vmem:[%s2715_s0 + $0x28c] ss:$12 sps:$4 sm:$0xff]   ;;  %v1815_v37 = vld [vmem:[%s2715_s0 + $0x48] ss:$12 sps:$4 sm:$0xff]  }
   0xd   :  { %v1831_v36 = vld [vmem:[%s2714_s1 + $0xa8] sm:$0xff]   ;;  %v1818_v39 = vld [vmem:[%s2715_s0 + $0x64] ss:$12 sps:$4 sm:$0xff]   ;;  %v1845_v42 = vld [vmem:[%s2714_s1 + $0xb8] sm:$0xff]  }
   0xe   :  { %861 = vmatpush1.bf16.msra.mxu0 %v1777_v4  ;;  %1760 = vmatpush1.bf16.msra.mxu1 %v1777_v4  ;;  %v1816_v38 = vld [vmem:[%s2715_s0 + $0x288] ss:$12 sps:$4 sm:$0xff]   ;;  %v1820_v40 = vld [vmem:[%s2715_s0 + $0x2a4] ss:$12 sps:$4 sm:$0xff]   ;;  %v1822_v43 = vld [vmem:[%s2715_s0 + $0x60] ss:$12 sps:$4 sm:$0xff]  }
   0xf   :  { %862 = vmatprep.subr.bf16.mxu0 %v1926_v0  ;;  %1745 = vmatprep.subr.bf16.mxu1 %v1926_v0  ;;  %v1838_v41 = vld [vmem:[%s2714_s1 + $0xb0] sm:$0xff]   ;;  %v1823_v44 = vld [vmem:[%s2715_s0 + $0x2a0] ss:$12 sps:$4 sm:$0xff]   ;;  %v1825_v45 = vld [vmem:[%s2715_s0 + $0x7c] ss:$12 sps:$4 sm:$0xff]  }
  0x10   :  { %v1827_v46 = vld [vmem:[%s2715_s0 + $0x2bc] ss:$12 sps:$4 sm:$0xff]   ;;  %v1829_v47 = vld [vmem:[%s2715_s0 + $0x78] ss:$12 sps:$4 sm:$0xff]   ;;  %v1832_v49 = vld [vmem:[%s2715_s0 + $0x94] ss:$12 sps:$4 sm:$0xff]  }
  0x11   :  { %v1830_v48 = vld [vmem:[%s2715_s0 + $0x2b8] ss:$12 sps:$4 sm:$0xff]   ;;  %v1834_v50 = vld [vmem:[%s2715_s0 + $0x2d4] ss:$12 sps:$4 sm:$0xff]   ;;  %v1836_v51 = vld [vmem:[%s2715_s0 + $0x90] ss:$12 sps:$4 sm:$0xff]  }
  0x12   :  { %863 = vmatpush1.bf16.msra.mxu0 %v1778_v5  ;;  %1761 = vmatpush1.bf16.msra.mxu1 %v1778_v5  ;;  %v1837_v52 = vld [vmem:[%s2715_s0 + $0x2d0] ss:$12 sps:$4 sm:$0xff]   ;;  %v1839_v53 = vld [vmem:[%s2715_s0 + $0xac] ss:$12 sps:$4 sm:$0xff]   ;;  %v1843_v55 = vld [vmem:[%s2715_s0 + $0xa8] ss:$12 sps:$4 sm:$0xff]  }
  0x13   :  { %864 = vmatprep.subr.bf16.mxu0 %v1926_v0  ;;  %1746 = vmatprep.subr.bf16.mxu1 %v1926_v0  ;;  %v1841_v54 = vld [vmem:[%s2715_s0 + $0x2ec] ss:$12 sps:$4 sm:$0xff]   ;;  %v1844_v56 = vld [vmem:[%s2715_s0 + $0x2e8] ss:$12 sps:$4 sm:$0xff]   ;;  %v1846_v57 = vld [vmem:[%s2715_s0 + $0xc4] ss:$12 sps:$4 sm:$0xff]  }
  0x14   :  { %v1848_v58 = vld [vmem:[%s2715_s0 + $0x8] ss:$12 sps:$4 sm:$0xff]   ;;  %v1849_v59 = vld [vmem:[%s2715_s0 + $0xc0] ss:$12 sps:$4 sm:$0xff]   ;;  %v1853_v62 = vld [vmem:[%s2715_s0 + $0x38] ss:$12 sps:$4 sm:$0xff]  }
  0x15   :  { %v1850_v60 = vld [vmem:[%s2715_s0 + $0x20] ss:$12 sps:$4 sm:$0xff]   ;;  %v1851_v61 = vld [vmem:[%s2715_s0 + $0xdc] ss:$12 sps:$4 sm:$0xff]   ;;  %v1854_v63 = vld [vmem:[%s2715_s0 + $0xd8] ss:$12 sps:$4 sm:$0xff]  }
  0x16   :  { %865 = vmatpush1.bf16.msra.mxu0 %v1779_v7  ;;  %1762 = vmatpush1.bf16.msra.mxu1 %v1779_v7  ;;  %v1856_v1 = vld [vmem:[%s2715_s0 + $0xf4] ss:$12 sps:$4 sm:$0xff]   ;;  %v1859_v3 = vld [vmem:[%s2715_s0 + $0xf0] ss:$12 sps:$4 sm:$0xff]   ;;  %v1861_v5 = vld [vmem:[%s2715_s0 + $0x10c] ss:$12 sps:$4 sm:$0xff]  }
  0x17   :  { %866 = vmatprep.subr.bf16.mxu0 %v1926_v0  ;;  %1747 = vmatprep.subr.bf16.mxu1 %v1926_v0  ;;  %v1858_v2 = vld [vmem:[%s2715_s0 + $0x68] ss:$12 sps:$4 sm:$0xff]   ;;  %v1860_v4 = vld [vmem:[%s2715_s0 + $0x80] ss:$12 sps:$4 sm:$0xff]   ;;  %v1863_v6 = vld [vmem:[%s2715_s0 + $0x98] ss:$12 sps:$4 sm:$0xff]  }
  0x18   :  { %v1864_v7 = vld [vmem:[%s2715_s0 + $0x108] ss:$12 sps:$4 sm:$0xff]   ;;  %v1865_v8 = vld [vmem:[%s2715_s0 + $0xb0] ss:$12 sps:$4 sm:$0xff]  }
  0x1a   :  { %867 = vmatpush1.bf16.msra.mxu0 %v1780_v9  ;;  %1763 = vmatpush1.bf16.msra.mxu1 %v1780_v9  ;;  %v1866_v9 = vld [vmem:[%s2715_s0 + $0x124] ss:$12 sps:$4 sm:$0xff]  }
  0x1b   :  { %868 = vmatprep.subr.bf16.mxu0 %v1926_v0  ;;  %1748 = vmatprep.subr.bf16.mxu1 %v1926_v0 }
  0x1e   :  { %869 = vmatpush1.bf16.msra.mxu0 %v1781_v10  ;;  %1764 = vmatpush1.bf16.msra.mxu1 %v1781_v10  ;;  %v1868_v10 = vld [vmem:[%s2715_s0 + $0xc8] ss:$12 sps:$4 sm:$0xff]  }
  0x1f   :  { %870 = vmatprep.subr.bf16.mxu0 %v1926_v0  ;;  %1749 = vmatprep.subr.bf16.mxu1 %v1926_v0 }
  0x22   :  { %871 = vmatpush1.bf16.msra.mxu0 %v1782_v11  ;;  %1765 = vmatpush1.bf16.msra.mxu1 %v1782_v11  ;;  %v1869_v11 = vld [vmem:[%s2715_s0 + $0x120] ss:$12 sps:$4 sm:$0xff]  }
  0x23   :  { %872 = vmatprep.subr.bf16.mxu0 %v1926_v0  ;;  %1750 = vmatprep.subr.bf16.mxu1 %v1926_v0 }
  0x26   :  { %873 = vmatpush1.bf16.msra.mxu0 %v1783_v12  ;;  %1766 = vmatpush1.bf16.msra.mxu1 %v1783_v12  ;;  %v1870_v12 = vld [vmem:[%s2715_s0 + $0xe0] ss:$12 sps:$4 sm:$0xff]  }
  0x27   :  { %874 = vmatprep.subr.bf16.mxu0 %v1926_v0  ;;  %1751 = vmatprep.subr.bf16.mxu1 %v1926_v0 }
  0x2a   :  { %875 = vmatpush1.bf16.msra.mxu0 %v1784_v13  ;;  %1767 = vmatpush1.bf16.msra.mxu1 %v1784_v13  ;;  %v1871_v13 = vld [vmem:[%s2715_s0 + $0x13c] ss:$12 sps:$4 sm:$0xff]  }
  0x2b   :  { %876 = vmatprep.subr.bf16.mxu0 %v1926_v0  ;;  %1752 = vmatprep.subr.bf16.mxu1 %v1926_v0 }
  0x2e   :  { %877 = vmatpush1.bf16.msra.mxu0 %v1785_v14  ;;  %1768 = vmatpush1.bf16.msra.mxu1 %v1785_v14  ;;  %v1873_v14 = vld [vmem:[%s2715_s0 + $0xf8] ss:$12 sps:$4 sm:$0xff]  }
  0x2f   :  { %878 = vmatprep.subr.bf16.mxu0 %v1926_v0  ;;  %1753 = vmatprep.subr.bf16.mxu1 %v1926_v0 }
  0x32   :  { %879 = vmatpush1.bf16.msra.mxu0 %v1786_v15  ;;  %1769 = vmatpush1.bf16.msra.mxu1 %v1786_v15  ;;  %v1874_v15 = vld [vmem:[%s2715_s0 + $0x138] ss:$12 sps:$4 sm:$0xff]  }
  0x33   :  { %880 = vmatprep.subr.bf16.mxu0 %v1926_v0  ;;  %1754 = vmatprep.subr.bf16.mxu1 %v1926_v0 }
  0x36   :  { %881 = vmatpush1.bf16.msra.mxu0 %v1787_v16  ;;  %1770 = vmatpush1.bf16.msra.mxu1 %v1787_v16  ;;  %v1875_v16 = vld [vmem:[%s2715_s0 + $0x110] ss:$12 sps:$4 sm:$0xff]  }
  0x37   :  { %882 = vmatprep.subr.bf16.mxu0 %v1926_v0  ;;  %1755 = vmatprep.subr.bf16.mxu1 %v1926_v0 }
  0x3a   :  { %883 = vmatpush1.bf16.msra.mxu0 %v1788_v17  ;;  %1771 = vmatpush1.bf16.msra.mxu1 %v1788_v17  ;;  %v1876_v17 = vld [vmem:[%s2715_s0 + $0x154] ss:$12 sps:$4 sm:$0xff]  }
  0x3b   :  { %884 = vmatprep.subr.bf16.mxu0 %v1926_v0  ;;  %1756 = vmatprep.subr.bf16.mxu1 %v1926_v0  ;;  %v1855_v0 = vld [vmem:[%s2715_s0 + $0x50] ss:$12 sps:$4 sm:$0xff]  }
  0x3e   :  { %885 = vmatpush1.bf16.msra.mxu0 %v1789_v18  ;;  %1772 = vmatpush1.bf16.msra.mxu1 %v1789_v18  ;;  %v1878_v18 = vld [vmem:[%s2715_s0 + $0x128] ss:$12 sps:$4 sm:$0xff]  }
  0x3f   :  { %1661 = vmatprep.subr.bf16.mxu1 %v1796_v19 }
  0x41   :  { %887 = vmatmul.mubr.bf16.vlgmr.msra.gmra.mrb[0].mxu0 %v1790_v20  ;;  %1079 = vmatmul.mubr.bf16.vlgmr.msra.gmra.mrb[0].mxu1 %v1793_v21  ;;  %v1880_v20 = vld [vmem:[%s2715_s0 + $0x140] ss:$12 sps:$4 sm:$0xff]  }
  0x42   :  { %1662 = vmatpush3.bf16.msra.mxu1 %v1796_v19  ;;  %894 = vmatprep.mubr.bf16.mxu0 %v1797_v22  ;;  %v1879_v19 = vld [vmem:[%s2715_s0 + $0x150] ss:$12 sps:$4 sm:$0xff]   ;;  %v1881_v21 = vld [vmem:[%s2715_s0 + $0x16c] ss:$12 sps:$4 sm:$0xff]  }
  0x43   :  { %1086 = vmatprep.mubr.bf16.mxu1 %v1799_v23  ;;  %1663 = vmatprep.subr.bf16.mxu1 %v1803_v24  ;;  %v1883_v22 = vld [vmem:[%s2715_s0 + $0x158] ss:$12 sps:$4 sm:$0xff]   ;;  %v1884_v23 = vld [vmem:[%s2715_s0 + $0x168] ss:$12 sps:$4 sm:$0xff]  }
  0x46   :  { %1664 = vmatpush3.bf16.msra.mxu1 %v1803_v24  ;;  %v1885_v24 = vld [vmem:[%s2715_s0 + $0x170] ss:$12 sps:$4 sm:$0xff]  }
  0x47   :  { %1665 = vmatprep.subr.bf16.mxu1 %v1810_v25 }
  0x49   :  { %895 = vmatmul.mubr.bf16.gmra.mrb[4].mxu0 %v1801_v26  ;;  %1087 = vmatmul.mubr.bf16.gmra.mrb[4].mxu1 %v1802_v27  ;;  %v1888_v26 = vld [vmem:[%s2715_s0 + $0x188] ss:$12 sps:$4 sm:$0xff]   ;;  %v1889_v27 = vld [vmem:[%s2715_s0 + $0x180] ss:$12 sps:$4 sm:$0xff]  }
  0x4a   :  { %902 = vmatprep.mubr.bf16.mxu0 %v1804_v28  ;;  %1094 = vmatprep.mubr.bf16.mxu1 %v1806_v29  ;;  %v1890_v28 = vld [vmem:[%s2715_s0 + $0x1a0] ss:$12 sps:$4 sm:$0xff]   ;;  %v1891_v29 = vld [vmem:[%s2715_s0 + $0x19c] ss:$12 sps:$4 sm:$0xff]  }
  0x4b   :  { %1666 = vmatpush3.bf16.msra.mxu1 %v1810_v25  ;;  %v1886_v25 = vld [vmem:[%s2715_s0 + $0x184] ss:$12 sps:$4 sm:$0xff]  }
  0x4c   :  { %1667 = vmatprep.subr.bf16.mxu1 %v1817_v30 }
  0x4f   :  { %1668 = vmatpush3.bf16.msra.mxu1 %v1817_v30  ;;  %v1893_v30 = vld [vmem:[%s2715_s0 + $0x1b8] ss:$12 sps:$4 sm:$0xff]  }
  0x50   :  { %1669 = vmatprep.subr.bf16.mxu1 %v1824_v32 }
  0x51   :  { %903 = vmatmul.mubr.bf16.gmra.mrb[8].mxu0 %v1808_v31  ;;  %1095 = vmatmul.mubr.bf16.gmra.mrb[8].mxu1 %v1809_v33  ;;  %v1894_v31 = vld [vmem:[%s2715_s0 + $0x198] ss:$12 sps:$4 sm:$0xff]   ;;  %v1896_v33 = vld [vmem:[%s2715_s0 + $0x1b4] ss:$12 sps:$4 sm:$0xff]  }
  0x52   :  { %910 = vmatprep.mubr.bf16.mxu0 %v1811_v34  ;;  %1102 = vmatprep.mubr.bf16.mxu1 %v1813_v35  ;;  %v1898_v34 = vld [vmem:[%s2715_s0 + $0x1e8] ss:$12 sps:$4 sm:$0xff]   ;;  %v1899_v35 = vld [vmem:[%s2715_s0 + $0x1b0] ss:$12 sps:$4 sm:$0xff]  }
  0x53   :  { %1670 = vmatpush3.bf16.msra.mxu1 %v1824_v32  ;;  %v1895_v32 = vld [vmem:[%s2715_s0 + $0x1d0] ss:$12 sps:$4 sm:$0xff]  }
  0x54   :  { %1671 = vmatprep.subr.bf16.mxu1 %v1831_v36 }
  0x57   :  { %1672 = vmatpush3.bf16.msra.mxu1 %v1831_v36  ;;  %v1900_v36 = vld [vmem:[%s2715_s0 + $0x200] ss:$12 sps:$4 sm:$0xff]  }
  0x58   :  { %1673 = vmatprep.subr.bf16.mxu1 %v1838_v41 }
  0x59   :  { %911 = vmatmul.mubr.bf16.gmra.mrb[12].mxu0 %v1815_v37  ;;  %1103 = vmatmul.mubr.bf16.gmra.mrb[12].mxu1 %v1816_v38  ;;  %v1901_v37 = vld [vmem:[%s2715_s0 + $0x1cc] ss:$12 sps:$4 sm:$0xff]  }
  0x5a   :  { %918 = vmatprep.mubr.bf16.mxu0 %v1818_v39  ;;  %1110 = vmatprep.mubr.bf16.mxu1 %v1820_v40  ;;  %v1903_v38 = vld [vmem:[%s2715_s0 + $0x218] ss:$12 sps:$4 sm:$0xff]   ;;  %v1904_v39 = vld [vmem:[%s2715_s0 + $0x1c8] ss:$12 sps:$4 sm:$0xff]   ;;  %v1905_v40 = vld [vmem:[%s2715_s0 + $0x230] ss:$12 sps:$4 sm:$0xff]  }
  0x5b   :  { %1674 = vmatpush3.bf16.msra.mxu1 %v1838_v41  ;;  %v1906_v41 = vld [vmem:[%s2715_s0 + $0x1e4] ss:$12 sps:$4 sm:$0xff]  }
  0x5c   :  { %1675 = vmatprep.subr.bf16.mxu1 %v1845_v42 }
  0x5f   :  { %1676 = vmatpush3.bf16.msra.mxu1 %v1845_v42  ;;  %v1908_v42 = vld [vmem:[%s2715_s0 + $0x248] ss:$12 sps:$4 sm:$0xff]  }
  0x61   :  { %919 = vmatmul.mubr.bf16.gmra.mrb[16].mxu0 %v1822_v43  ;;  %1111 = vmatmul.mubr.bf16.gmra.mrb[16].mxu1 %v1823_v44  ;;  %v1909_v43 = vld [vmem:[%s2715_s0 + $0x1e0] ss:$12 sps:$4 sm:$0xff]  }
  0x62   :  { %926 = vmatprep.mubr.bf16.mxu0 %v1825_v45  ;;  %1118 = vmatprep.mubr.bf16.mxu1 %v1827_v46  ;;  %v1910_v44 = vld [vmem:[%s2715_s0 + $0x260] ss:$12 sps:$4 sm:$0xff]   ;;  %v1911_v45 = vld [vmem:[%s2715_s0 + $0x1fc] ss:$12 sps:$4 sm:$0xff]   ;;  %v1913_v46 = vld [vmem:[%s2715_s0 + $0x278] ss:$12 sps:$4 sm:$0xff]  }
  0x69   :  { %927 = vmatmul.mubr.bf16.gmra.mrb[20].mxu0 %v1829_v47  ;;  %1119 = vmatmul.mubr.bf16.gmra.mrb[20].mxu1 %v1830_v48  ;;  %v1914_v47 = vld [vmem:[%s2715_s0 + $0x1f8] ss:$12 sps:$4 sm:$0xff]   ;;  %v1915_v48 = vld [vmem:[%s2715_s0 + $0x290] ss:$12 sps:$4 sm:$0xff]  }
  0x6a   :  { %934 = vmatprep.mubr.bf16.mxu0 %v1832_v49  ;;  %1126 = vmatprep.mubr.bf16.mxu1 %v1834_v50  ;;  %v1916_v49 = vld [vmem:[%s2715_s0 + $0x214] ss:$12 sps:$4 sm:$0xff]  }
  0x6b   :  { %v1918_v50 = vld [vmem:[%s2715_s0 + $0x2a8] ss:$12 sps:$4 sm:$0xff]  }
  0x71   :  { %935 = vmatmul.mubr.bf16.gmra.mrb[24].mxu0 %v1836_v51  ;;  %1127 = vmatmul.mubr.bf16.gmra.mrb[24].mxu1 %v1837_v52  ;;  %v1919_v51 = vld [vmem:[%s2715_s0 + $0x210] ss:$12 sps:$4 sm:$0xff]   ;;  %v1920_v52 = vld [vmem:[%s2715_s0 + $0x2c0] ss:$12 sps:$4 sm:$0xff]  }
  0x72   :  { %942 = vmatprep.mubr.bf16.mxu0 %v1839_v53  ;;  %1134 = vmatprep.mubr.bf16.mxu1 %v1841_v54  ;;  %v1921_v53 = vld [vmem:[%s2715_s0 + $0x22c] ss:$12 sps:$4 sm:$0xff]  }
  0x73   :  { %v1923_v54 = vld [vmem:[%s2715_s0 + $0x2d8] ss:$12 sps:$4 sm:$0xff]  }
  0x79   :  { %943 = vmatmul.mubr.bf16.gmra.mrb[28].mxu0 %v1843_v55  ;;  %1135 = vmatmul.mubr.bf16.gmra.mrb[28].mxu1 %v1844_v56  ;;  %v1924_v55 = vld [vmem:[%s2715_s0 + $0x228] ss:$12 sps:$4 sm:$0xff]   ;;  %v1925_v56 = vld [vmem:[%s2715_s0 + $0x2f0] ss:$12 sps:$4 sm:$0xff]  }
  0x7a   :  { %950 = vmatprep.mubr.bf16.mxu0 %v1846_v57  ;;  %1677 = vmatprep.mubr.bf16.mxu1 %v1848_v58 }
  0x81   :  { %951 = vmatmul.mubr.bf16.gmra.mrb[32].mxu0 %v1849_v59  ;;  %1678 = vmatmul.mubr.bf16.vlgmr.msra.gmra.mrb[32].mxu1 %v1850_v60 }
  0x82   :  { %958 = vmatprep.mubr.bf16.mxu0 %v1851_v61  ;;  %1681 = vmatprep.mubr.bf16.mxu1 %v1853_v62 }
  0x89   :  { %959 = vmatmul.mubr.bf16.gmra.mrb[36].mxu0 %v1854_v63  ;;  %1682 = vmatmul.mubr.bf16.gmra.mrb[36].mxu1 %v1855_v0 }
  0x8a   :  { %966 = vmatprep.mubr.bf16.mxu0 %v1856_v1  ;;  %1685 = vmatprep.mubr.bf16.mxu1 %v1858_v2 }
  0x91   :  { %967 = vmatmul.mubr.bf16.gmra.mrb[40].mxu0 %v1859_v3  ;;  %1686 = vmatmul.mubr.bf16.gmra.mrb[40].mxu1 %v1860_v4 }
  0x92   :  { %974 = vmatprep.mubr.bf16.mxu0 %v1861_v5  ;;  %1689 = vmatprep.mubr.bf16.mxu1 %v1863_v6 }
  0x99   :  { %975 = vmatmul.mubr.bf16.gmra.mrb[44].mxu0 %v1864_v7  ;;  %1690 = vmatmul.mubr.bf16.gmra.mrb[44].mxu1 %v1865_v8 }
  0x9a   :  { %982 = vmatprep.mubr.bf16.mxu0 %v1866_v9  ;;  %1693 = vmatprep.mubr.bf16.mxu1 %v1868_v10 }
  0xa1   :  { %983 = vmatmul.mubr.bf16.gmra.mrb[48].mxu0 %v1869_v11  ;;  %1694 = vmatmul.mubr.bf16.gmra.mrb[48].mxu1 %v1870_v12 }
  0xa2   :  { %990 = vmatprep.mubr.bf16.mxu0 %v1871_v13  ;;  %1697 = vmatprep.mubr.bf16.mxu1 %v1873_v14 }
  0xa9   :  { %991 = vmatmul.mubr.bf16.gmra.mrb[52].mxu0 %v1874_v15  ;;  %1698 = vmatmul.mubr.bf16.gmra.mrb[52].mxu1 %v1875_v16 }
  0xaa   :  { %998 = vmatprep.mubr.bf16.mxu0 %v1876_v17  ;;  %1701 = vmatprep.mubr.bf16.mxu1 %v1878_v18 }
  0xb1   :  { %999 = vmatmul.mubr.bf16.gmra.mrb[56].mxu0 %v1879_v19  ;;  %1702 = vmatmul.mubr.bf16.gmra.mrb[56].mxu1 %v1880_v20 }
  0xb2   :  { %1006 = vmatprep.mubr.bf16.mxu0 %v1881_v21  ;;  %1705 = vmatprep.mubr.bf16.mxu1 %v1883_v22 }
  0xb9   :  { %1007 = vmatmul.mubr.bf16.gmra.mrb[60].mxu0 %v1884_v23  ;;  %1706 = vmatmul.mubr.bf16.gmra.mrb[60].mxu1 %v1885_v24 }
  0xba   :  { %1014 = vmatprep.mubr.bf16.mxu0 %v1886_v25  ;;  %1709 = vmatprep.mubr.bf16.mxu1 %v1888_v26 }
  0xc1   :  { %1015 = vmatmul.mubr.bf16.gmra.mrb[64].mxu0 %v1889_v27  ;;  %1710 = vmatmul.mubr.bf16.gmra.mrb[64].mxu1 %v1890_v28 }
  0xc2   :  { %1022 = vmatprep.mubr.bf16.mxu0 %v1891_v29  ;;  %1713 = vmatprep.mubr.bf16.mxu1 %v1893_v30 }
  0xc9   :  { %1023 = vmatmul.mubr.bf16.gmra.mrb[68].mxu0 %v1894_v31  ;;  %1714 = vmatmul.mubr.bf16.gmra.mrb[68].mxu1 %v1895_v32 }
  0xca   :  { %1030 = vmatprep.mubr.bf16.mxu0 %v1896_v33  ;;  %1717 = vmatprep.mubr.bf16.mxu1 %v1898_v34 }
  0xd1   :  { %1031 = vmatmul.mubr.bf16.gmra.mrb[72].mxu0 %v1899_v35  ;;  %1718 = vmatmul.mubr.bf16.gmra.mrb[72].mxu1 %v1900_v36 }
  0xd2   :  { %1038 = vmatprep.mubr.bf16.mxu0 %v1901_v37  ;;  %1721 = vmatprep.mubr.bf16.mxu1 %v1903_v38 }
  0xd9   :  { %1039 = vmatmul.mubr.bf16.gmra.mrb[76].mxu0 %v1904_v39  ;;  %1722 = vmatmul.mubr.bf16.gmra.mrb[76].mxu1 %v1905_v40 }
  0xda   :  { %1046 = vmatprep.mubr.bf16.mxu0 %v1906_v41  ;;  %1725 = vmatprep.mubr.bf16.mxu1 %v1908_v42 }
  0xe1   :  { %1047 = vmatmul.mubr.bf16.gmra.mrb[80].mxu0 %v1909_v43  ;;  %1726 = vmatmul.mubr.bf16.gmra.mrb[80].mxu1 %v1910_v44 }
  0xe2   :  { %1054 = vmatprep.mubr.bf16.mxu0 %v1911_v45  ;;  %1729 = vmatprep.mubr.bf16.mxu1 %v1913_v46 }
  0xe9   :  { %1055 = vmatmul.mubr.bf16.gmra.mrb[84].mxu0 %v1914_v47  ;;  %1730 = vmatmul.mubr.bf16.gmra.mrb[84].mxu1 %v1915_v48 }
  0xea   :  { %1062 = vmatprep.mubr.bf16.mxu0 %v1916_v49  ;;  %1733 = vmatprep.mubr.bf16.mxu1 %v1918_v50 }
  0xf1   :  { %1063 = vmatmul.mubr.bf16.gmra.mrb[88].mxu0 %v1919_v51  ;;  %1734 = vmatmul.mubr.bf16.gmra.mrb[88].mxu1 %v1920_v52 }
  0xf2   :  { %1070 = vmatprep.mubr.bf16.mxu0 %v1921_v53  ;;  %1737 = vmatprep.mubr.bf16.mxu1 %v1923_v54 }
  0xf9   :  { %1071 = vmatmul.mubr.bf16.gmra.mrb[92].mxu0 %v1924_v55  ;;  %1738 = vmatmul.mubr.bf16.gmra.mrb[92].mxu1 %v1925_v56 }
 0x114   :  { %v2339_v57 = vpop.f32.mrb[0].mxu0  ;;  %v2341_v58 = vpop.f32.mrb[0].mxu1 }
 0x115   :  { %v890_v59 = vpop.f32.mrb[1].mxu0  ;;  %v1082_v60 = vpop.f32.mrb[1].mxu1 }
 0x116   :  { %v2343_v61 = vpop.f32.mrb[2].mxu0  ;;  %v2345_v62 = vpop.f32.mrb[2].mxu1  ;;  %v2402_v59 = vld [vmem:[%s2716_s2] ss:$0 sm:$0xff] }
 0x117   :  { %v893_v63 = vpop.f32.mrb[3].mxu0  ;;  %v1085_v0 = vpop.f32.mrb[3].mxu1 }
 0x118   :  { %v889_v63 = vadd.f32 %v2402_v59, %v2339_v57 }
 0x11c   :  { %v896_v1 = vpop.f32.mrb[4].mxu0  ;;  %v2347_v2 = vpop.f32.mrb[4].mxu1 }
 0x11d   :  { %v898_v3 = vpop.f32.mrb[5].mxu0  ;;  %v1090_v4 = vpop.f32.mrb[5].mxu1  ;;  %v897_v60 = vadd.f32 %v2402_v59, %v896_v1 }
 0x11e   :  { %v899_v5 = vpop.f32.mrb[6].mxu0  ;;  %v2349_v6 = vpop.f32.mrb[6].mxu1 }
 0x11f   :  { %v901_v7 = vpop.f32.mrb[7].mxu0  ;;  %v1093_v8 = vpop.f32.mrb[7].mxu1  ;;  %v900_v4 = vadd.f32 %v2402_v59, %v899_v5 }
 0x124   :  { %v2351_v9 = vpop.f32.mrb[8].mxu0  ;;  %v2353_v10 = vpop.f32.mrb[8].mxu1 }
 0x125   :  { %v906_v11 = vpop.f32.mrb[9].mxu0  ;;  %v1098_v12 = vpop.f32.mrb[9].mxu1 }
 0x126   :  { %v2355_v13 = vpop.f32.mrb[10].mxu0  ;;  %v2357_v14 = vpop.f32.mrb[10].mxu1  ;;  %v892_v12 = vadd.f32 %v2402_v59, %v2343_v61 }
 0x127   :  { %v909_v15 = vpop.f32.mrb[11].mxu0  ;;  %v1101_v16 = vpop.f32.mrb[11].mxu1 }
 0x12c   :  { %v2359_v17 = vpop.f32.mrb[12].mxu0  ;;  %v2361_v18 = vpop.f32.mrb[12].mxu1 }
 0x12d   :  { %v914_v19 = vpop.f32.mrb[13].mxu0  ;;  %v1106_v20 = vpop.f32.mrb[13].mxu1  ;;  %v913_v61 = vadd.f32 %v2402_v59, %v2359_v17 }
 0x12e   :  { %v2363_v21 = vpop.f32.mrb[14].mxu0  ;;  %v2365_v22 = vpop.f32.mrb[14].mxu1 }
 0x12f   :  { %v917_v23 = vpop.f32.mrb[15].mxu0  ;;  %v1109_v24 = vpop.f32.mrb[15].mxu1 }
 0x130   :  { %v905_v23 = vadd.f32 %v2402_v59, %v2351_v9 }
 0x134   :  { %v2367_v25 = vpop.f32.mrb[16].mxu0  ;;  %v2369_v26 = vpop.f32.mrb[16].mxu1 }
 0x135   :  { %v922_v27 = vpop.f32.mrb[17].mxu0  ;;  %v1114_v28 = vpop.f32.mrb[17].mxu1 }
 0x136   :  { %v2371_v29 = vpop.f32.mrb[18].mxu0  ;;  %v2373_v30 = vpop.f32.mrb[18].mxu1  ;;  %v916_v28 = vadd.f32 %v2402_v59, %v2363_v21 }
 0x137   :  { %v925_v31 = vpop.f32.mrb[19].mxu0  ;;  %v1117_v32 = vpop.f32.mrb[19].mxu1 }
 0x13c   :  { %v2375_v33 = vpop.f32.mrb[20].mxu0  ;;  %v2377_v34 = vpop.f32.mrb[20].mxu1 }
 0x13d   :  { %v930_v35 = vpop.f32.mrb[21].mxu0  ;;  %v1122_v36 = vpop.f32.mrb[21].mxu1 }
 0x13e   :  { %v2379_v37 = vpop.f32.mrb[22].mxu0  ;;  %v2381_v38 = vpop.f32.mrb[22].mxu1  ;;  %v908_v36 = vadd.f32 %v2402_v59, %v2355_v13  ;;  %v929_v13 = vadd.f32 %v2402_v59, %v2375_v33 }
 0x13f   :  { %v933_v39 = vpop.f32.mrb[23].mxu0  ;;  %v1125_v40 = vpop.f32.mrb[23].mxu1 }
 0x144   :  { %v2383_v41 = vpop.f32.mrb[24].mxu0  ;;  %v2385_v42 = vpop.f32.mrb[24].mxu1 }
 0x145   :  { %v938_v43 = vpop.f32.mrb[25].mxu0  ;;  %v1130_v44 = vpop.f32.mrb[25].mxu1 }
 0x146   :  { %v2387_v45 = vpop.f32.mrb[26].mxu0  ;;  %v2389_v46 = vpop.f32.mrb[26].mxu1 }
 0x147   :  { %v941_v47 = vpop.f32.mrb[27].mxu0  ;;  %v1133_v48 = vpop.f32.mrb[27].mxu1 }
 0x148   :  { %v921_v47 = vadd.f32 %v2402_v59, %v2367_v25 }
 0x14c   :  { %v2391_v49 = vpop.f32.mrb[28].mxu0  ;;  %v2393_v50 = vpop.f32.mrb[28].mxu1 }
 0x14d   :  { %v946_v51 = vpop.f32.mrb[29].mxu0  ;;  %v1138_v52 = vpop.f32.mrb[29].mxu1 }
 0x14e   :  { %v2395_v53 = vpop.f32.mrb[30].mxu0  ;;  %v2397_v54 = vpop.f32.mrb[30].mxu1  ;;  %v932_v52 = vadd.f32 %v2402_v59, %v2379_v37 }
 0x14f   :  { %v949_v55 = vpop.f32.mrb[31].mxu0  ;;  %v1141_v56 = vpop.f32.mrb[31].mxu1 }
 0x154   :  { %v2407_v0 = vpop.f32.mrb[32].mxu0  ;;  %v1679_v3 = vpop.f32.mrb[32].mxu1 }
 0x155   :  { %v1186_v7 = vadd.f32 %v1679_v3, %v897_v60  ;;  %v954_v8 = vpop.f32.mrb[33].mxu0  ;;  %v1177_v11 = vpop.f32.mrb[33].mxu1 }
 0x156   :  { %v1178_v15 = vadd.f32 %v1177_v11, %v889_v63  ;;  %v2412_v16 = vpop.f32.mrb[34].mxu0  ;;  %v1680_v19 = vpop.f32.mrb[34].mxu1  ;;  %v924_v63 = vadd.f32 %v2402_v59, %v2371_v29  ;;  %v945_v29 = vadd.f32 %v2402_v59, %v2391_v49  ;;  %v937_v11 = vadd.f32 %v2402_v59, %v2383_v41 }
 0x157   :  { %1434 = vst [vmem:[%s2717_s3 + $0x10] sm:$0xff] %v1186_v7  ;;  %v1189_v57 = vadd.f32 %v1680_v19, %v900_v4  ;;  %v957_v1 = vpop.f32.mrb[35].mxu0  ;;  %v1180_v20 = vpop.f32.mrb[35].mxu1  ;;  %v948_v19 = vadd.f32 %v2402_v59, %v2395_v53 }
 0x158   :  { %1432 = vst [vmem:[%s2717_s3] sm:$0xff] %v1178_v15  ;;  %v1181_v5 = vadd.f32 %v1180_v20, %v892_v12 }
 0x159   :  { %1435 = vst [vmem:[%s2717_s3 + $0x18] sm:$0xff] %v1189_v57 }
 0x15a   :  { %1433 = vst [vmem:[%s2717_s3 + $0x8] sm:$0xff] %v1181_v5  ;;  %v940_v5 = vadd.f32 %v2402_v59, %v2387_v45 }
 0x15c   :  { %v960_v24 = vpop.f32.mrb[36].mxu0  ;;  %v1683_v27 = vpop.f32.mrb[36].mxu1 }
 0x15d   :  { %v1202_v31 = vadd.f32 %v1683_v27, %v913_v61  ;;  %v962_v32 = vpop.f32.mrb[37].mxu0  ;;  %v1193_v35 = vpop.f32.mrb[37].mxu1  ;;  %v961_v45 = vadd.f32 %v2402_v59, %v960_v24 }
 0x15e   :  { %v1194_v39 = vadd.f32 %v1193_v35, %v905_v23  ;;  %v963_v40 = vpop.f32.mrb[38].mxu0  ;;  %v1684_v43 = vpop.f32.mrb[38].mxu1 }
 0x15f   :  { %1438 = vst [vmem:[%s2717_s3 + $0x30] sm:$0xff] %v1202_v31  ;;  %v1205_v17 = vadd.f32 %v1684_v43, %v916_v28  ;;  %v965_v9 = vpop.f32.mrb[39].mxu0  ;;  %v1196_v44 = vpop.f32.mrb[39].mxu1  ;;  %v953_v31 = vadd.f32 %v2402_v59, %v2407_v0 }
 0x160   :  { %1436 = vst [vmem:[%s2717_s3 + $0x20] sm:$0xff] %v1194_v39  ;;  %v1197_v21 = vadd.f32 %v1196_v44, %v908_v36  ;;  %v964_v36 = vadd.f32 %v2402_v59, %v963_v40  ;;  %v956_v9 = vadd.f32 %v2402_v59, %v2412_v16 }
 0x161   :  { %1439 = vst [vmem:[%s2717_s3 + $0x38] sm:$0xff] %v1205_v17 }
 0x162   :  { %1437 = vst [vmem:[%s2717_s3 + $0x28] sm:$0xff] %v1197_v21 }
 0x164   :  { %v968_v48 = vpop.f32.mrb[40].mxu0  ;;  %v1687_v51 = vpop.f32.mrb[40].mxu1 }
 0x165   :  { %v1218_v55 = vadd.f32 %v1687_v51, %v929_v13  ;;  %v970_v56 = vpop.f32.mrb[41].mxu0  ;;  %v1209_v60 = vpop.f32.mrb[41].mxu1  ;;  %v969_v51 = vadd.f32 %v2402_v59, %v968_v48 }
 0x166   :  { %v1210_v3 = vadd.f32 %v1209_v60, %v921_v47  ;;  %v971_v4 = vpop.f32.mrb[42].mxu0  ;;  %v1688_v7 = vpop.f32.mrb[42].mxu1 }
 0x167   :  { %1442 = vst [vmem:[%s2717_s3 + $0x50] sm:$0xff] %v1218_v55  ;;  %v1221_v33 = vadd.f32 %v1688_v7, %v932_v52  ;;  %v973_v25 = vpop.f32.mrb[43].mxu0  ;;  %v1212_v8 = vpop.f32.mrb[43].mxu1  ;;  %v972_v7 = vadd.f32 %v2402_v59, %v971_v4 }
 0x168   :  { %1440 = vst [vmem:[%s2717_s3 + $0x40] sm:$0xff] %v1210_v3  ;;  %v1213_v37 = vadd.f32 %v1212_v8, %v924_v63 }
 0x169   :  { %1443 = vst [vmem:[%s2717_s3 + $0x58] sm:$0xff] %v1221_v33 }
 0x16a   :  { %1441 = vst [vmem:[%s2717_s3 + $0x48] sm:$0xff] %v1213_v37 }
 0x16c   :  { %v976_v12 = vpop.f32.mrb[44].mxu0  ;;  %v1691_v15 = vpop.f32.mrb[44].mxu1 }
 0x16d   :  { %v1234_v57 = vadd.f32 %v1691_v15, %v945_v29  ;;  %v978_v1 = vpop.f32.mrb[45].mxu0  ;;  %v1225_v20 = vpop.f32.mrb[45].mxu1  ;;  %v977_v16 = vadd.f32 %v2402_v59, %v976_v12 }
 0x16e   :  { %v1226_v61 = vadd.f32 %v1225_v20, %v937_v11  ;;  %v979_v23 = vpop.f32.mrb[46].mxu0  ;;  %v1692_v27 = vpop.f32.mrb[46].mxu1 }
 0x16f   :  { %1446 = vst [vmem:[%s2717_s3 + $0x70] sm:$0xff] %v1234_v57  ;;  %v1237_v49 = vadd.f32 %v1692_v27, %v948_v19  ;;  %v981_v41 = vpop.f32.mrb[47].mxu0  ;;  %v1228_v28 = vpop.f32.mrb[47].mxu1  ;;  %v980_v56 = vadd.f32 %v2402_v59, %v979_v23 }
 0x170   :  { %1444 = vst [vmem:[%s2717_s3 + $0x60] sm:$0xff] %v1226_v61  ;;  %v1229_v53 = vadd.f32 %v1228_v28, %v940_v5 }
 0x171   :  { %1447 = vst [vmem:[%s2717_s3 + $0x78] sm:$0xff] %v1237_v49 }
 0x172   :  { %1445 = vst [vmem:[%s2717_s3 + $0x68] sm:$0xff] %v1229_v53 }
 0x174   :  { %v984_v32 = vpop.f32.mrb[48].mxu0  ;;  %v1695_v35 = vpop.f32.mrb[48].mxu1 }
 0x175   :  { %v1250_v39 = vadd.f32 %v1695_v35, %v961_v45  ;;  %v986_v43 = vpop.f32.mrb[49].mxu0  ;;  %v1241_v17 = vpop.f32.mrb[49].mxu1  ;;  %v985_v12 = vadd.f32 %v2402_v59, %v984_v32 }
 0x176   :  { %v1242_v44 = vadd.f32 %v1241_v17, %v953_v31  ;;  %v987_v21 = vpop.f32.mrb[50].mxu0  ;;  %v1696_v13 = vpop.f32.mrb[50].mxu1 }
 0x177   :  { %1450 = vst [vmem:[%s2717_s3 + $0x90] sm:$0xff] %v1250_v39  ;;  %v1253_v24 = vadd.f32 %v1696_v13, %v964_v36  ;;  %v989_v47 = vpop.f32.mrb[51].mxu0  ;;  %v1244_v0 = vpop.f32.mrb[51].mxu1  ;;  %v988_v61 = vadd.f32 %v2402_v59, %v987_v21 }
 0x178   :  { %1448 = vst [vmem:[%s2717_s3 + $0x80] sm:$0xff] %v1242_v44  ;;  %v1245_v40 = vadd.f32 %v1244_v0, %v956_v9 }
 0x179   :  { %1451 = vst [vmem:[%s2717_s3 + $0x98] sm:$0xff] %v1253_v24 }
 0x17a   :  { %1449 = vst [vmem:[%s2717_s3 + $0x88] sm:$0xff] %v1245_v40 }
 0x17c   :  { %v992_v52 = vpop.f32.mrb[52].mxu0  ;;  %v1699_v55 = vpop.f32.mrb[52].mxu1 }
 0x17d   :  { %v1266_v60 = vadd.f32 %v1699_v55, %v977_v16  ;;  %v994_v63 = vpop.f32.mrb[53].mxu0  ;;  %v1257_v3 = vpop.f32.mrb[53].mxu1  ;;  %v993_v4 = vadd.f32 %v2402_v59, %v992_v52 }
 0x17e   :  { %v1258_v33 = vadd.f32 %v1257_v3, %v969_v51  ;;  %v995_v25 = vpop.f32.mrb[54].mxu0  ;;  %v1700_v8 = vpop.f32.mrb[54].mxu1 }
 0x17f   :  { %1454 = vst [vmem:[%s2717_s3 + $0xb0] sm:$0xff] %v1266_v60  ;;  %v1269_v37 = vadd.f32 %v1700_v8, %v980_v56  ;;  %v997_v29 = vpop.f32.mrb[55].mxu0  ;;  %v1260_v11 = vpop.f32.mrb[55].mxu1  ;;  %v996_v57 = vadd.f32 %v2402_v59, %v995_v25 }
 0x180   :  { %1452 = vst [vmem:[%s2717_s3 + $0xa0] sm:$0xff] %v1258_v33  ;;  %v1261_v48 = vadd.f32 %v1260_v11, %v972_v7 }
 0x181   :  { %1455 = vst [vmem:[%s2717_s3 + $0xb8] sm:$0xff] %v1269_v37 }
 0x182   :  { %1453 = vst [vmem:[%s2717_s3 + $0xa8] sm:$0xff] %v1261_v48 }
 0x184   :  { %v1000_v15 = vpop.f32.mrb[56].mxu0  ;;  %v1703_v19 = vpop.f32.mrb[56].mxu1 }
 0x185   :  { %v1282_v1 = vadd.f32 %v1703_v19, %v993_v4  ;;  %v1002_v20 = vpop.f32.mrb[57].mxu0  ;;  %v1273_v5 = vpop.f32.mrb[57].mxu1  ;;  %v1001_v31 = vadd.f32 %v2402_v59, %v1000_v15 }
 0x186   :  { %v1274_v23 = vadd.f32 %v1273_v5, %v985_v12  ;;  %v1003_v27 = vpop.f32.mrb[58].mxu0  ;;  %v1704_v49 = vpop.f32.mrb[58].mxu1 }
 0x187   :  { %1458 = vst [vmem:[%s2717_s3 + $0xd0] sm:$0xff] %v1282_v1  ;;  %v1285_v41 = vadd.f32 %v1704_v49, %v996_v57  ;;  %v1005_v28 = vpop.f32.mrb[59].mxu0  ;;  %v1276_v53 = vpop.f32.mrb[59].mxu1  ;;  %v1004_v17 = vadd.f32 %v2402_v59, %v1003_v27 }
 0x188   :  { %1456 = vst [vmem:[%s2717_s3 + $0xc0] sm:$0xff] %v1274_v23  ;;  %v1277_v45 = vadd.f32 %v1276_v53, %v988_v61 }
 0x189   :  { %1459 = vst [vmem:[%s2717_s3 + $0xd8] sm:$0xff] %v1285_v41 }
 0x18a   :  { %1457 = vst [vmem:[%s2717_s3 + $0xc8] sm:$0xff] %v1277_v45 }
 0x18c   :  { %v1008_v32 = vpop.f32.mrb[60].mxu0  ;;  %v1707_v35 = vpop.f32.mrb[60].mxu1 }
 0x18d   :  { %v1009_v36 = vadd.f32 %v2402_v59, %v1008_v32  ;;  %v1010_v39 = vpop.f32.mrb[61].mxu0  ;;  %v1289_v43 = vpop.f32.mrb[61].mxu1 }
 0x18e   :  { %v1290_v9 = vadd.f32 %v1289_v43, %v1001_v31  ;;  %v1011_v44 = vpop.f32.mrb[62].mxu0  ;;  %v1708_v21 = vpop.f32.mrb[62].mxu1 }
 0x18f   :  { %v1298_v13 = vadd.f32 %v1707_v35, %v1009_v36  ;;  %v1012_v24 = vadd.f32 %v2402_v59, %v1011_v44  ;;  %v1013_v47 = vpop.f32.mrb[63].mxu0  ;;  %v1292_v0 = vpop.f32.mrb[63].mxu1 }
 0x190   :  { %1460 = vst [vmem:[%s2717_s3 + $0xe0] sm:$0xff] %v1290_v9  ;;  %v1293_v40 = vadd.f32 %v1292_v0, %v1004_v17 }
 0x191   :  { %1462 = vst [vmem:[%s2717_s3 + $0xf0] sm:$0xff] %v1298_v13  ;;  %v1301_v16 = vadd.f32 %v1708_v21, %v1012_v24 }
 0x192   :  { %1461 = vst [vmem:[%s2717_s3 + $0xe8] sm:$0xff] %v1293_v40 }
 0x193   :  { %1463 = vst [vmem:[%s2717_s3 + $0xf8] sm:$0xff] %v1301_v16 }
 0x194   :  { %v1016_v51 = vpop.f32.mrb[64].mxu0  ;;  %v1711_v52 = vpop.f32.mrb[64].mxu1 }
 0x195   :  { %v1017_v55 = vadd.f32 %v2402_v59, %v1016_v51  ;;  %v1018_v56 = vpop.f32.mrb[65].mxu0  ;;  %v1305_v60 = vpop.f32.mrb[65].mxu1 }
 0x196   :  { %v1019_v63 = vpop.f32.mrb[66].mxu0  ;;  %v1712_v3 = vpop.f32.mrb[66].mxu1 }
 0x197   :  { %v1306_v7 = vadd.f32 %v1305_v60, %v1017_v55  ;;  %v1020_v33 = vadd.f32 %v2402_v59, %v1019_v63  ;;  %v1021_v25 = vpop.f32.mrb[67].mxu0  ;;  %v1308_v8 = vpop.f32.mrb[67].mxu1  ;;  %v1081_v55 = vadd.f32 %v2402_v59, %v2341_v58  ;;  %v1092_v63 = vadd.f32 %v2402_v59, %v2349_v6 }
 0x199   :  { %1464 = vst [vmem:[%s2717_s3 + $0x100] sm:$0xff] %v1306_v7  ;;  %v1309_v37 = vadd.f32 %v1308_v8, %v1020_v33 }
 0x19b   :  { %1465 = vst [vmem:[%s2717_s3 + $0x108] sm:$0xff] %v1309_v37 }
 0x19c   :  { %v1024_v29 = vpop.f32.mrb[68].mxu0  ;;  %v1715_v11 = vpop.f32.mrb[68].mxu1 }
 0x19d   :  { %v1025_v48 = vadd.f32 %v2402_v59, %v1024_v29  ;;  %v1026_v4 = vpop.f32.mrb[69].mxu0  ;;  %v1321_v12 = vpop.f32.mrb[69].mxu1 }
 0x19e   :  { %v1027_v15 = vpop.f32.mrb[70].mxu0  ;;  %v1716_v19 = vpop.f32.mrb[70].mxu1 }
 0x19f   :  { %v1314_v57 = vadd.f32 %v1711_v52, %v1025_v48  ;;  %v1028_v1 = vadd.f32 %v2402_v59, %v1027_v15  ;;  %v1029_v20 = vpop.f32.mrb[71].mxu0  ;;  %v1324_v5 = vpop.f32.mrb[71].mxu1  ;;  %v1089_v52 = vadd.f32 %v2402_v59, %v2347_v2  ;;  %v1084_v2 = vadd.f32 %v2402_v59, %v2345_v62 }
 0x1a0   :  { %v1105_v15 = vadd.f32 %v2402_v59, %v2361_v18  ;;  %v1108_v20 = vadd.f32 %v2402_v59, %v2365_v22  ;;  %v1100_v18 = vadd.f32 %v2402_v59, %v2357_v14 }
 0x1a1   :  { %1466 = vst [vmem:[%s2717_s3 + $0x110] sm:$0xff] %v1314_v57  ;;  %v1317_v61 = vadd.f32 %v1712_v3, %v1028_v1 }
 0x1a3   :  { %1467 = vst [vmem:[%s2717_s3 + $0x118] sm:$0xff] %v1317_v61 }
 0x1a4   :  { %v1032_v23 = vpop.f32.mrb[72].mxu0  ;;  %v2568_v27 = vpop.f32.mrb[72].mxu1 }
 0x1a5   :  { %v1033_v49 = vadd.f32 %v2402_v59, %v1032_v23  ;;  %v1034_v41 = vpop.f32.mrb[73].mxu0  ;;  %v1337_v28 = vpop.f32.mrb[73].mxu1 }
 0x1a6   :  { %v1035_v53 = vpop.f32.mrb[74].mxu0  ;;  %v2571_v45 = vpop.f32.mrb[74].mxu1 }
 0x1a7   :  { %v1322_v31 = vadd.f32 %v1321_v12, %v1033_v49  ;;  %v1036_v32 = vadd.f32 %v2402_v59, %v1035_v53  ;;  %v1037_v35 = vpop.f32.mrb[75].mxu0  ;;  %v1340_v36 = vpop.f32.mrb[75].mxu1 }
 0x1a9   :  { %1468 = vst [vmem:[%s2717_s3 + $0x120] sm:$0xff] %v1322_v31  ;;  %v1325_v39 = vadd.f32 %v1324_v5, %v1036_v32 }
 0x1ab   :  { %1469 = vst [vmem:[%s2717_s3 + $0x128] sm:$0xff] %v1325_v39  ;;  %v1113_v39 = vadd.f32 %v2402_v59, %v2369_v26 }
 0x1ac   :  { %v1040_v43 = vpop.f32.mrb[76].mxu0  ;;  %v2580_v17 = vpop.f32.mrb[76].mxu1 }
 0x1ad   :  { %v1041_v9 = vadd.f32 %v2402_v59, %v1040_v43  ;;  %v1042_v44 = vpop.f32.mrb[77].mxu0  ;;  %v2583_v21 = vpop.f32.mrb[77].mxu1 }
 0x1ae   :  { %v1043_v13 = vpop.f32.mrb[78].mxu0  ;;  %v2585_v24 = vpop.f32.mrb[78].mxu1 }
 0x1af   :  { %v1330_v47 = vadd.f32 %v1715_v11, %v1041_v9  ;;  %v1044_v0 = vadd.f32 %v2402_v59, %v1043_v13  ;;  %v1045_v40 = vpop.f32.mrb[79].mxu0  ;;  %v2588_v16 = vpop.f32.mrb[79].mxu1  ;;  %v1124_v9 = vadd.f32 %v2402_v59, %v2381_v38 }
 0x1b1   :  { %1470 = vst [vmem:[%s2717_s3 + $0x130] sm:$0xff] %v1330_v47  ;;  %v1333_v51 = vadd.f32 %v1716_v19, %v1044_v0  ;;  %v1097_v19 = vadd.f32 %v2402_v59, %v2353_v10 }
 0x1b3   :  { %1471 = vst [vmem:[%s2717_s3 + $0x138] sm:$0xff] %v1333_v51 }
 0x1b4   :  { %v1048_v56 = vpop.f32.mrb[80].mxu0  ;;  %v1727_v60 = vpop.f32.mrb[80].mxu1 }
 0x1b5   :  { %v1049_v3 = vadd.f32 %v2402_v59, %v1048_v56  ;;  %v1378_v7 = vadd.f32 %v1727_v60, %v1089_v52  ;;  %v1050_v33 = vpop.f32.mrb[81].mxu0  ;;  %v1369_v25 = vpop.f32.mrb[81].mxu1 }
 0x1b6   :  { %v1370_v8 = vadd.f32 %v1369_v25, %v1081_v55  ;;  %v1051_v37 = vpop.f32.mrb[82].mxu0  ;;  %v1728_v29 = vpop.f32.mrb[82].mxu1  ;;  %v1140_v33 = vadd.f32 %v2402_v59, %v2397_v54 }
 0x1b7   :  { %v1338_v11 = vadd.f32 %v1337_v28, %v1049_v3  ;;  %1482 = vst [vmem:[%s2717_s3 + $0x190] sm:$0xff] %v1378_v7  ;;  %v1052_v58 = vadd.f32 %v2402_v59, %v1051_v37  ;;  %v1381_v48 = vadd.f32 %v1728_v29, %v1092_v63  ;;  %v1053_v6 = vpop.f32.mrb[83].mxu0  ;;  %v1372_v4 = vpop.f32.mrb[83].mxu1  ;;  %v1129_v3 = vadd.f32 %v2402_v59, %v2385_v42 }
 0x1b8   :  { %1480 = vst [vmem:[%s2717_s3 + $0x180] sm:$0xff] %v1370_v8  ;;  %v1373_v12 = vadd.f32 %v1372_v4, %v1084_v2 }
 0x1b9   :  { %1472 = vst [vmem:[%s2717_s3 + $0x140] sm:$0xff] %v1338_v11  ;;  %v1341_v62 = vadd.f32 %v1340_v36, %v1052_v58  ;;  %1483 = vst [vmem:[%s2717_s3 + $0x198] sm:$0xff] %v1381_v48 }
 0x1ba   :  { %1481 = vst [vmem:[%s2717_s3 + $0x188] sm:$0xff] %v1373_v12 }
 0x1bb   :  { %1473 = vst [vmem:[%s2717_s3 + $0x148] sm:$0xff] %v1341_v62 }
 0x1bc   :  { %v1056_v57 = vpop.f32.mrb[84].mxu0  ;;  %v1731_v1 = vpop.f32.mrb[84].mxu1 }
 0x1bd   :  { %v1057_v5 = vadd.f32 %v2402_v59, %v1056_v57  ;;  %v1394_v61 = vadd.f32 %v1731_v1, %v1105_v15  ;;  %v1058_v23 = vpop.f32.mrb[85].mxu0  ;;  %v1385_v49 = vpop.f32.mrb[85].mxu1 }
 0x1be   :  { %v1386_v41 = vadd.f32 %v1385_v49, %v1097_v19  ;;  %v1059_v28 = vpop.f32.mrb[86].mxu0  ;;  %v1732_v53 = vpop.f32.mrb[86].mxu1 }
 0x1bf   :  { %v1346_v31 = vadd.f32 %v2568_v27, %v1057_v5  ;;  %1486 = vst [vmem:[%s2717_s3 + $0x1b0] sm:$0xff] %v1394_v61  ;;  %v1060_v10 = vadd.f32 %v2402_v59, %v1059_v28  ;;  %v1397_v22 = vadd.f32 %v1732_v53, %v1108_v20  ;;  %v1061_v32 = vpop.f32.mrb[87].mxu0  ;;  %v1388_v35 = vpop.f32.mrb[87].mxu1  ;;  %v1121_v27 = vadd.f32 %v2402_v59, %v2377_v34 }
 0x1c0   :  { %1484 = vst [vmem:[%s2717_s3 + $0x1a0] sm:$0xff] %v1386_v41  ;;  %v1389_v36 = vadd.f32 %v1388_v35, %v1100_v18  ;;  %v1116_v34 = vadd.f32 %v2402_v59, %v2373_v30 }
 0x1c1   :  { %1474 = vst [vmem:[%s2717_s3 + $0x150] sm:$0xff] %v1346_v31  ;;  %v1349_v14 = vadd.f32 %v2571_v45, %v1060_v10  ;;  %1487 = vst [vmem:[%s2717_s3 + $0x1b8] sm:$0xff] %v1397_v22 }
 0x1c2   :  { %1485 = vst [vmem:[%s2717_s3 + $0x1a8] sm:$0xff] %v1389_v36 }
 0x1c3   :  { %1475 = vst [vmem:[%s2717_s3 + $0x158] sm:$0xff] %v1349_v14 }
 0x1c4   :  { %v1064_v43 = vpop.f32.mrb[88].mxu0  ;;  %v1735_v45 = vpop.f32.mrb[88].mxu1 }
 0x1c5   :  { %v1065_v44 = vadd.f32 %v2402_v59, %v1064_v43  ;;  %v1410_v13 = vadd.f32 %v1735_v45, %v1121_v27  ;;  %v1066_v47 = vpop.f32.mrb[89].mxu0  ;;  %v1401_v0 = vpop.f32.mrb[89].mxu1 }
 0x1c6   :  { %v1402_v40 = vadd.f32 %v1401_v0, %v1113_v39  ;;  %v1067_v51 = vpop.f32.mrb[90].mxu0  ;;  %v1736_v52 = vpop.f32.mrb[90].mxu1 }
 0x1c7   :  { %v1354_v55 = vadd.f32 %v2583_v21, %v1065_v44  ;;  %1490 = vst [vmem:[%s2717_s3 + $0x1d0] sm:$0xff] %v1410_v13  ;;  %v1068_v26 = vadd.f32 %v2402_v59, %v1067_v51  ;;  %v1413_v38 = vadd.f32 %v1736_v52, %v1124_v9  ;;  %v1069_v56 = vpop.f32.mrb[91].mxu0  ;;  %v1404_v60 = vpop.f32.mrb[91].mxu1  ;;  %v1137_v21 = vadd.f32 %v2402_v59, %v2393_v50 }
 0x1c8   :  { %1488 = vst [vmem:[%s2717_s3 + $0x1c0] sm:$0xff] %v1402_v40  ;;  %v1405_v63 = vadd.f32 %v1404_v60, %v1116_v34  ;;  %v1132_v50 = vadd.f32 %v2402_v59, %v2389_v46 }
 0x1c9   :  { %1476 = vst [vmem:[%s2717_s3 + $0x160] sm:$0xff] %v1354_v55  ;;  %v1357_v30 = vadd.f32 %v2588_v16, %v1068_v26  ;;  %1491 = vst [vmem:[%s2717_s3 + $0x1d8] sm:$0xff] %v1413_v38 }
 0x1ca   :  { %1489 = vst [vmem:[%s2717_s3 + $0x1c8] sm:$0xff] %v1405_v63 }
 0x1cb   :  { %1477 = vst [vmem:[%s2717_s3 + $0x168] sm:$0xff] %v1357_v30 }
 0x1cc   :  { %v1072_v7 = vpop.f32.mrb[92].mxu0  ;;  %v1739_v16 = vpop.f32.mrb[92].mxu1 }
 0x1cd   :  { %v1073_v25 = vadd.f32 %v2402_v59, %v1072_v7  ;;  %v1426_v2 = vadd.f32 %v1739_v16, %v1137_v21  ;;  %v1074_v8 = vpop.f32.mrb[93].mxu0  ;;  %v1417_v37 = vpop.f32.mrb[93].mxu1 }
 0x1ce   :  { %v1418_v29 = vadd.f32 %v1417_v37, %v1129_v3  ;;  %v1075_v11 = vpop.f32.mrb[94].mxu0  ;;  %v1740_v58 = vpop.f32.mrb[94].mxu1 }
 0x1cf   :  { %v1362_v48 = vadd.f32 %v2580_v17, %v1073_v25  ;;  %1494 = vst [vmem:[%s2717_s3 + $0x1f0] sm:$0xff] %v1426_v2  ;;  %v1076_v42 = vadd.f32 %v2402_v59, %v1075_v11  ;;  %v1429_v54 = vadd.f32 %v1740_v58, %v1140_v33  ;;  %v1077_v6 = vpop.f32.mrb[95].mxu0  ;;  %v1420_v4 = vpop.f32.mrb[95].mxu1 }
 0x1d0   :  { %1492 = vst [vmem:[%s2717_s3 + $0x1e0] sm:$0xff] %v1418_v29  ;;  %v1421_v12 = vadd.f32 %v1420_v4, %v1132_v50 }
 0x1d1   :  { %1478 = vst [vmem:[%s2717_s3 + $0x170] sm:$0xff] %v1362_v48  ;;  %v1365_v46 = vadd.f32 %v2585_v24, %v1076_v42  ;;  %1495 = vst [vmem:[%s2717_s3 + $0x1f8] sm:$0xff] %v1429_v54 }
 0x1d2   :  { %1493 = vst [vmem:[%s2717_s3 + $0x1e8] sm:$0xff] %v1421_v12 }
 0x1d3   :  { %1479 = vst [vmem:[%s2717_s3 + $0x178] sm:$0xff] %v1365_v46 }

// kernel: video_codec_forward.30
= control target key start
LH: loop header
LB: loop body
LE: loop exit
PB: predicated region body
PF: predicated region fallthrough
CT: control target
= control target key end

     0   :  { %s164_s0 = inlined_call_operand.vmem [shape: f32[16,128], index: 0, kind: input, shape index: {}]   ;;  %s165_s1 = inlined_call_operand.vmem [shape: f32[16,128], index: 1, kind: input, shape index: {}]   ;;  %s166_s2 = inlined_call_operand.vmem [shape: f32[16,128], index: 2, kind: input, shape index: {}]   ;;  %s167_s3 = inlined_call_operand.vmem [shape: f32[16,128], index: 3, kind: input, shape index: {}]   ;;  %s168_s4 = inlined_call_operand.vmem [shape: f32[16,128], index: 4, kind: input, shape index: {}]   ;;  %s169_s5 = inlined_call_operand.vmem [shape: f32[16,128], index: 5, kind: input, shape index: {}]   ;;  %s170_s6 = inlined_call_operand.vmem [shape: f32[16,128], index: 6, kind: input, shape index: {}]   ;;  %s171_s7 = inlined_call_operand.vmem [shape: f32[16,128], index: 7, kind: input, shape index: {}]   ;;  %s172_s8 = inlined_call_operand.vmem [shape: f32[16,128], index: 8, kind: output, shape index: {}]  }
   0x1   :  { %v29_v0 = vld [vmem:[%s164_s0] sm:$0xff]  ;;  %v30_v11 = vld [vmem:[%s164_s0 + $0x8] sm:$0xff] }
   0x2   :  { %v31_v1 = vld [vmem:[%s168_s4] sm:$0xff]  ;;  %v32_v12 = vld [vmem:[%s168_s4 + $0x8] sm:$0xff] }
   0x3   :  { %v35_v2 = vld [vmem:[%s165_s1] sm:$0xff]  ;;  %v33_v3 = vmul.f32 %v31_v1, %v29_v0  ;;  %v36_v13 = vld [vmem:[%s165_s1 + $0x8] sm:$0xff]  ;;  %v34_v17 = vmul.f32 %v32_v12, %v30_v11 }
   0x4   :  { %v37_v4 = vld [vmem:[%s169_s5] sm:$0xff]  ;;  %v38_v14 = vld [vmem:[%s169_s5 + $0x8] sm:$0xff] }
   0x5   :  { %v43_v5 = vld [vmem:[%s166_s2] sm:$0xff]  ;;  %v39_v7 = vmul.f32 %v37_v4, %v35_v2  ;;  %v40_v18 = vmul.f32 %v38_v14, %v36_v13  ;;  %v44_v19 = vld [vmem:[%s166_s2 + $0x8] sm:$0xff] }
   0x6   :  { %v45_v6 = vld [vmem:[%s170_s6] sm:$0xff]  ;;  %v46_v20 = vld [vmem:[%s170_s6 + $0x8] sm:$0xff] }
   0x7   :  { %v47_v8 = vmul.f32 %v45_v6, %v43_v5  ;;  %v51_v9 = vld [vmem:[%s167_s3] sm:$0xff]  ;;  %v41_v15 = vadd.f32 %v39_v7, %v33_v3  ;;  %v52_v21 = vld [vmem:[%s167_s3 + $0x8] sm:$0xff]  ;;  %v48_v22 = vmul.f32 %v46_v20, %v44_v19  ;;  %v42_v25 = vadd.f32 %v40_v18, %v34_v17 }
   0x8   :  { %v53_v10 = vld [vmem:[%s171_s7] sm:$0xff]  ;;  %v54_v23 = vld [vmem:[%s171_s7 + $0x8] sm:$0xff] }
   0x9   :  { %v55_v16 = vmul.f32 %v53_v10, %v51_v9  ;;  %v49_v24 = vadd.f32 %v47_v8, %v41_v15  ;;  %v56_v26 = vmul.f32 %v54_v23, %v52_v21  ;;  %v50_v28 = vadd.f32 %v48_v22, %v42_v25 }
   0xb   :  { %v57_v27 = vadd.f32 %v55_v16, %v49_v24  ;;  %v58_v29 = vadd.f32 %v56_v26, %v50_v28 }
   0xd   :  { %59 = vst [vmem:[%s172_s8] sm:$0xff] %v57_v27  ;;  %60 = vst [vmem:[%s172_s8 + $0x8] sm:$0xff] %v58_v29 }

// kernel: video_codec_forward.31
= control target key start
LH: loop header
LB: loop body
LE: loop exit
PB: predicated region body
PF: predicated region fallthrough
CT: control target
= control target key end

     0   :  { %s1381_s1 = inlined_call_operand.vmem [shape: bf16[128,128], index: 1, kind: input, shape index: {}]   ;;  %s1382_s0 = inlined_call_operand.vmem [shape: bf16[512,128], index: 0, kind: input, shape index: {}]   ;;  %s1383_s2 = inlined_call_operand.vmem [shape: f32[1,128], index: 2, kind: input, shape index: {}]   ;;  %s1384_s3 = inlined_call_operand.vmem [shape: f32[512,128], index: 3, kind: output, shape index: {}]  }
   0x1   :  { %v940_v0 = vld [vmem:[%s1381_s1] sm:$0xff]   ;;  %v941_v1 = vld [vmem:[%s1381_s1 + $0x8] sm:$0xff]   ;;  %v942_v2 = vld [vmem:[%s1381_s1 + $0x10] sm:$0xff]  }
   0x2   :  { %844 = vmatprep.subr.bf16.mxu0 %v940_v0  ;;  %924 = vmatprep.subr.bf16.mxu1 %v940_v0  ;;  %v943_v3 = vld [vmem:[%s1381_s1 + $0x18] sm:$0xff]   ;;  %v948_v4 = vld [vmem:[%s1382_s0] sm:$0xff]   ;;  %v945_v7 = vld [vmem:[%s1381_s1 + $0x28] sm:$0xff]  }
   0x3   :  { %845 = vmatpush3.bf16.msra.mxu0 %v940_v0  ;;  %932 = vmatpush3.bf16.msra.mxu1 %v940_v0  ;;  %v949_v5 = vld [vmem:[%s1382_s0 + $0x80] sm:$0xff]   ;;  %v946_v8 = vld [vmem:[%s1381_s1 + $0x30] sm:$0xff]   ;;  %v947_v9 = vld [vmem:[%s1381_s1 + $0x38] sm:$0xff]  }
   0x4   :  { %846 = vmatprep.subr.bf16.mxu0 %v941_v1  ;;  %925 = vmatprep.subr.bf16.mxu1 %v941_v1  ;;  %v944_v6 = vld [vmem:[%s1381_s1 + $0x20] sm:$0xff]   ;;  %v950_v10 = vld [vmem:[%s1382_s0 + $0x8] sm:$0xff]   ;;  %v952_v12 = vld [vmem:[%s1382_s0 + $0x10] sm:$0xff]  }
   0x5   :  { %860 = vmatprep.mubr.bf16.mxu0 %v948_v4  ;;  %892 = vmatprep.mubr.bf16.mxu1 %v949_v5  ;;  %v951_v11 = vld [vmem:[%s1382_s0 + $0x88] sm:$0xff]   ;;  %v953_v13 = vld [vmem:[%s1382_s0 + $0x90] sm:$0xff]   ;;  %v954_v14 = vld [vmem:[%s1382_s0 + $0x18] sm:$0xff]  }
   0x6   :  { %v955_v15 = vld [vmem:[%s1382_s0 + $0x98] sm:$0xff]   ;;  %v956_v16 = vld [vmem:[%s1382_s0 + $0x20] sm:$0xff]   ;;  %v958_v18 = vld [vmem:[%s1382_s0 + $0x28] sm:$0xff]  }
   0x7   :  { %847 = vmatpush3.bf16.msra.mxu0 %v941_v1  ;;  %933 = vmatpush3.bf16.msra.mxu1 %v941_v1  ;;  %v957_v17 = vld [vmem:[%s1382_s0 + $0xa0] sm:$0xff]   ;;  %v959_v19 = vld [vmem:[%s1382_s0 + $0xa8] sm:$0xff]   ;;  %v960_v20 = vld [vmem:[%s1382_s0 + $0x30] sm:$0xff]  }
   0x8   :  { %848 = vmatprep.subr.bf16.mxu0 %v942_v2  ;;  %926 = vmatprep.subr.bf16.mxu1 %v942_v2  ;;  %v961_v21 = vld [vmem:[%s1382_s0 + $0xb0] sm:$0xff]   ;;  %v962_v22 = vld [vmem:[%s1382_s0 + $0x38] sm:$0xff]   ;;  %v964_v24 = vld [vmem:[%s1382_s0 + $0x40] sm:$0xff]  }
   0x9   :  { %v963_v23 = vld [vmem:[%s1382_s0 + $0xb8] sm:$0xff]   ;;  %v965_v25 = vld [vmem:[%s1382_s0 + $0xc0] sm:$0xff]   ;;  %v966_v26 = vld [vmem:[%s1382_s0 + $0x48] sm:$0xff]  }
   0xa   :  { %v967_v27 = vld [vmem:[%s1382_s0 + $0xc8] sm:$0xff]   ;;  %v968_v28 = vld [vmem:[%s1382_s0 + $0x50] sm:$0xff]   ;;  %v970_v30 = vld [vmem:[%s1382_s0 + $0x58] sm:$0xff]  }
   0xb   :  { %849 = vmatpush3.bf16.msra.mxu0 %v942_v2  ;;  %934 = vmatpush3.bf16.msra.mxu1 %v942_v2  ;;  %v969_v29 = vld [vmem:[%s1382_s0 + $0xd0] sm:$0xff]   ;;  %v971_v31 = vld [vmem:[%s1382_s0 + $0xd8] sm:$0xff]   ;;  %v972_v32 = vld [vmem:[%s1382_s0 + $0x60] sm:$0xff]  }
   0xc   :  { %850 = vmatprep.subr.bf16.mxu0 %v943_v3  ;;  %927 = vmatprep.subr.bf16.mxu1 %v943_v3  ;;  %v973_v33 = vld [vmem:[%s1382_s0 + $0xe0] sm:$0xff]   ;;  %v974_v34 = vld [vmem:[%s1382_s0 + $0x68] sm:$0xff]   ;;  %v976_v36 = vld [vmem:[%s1382_s0 + $0x70] sm:$0xff]  }
   0xd   :  { %v975_v35 = vld [vmem:[%s1382_s0 + $0xe8] sm:$0xff]   ;;  %v977_v37 = vld [vmem:[%s1382_s0 + $0xf0] sm:$0xff]   ;;  %v978_v38 = vld [vmem:[%s1382_s0 + $0x78] sm:$0xff]  }
   0xe   :  { %v979_v39 = vld [vmem:[%s1382_s0 + $0xf8] sm:$0xff]   ;;  %v1123_v40 = vld [vmem:[%s1383_s2] ss:$0 sm:$0xff] }
   0xf   :  { %851 = vmatpush3.bf16.msra.mxu0 %v943_v3  ;;  %935 = vmatpush3.bf16.msra.mxu1 %v943_v3 }
  0x10   :  { %852 = vmatprep.subr.bf16.mxu0 %v944_v6  ;;  %928 = vmatprep.subr.bf16.mxu1 %v944_v6 }
  0x13   :  { %853 = vmatpush3.bf16.msra.mxu0 %v944_v6  ;;  %936 = vmatpush3.bf16.msra.mxu1 %v944_v6 }
  0x14   :  { %854 = vmatprep.subr.bf16.mxu0 %v945_v7  ;;  %929 = vmatprep.subr.bf16.mxu1 %v945_v7 }
  0x17   :  { %855 = vmatpush3.bf16.msra.mxu0 %v945_v7  ;;  %937 = vmatpush3.bf16.msra.mxu1 %v945_v7 }
  0x18   :  { %856 = vmatprep.subr.bf16.mxu0 %v946_v8  ;;  %930 = vmatprep.subr.bf16.mxu1 %v946_v8 }
  0x1b   :  { %857 = vmatpush3.bf16.msra.mxu0 %v946_v8  ;;  %938 = vmatpush3.bf16.msra.mxu1 %v946_v8 }
  0x1c   :  { %858 = vmatprep.subr.bf16.mxu0 %v947_v9  ;;  %931 = vmatprep.subr.bf16.mxu1 %v947_v9 }
  0x1f   :  { %859 = vmatpush3.bf16.msra.mxu0 %v947_v9  ;;  %939 = vmatpush3.bf16.msra.mxu1 %v947_v9 }
  0x22   :  { %861 = vmatmul.mubr.bf16.vlgmr.msra.gmra.mrb[0].mxu0 %v950_v10  ;;  %893 = vmatmul.mubr.bf16.vlgmr.msra.gmra.mrb[0].mxu1 %v951_v11 }
  0x23   :  { %864 = vmatprep.mubr.bf16.mxu0 %v952_v12  ;;  %896 = vmatprep.mubr.bf16.mxu1 %v953_v13 }
  0x2a   :  { %865 = vmatmul.mubr.bf16.gmra.mrb[4].mxu0 %v954_v14  ;;  %897 = vmatmul.mubr.bf16.gmra.mrb[4].mxu1 %v955_v15 }
  0x2b   :  { %868 = vmatprep.mubr.bf16.mxu0 %v956_v16  ;;  %900 = vmatprep.mubr.bf16.mxu1 %v957_v17 }
  0x32   :  { %869 = vmatmul.mubr.bf16.gmra.mrb[8].mxu0 %v958_v18  ;;  %901 = vmatmul.mubr.bf16.gmra.mrb[8].mxu1 %v959_v19 }
  0x33   :  { %872 = vmatprep.mubr.bf16.mxu0 %v960_v20  ;;  %904 = vmatprep.mubr.bf16.mxu1 %v961_v21 }
  0x3a   :  { %873 = vmatmul.mubr.bf16.gmra.mrb[12].mxu0 %v962_v22  ;;  %905 = vmatmul.mubr.bf16.gmra.mrb[12].mxu1 %v963_v23 }
  0x3b   :  { %876 = vmatprep.mubr.bf16.mxu0 %v964_v24  ;;  %908 = vmatprep.mubr.bf16.mxu1 %v965_v25 }
  0x42   :  { %877 = vmatmul.mubr.bf16.gmra.mrb[16].mxu0 %v966_v26  ;;  %909 = vmatmul.mubr.bf16.gmra.mrb[16].mxu1 %v967_v27 }
  0x43   :  { %880 = vmatprep.mubr.bf16.mxu0 %v968_v28  ;;  %912 = vmatprep.mubr.bf16.mxu1 %v969_v29 }
  0x4a   :  { %881 = vmatmul.mubr.bf16.gmra.mrb[20].mxu0 %v970_v30  ;;  %913 = vmatmul.mubr.bf16.gmra.mrb[20].mxu1 %v971_v31 }
  0x4b   :  { %884 = vmatprep.mubr.bf16.mxu0 %v972_v32  ;;  %916 = vmatprep.mubr.bf16.mxu1 %v973_v33 }
  0x52   :  { %885 = vmatmul.mubr.bf16.gmra.mrb[24].mxu0 %v974_v34  ;;  %917 = vmatmul.mubr.bf16.gmra.mrb[24].mxu1 %v975_v35 }
  0x53   :  { %888 = vmatprep.mubr.bf16.mxu0 %v976_v36  ;;  %920 = vmatprep.mubr.bf16.mxu1 %v977_v37 }
  0x5a   :  { %889 = vmatmul.mubr.bf16.gmra.mrb[28].mxu0 %v978_v38  ;;  %921 = vmatmul.mubr.bf16.gmra.mrb[28].mxu1 %v979_v39 }
  0xf5   :  { %v862_v41 = vpop.f32.mrb[0].mxu0  ;;  %v894_v42 = vpop.f32.mrb[0].mxu1 }
  0xf6   :  { %v385_v43 = vadd.f32 %v862_v41, %v1123_v40  ;;  %v513_v44 = vadd.f32 %v894_v42, %v1123_v40  ;;  %v376_v45 = vpop.f32.mrb[1].mxu0  ;;  %v504_v46 = vpop.f32.mrb[1].mxu1 }
  0xf7   :  { %v377_v47 = vadd.f32 %v1123_v40, %v376_v45  ;;  %v505_v48 = vadd.f32 %v1123_v40, %v504_v46  ;;  %v863_v49 = vpop.f32.mrb[2].mxu0  ;;  %v895_v50 = vpop.f32.mrb[2].mxu1 }
  0xf8   :  { %v633_v51 = vmax.f32 %v385_v43, 0.0  ;;  %v665_v52 = vmax.f32 %v513_v44, 0.0  ;;  %v388_v53 = vadd.f32 %v863_v49, %v1123_v40  ;;  %v516_v54 = vadd.f32 %v895_v50, %v1123_v40  ;;  %v379_v55 = vpop.f32.mrb[3].mxu0  ;;  %v507_v56 = vpop.f32.mrb[3].mxu1 }
  0xf9   :  { %v631_v57 = vmax.f32 %v377_v47, 0.0  ;;  %v663_v58 = vmax.f32 %v505_v48, 0.0  ;;  %v380_v59 = vadd.f32 %v1123_v40, %v379_v55  ;;  %v508_v60 = vadd.f32 %v1123_v40, %v507_v56 }
  0xfa   :  { %697 = vst [vmem:[%s1384_s3 + $0x10] sm:$0xff] %v633_v51  ;;  %729 = vst [vmem:[%s1384_s3 + $0x110] sm:$0xff] %v665_v52  ;;  %v634_v61 = vmax.f32 %v388_v53, 0.0  ;;  %v666_v62 = vmax.f32 %v516_v54, 0.0 }
  0xfb   :  { %695 = vst [vmem:[%s1384_s3] sm:$0xff] %v631_v57  ;;  %727 = vst [vmem:[%s1384_s3 + $0x100] sm:$0xff] %v663_v58  ;;  %v632_v63 = vmax.f32 %v380_v59, 0.0  ;;  %v664_v0 = vmax.f32 %v508_v60, 0.0 }
  0xfc   :  { %698 = vst [vmem:[%s1384_s3 + $0x18] sm:$0xff] %v634_v61  ;;  %730 = vst [vmem:[%s1384_s3 + $0x118] sm:$0xff] %v666_v62 }
  0xfd   :  { %696 = vst [vmem:[%s1384_s3 + $0x8] sm:$0xff] %v632_v63  ;;  %728 = vst [vmem:[%s1384_s3 + $0x108] sm:$0xff] %v664_v0  ;;  %v866_v1 = vpop.f32.mrb[4].mxu0  ;;  %v898_v2 = vpop.f32.mrb[4].mxu1 }
  0xfe   :  { %v401_v3 = vadd.f32 %v866_v1, %v1123_v40  ;;  %v529_v4 = vadd.f32 %v898_v2, %v1123_v40  ;;  %v392_v5 = vpop.f32.mrb[5].mxu0  ;;  %v520_v6 = vpop.f32.mrb[5].mxu1 }
  0xff   :  { %v393_v7 = vadd.f32 %v1123_v40, %v392_v5  ;;  %v521_v8 = vadd.f32 %v1123_v40, %v520_v6  ;;  %v867_v9 = vpop.f32.mrb[6].mxu0  ;;  %v899_v10 = vpop.f32.mrb[6].mxu1 }
 0x100   :  { %v637_v11 = vmax.f32 %v401_v3, 0.0  ;;  %v669_v12 = vmax.f32 %v529_v4, 0.0  ;;  %v404_v13 = vadd.f32 %v867_v9, %v1123_v40  ;;  %v532_v14 = vadd.f32 %v899_v10, %v1123_v40  ;;  %v395_v15 = vpop.f32.mrb[7].mxu0  ;;  %v523_v16 = vpop.f32.mrb[7].mxu1 }
 0x101   :  { %v635_v17 = vmax.f32 %v393_v7, 0.0  ;;  %v667_v18 = vmax.f32 %v521_v8, 0.0  ;;  %v396_v19 = vadd.f32 %v1123_v40, %v395_v15  ;;  %v524_v20 = vadd.f32 %v1123_v40, %v523_v16 }
 0x102   :  { %701 = vst [vmem:[%s1384_s3 + $0x30] sm:$0xff] %v637_v11  ;;  %733 = vst [vmem:[%s1384_s3 + $0x130] sm:$0xff] %v669_v12  ;;  %v638_v21 = vmax.f32 %v404_v13, 0.0  ;;  %v670_v22 = vmax.f32 %v532_v14, 0.0 }
 0x103   :  { %699 = vst [vmem:[%s1384_s3 + $0x20] sm:$0xff] %v635_v17  ;;  %731 = vst [vmem:[%s1384_s3 + $0x120] sm:$0xff] %v667_v18  ;;  %v636_v23 = vmax.f32 %v396_v19, 0.0  ;;  %v668_v24 = vmax.f32 %v524_v20, 0.0 }
 0x104   :  { %702 = vst [vmem:[%s1384_s3 + $0x38] sm:$0xff] %v638_v21  ;;  %734 = vst [vmem:[%s1384_s3 + $0x138] sm:$0xff] %v670_v22 }
 0x105   :  { %700 = vst [vmem:[%s1384_s3 + $0x28] sm:$0xff] %v636_v23  ;;  %732 = vst [vmem:[%s1384_s3 + $0x128] sm:$0xff] %v668_v24  ;;  %v870_v25 = vpop.f32.mrb[8].mxu0  ;;  %v902_v26 = vpop.f32.mrb[8].mxu1 }
 0x106   :  { %v417_v27 = vadd.f32 %v870_v25, %v1123_v40  ;;  %v545_v28 = vadd.f32 %v902_v26, %v1123_v40  ;;  %v408_v29 = vpop.f32.mrb[9].mxu0  ;;  %v536_v30 = vpop.f32.mrb[9].mxu1 }
 0x107   :  { %v409_v31 = vadd.f32 %v1123_v40, %v408_v29  ;;  %v537_v32 = vadd.f32 %v1123_v40, %v536_v30  ;;  %v871_v33 = vpop.f32.mrb[10].mxu0  ;;  %v903_v34 = vpop.f32.mrb[10].mxu1 }
 0x108   :  { %v641_v35 = vmax.f32 %v417_v27, 0.0  ;;  %v673_v36 = vmax.f32 %v545_v28, 0.0  ;;  %v420_v37 = vadd.f32 %v871_v33, %v1123_v40  ;;  %v548_v38 = vadd.f32 %v903_v34, %v1123_v40  ;;  %v411_v39 = vpop.f32.mrb[11].mxu0  ;;  %v539_v41 = vpop.f32.mrb[11].mxu1 }
 0x109   :  { %v639_v42 = vmax.f32 %v409_v31, 0.0  ;;  %v671_v43 = vmax.f32 %v537_v32, 0.0  ;;  %v412_v44 = vadd.f32 %v1123_v40, %v411_v39  ;;  %v540_v45 = vadd.f32 %v1123_v40, %v539_v41 }
 0x10a   :  { %705 = vst [vmem:[%s1384_s3 + $0x50] sm:$0xff] %v641_v35  ;;  %737 = vst [vmem:[%s1384_s3 + $0x150] sm:$0xff] %v673_v36  ;;  %v642_v46 = vmax.f32 %v420_v37, 0.0  ;;  %v674_v47 = vmax.f32 %v548_v38, 0.0 }
 0x10b   :  { %703 = vst [vmem:[%s1384_s3 + $0x40] sm:$0xff] %v639_v42  ;;  %735 = vst [vmem:[%s1384_s3 + $0x140] sm:$0xff] %v671_v43  ;;  %v640_v48 = vmax.f32 %v412_v44, 0.0  ;;  %v672_v49 = vmax.f32 %v540_v45, 0.0 }
 0x10c   :  { %706 = vst [vmem:[%s1384_s3 + $0x58] sm:$0xff] %v642_v46  ;;  %738 = vst [vmem:[%s1384_s3 + $0x158] sm:$0xff] %v674_v47 }
 0x10d   :  { %704 = vst [vmem:[%s1384_s3 + $0x48] sm:$0xff] %v640_v48  ;;  %736 = vst [vmem:[%s1384_s3 + $0x148] sm:$0xff] %v672_v49  ;;  %v874_v50 = vpop.f32.mrb[12].mxu0  ;;  %v906_v51 = vpop.f32.mrb[12].mxu1 }
 0x10e   :  { %v433_v52 = vadd.f32 %v874_v50, %v1123_v40  ;;  %v561_v53 = vadd.f32 %v906_v51, %v1123_v40  ;;  %v424_v54 = vpop.f32.mrb[13].mxu0  ;;  %v552_v55 = vpop.f32.mrb[13].mxu1 }
 0x10f   :  { %v425_v56 = vadd.f32 %v1123_v40, %v424_v54  ;;  %v553_v57 = vadd.f32 %v1123_v40, %v552_v55  ;;  %v875_v58 = vpop.f32.mrb[14].mxu0  ;;  %v907_v59 = vpop.f32.mrb[14].mxu1 }
 0x110   :  { %v645_v60 = vmax.f32 %v433_v52, 0.0  ;;  %v677_v61 = vmax.f32 %v561_v53, 0.0  ;;  %v436_v62 = vadd.f32 %v875_v58, %v1123_v40  ;;  %v564_v63 = vadd.f32 %v907_v59, %v1123_v40  ;;  %v427_v0 = vpop.f32.mrb[15].mxu0  ;;  %v555_v1 = vpop.f32.mrb[15].mxu1 }
 0x111   :  { %v643_v2 = vmax.f32 %v425_v56, 0.0  ;;  %v675_v3 = vmax.f32 %v553_v57, 0.0  ;;  %v428_v4 = vadd.f32 %v1123_v40, %v427_v0  ;;  %v556_v5 = vadd.f32 %v1123_v40, %v555_v1 }
 0x112   :  { %709 = vst [vmem:[%s1384_s3 + $0x70] sm:$0xff] %v645_v60  ;;  %741 = vst [vmem:[%s1384_s3 + $0x170] sm:$0xff] %v677_v61  ;;  %v646_v6 = vmax.f32 %v436_v62, 0.0  ;;  %v678_v7 = vmax.f32 %v564_v63, 0.0 }
 0x113   :  { %707 = vst [vmem:[%s1384_s3 + $0x60] sm:$0xff] %v643_v2  ;;  %739 = vst [vmem:[%s1384_s3 + $0x160] sm:$0xff] %v675_v3  ;;  %v644_v8 = vmax.f32 %v428_v4, 0.0  ;;  %v676_v9 = vmax.f32 %v556_v5, 0.0 }
 0x114   :  { %710 = vst [vmem:[%s1384_s3 + $0x78] sm:$0xff] %v646_v6  ;;  %742 = vst [vmem:[%s1384_s3 + $0x178] sm:$0xff] %v678_v7 }
 0x115   :  { %708 = vst [vmem:[%s1384_s3 + $0x68] sm:$0xff] %v644_v8  ;;  %740 = vst [vmem:[%s1384_s3 + $0x168] sm:$0xff] %v676_v9  ;;  %v878_v10 = vpop.f32.mrb[16].mxu0  ;;  %v910_v11 = vpop.f32.mrb[16].mxu1 }
 0x116   :  { %v449_v12 = vadd.f32 %v878_v10, %v1123_v40  ;;  %v577_v13 = vadd.f32 %v910_v11, %v1123_v40  ;;  %v440_v14 = vpop.f32.mrb[17].mxu0  ;;  %v568_v15 = vpop.f32.mrb[17].mxu1 }
 0x117   :  { %v441_v16 = vadd.f32 %v1123_v40, %v440_v14  ;;  %v569_v17 = vadd.f32 %v1123_v40, %v568_v15  ;;  %v879_v18 = vpop.f32.mrb[18].mxu0  ;;  %v911_v19 = vpop.f32.mrb[18].mxu1 }
 0x118   :  { %v649_v20 = vmax.f32 %v449_v12, 0.0  ;;  %v681_v21 = vmax.f32 %v577_v13, 0.0  ;;  %v452_v22 = vadd.f32 %v879_v18, %v1123_v40  ;;  %v580_v23 = vadd.f32 %v911_v19, %v1123_v40  ;;  %v443_v24 = vpop.f32.mrb[19].mxu0  ;;  %v571_v25 = vpop.f32.mrb[19].mxu1 }
 0x119   :  { %v647_v26 = vmax.f32 %v441_v16, 0.0  ;;  %v679_v27 = vmax.f32 %v569_v17, 0.0  ;;  %v444_v28 = vadd.f32 %v1123_v40, %v443_v24  ;;  %v572_v29 = vadd.f32 %v1123_v40, %v571_v25 }
 0x11a   :  { %713 = vst [vmem:[%s1384_s3 + $0x90] sm:$0xff] %v649_v20  ;;  %745 = vst [vmem:[%s1384_s3 + $0x190] sm:$0xff] %v681_v21  ;;  %v650_v30 = vmax.f32 %v452_v22, 0.0  ;;  %v682_v31 = vmax.f32 %v580_v23, 0.0 }
 0x11b   :  { %711 = vst [vmem:[%s1384_s3 + $0x80] sm:$0xff] %v647_v26  ;;  %743 = vst [vmem:[%s1384_s3 + $0x180] sm:$0xff] %v679_v27  ;;  %v648_v32 = vmax.f32 %v444_v28, 0.0  ;;  %v680_v33 = vmax.f32 %v572_v29, 0.0 }
 0x11c   :  { %714 = vst [vmem:[%s1384_s3 + $0x98] sm:$0xff] %v650_v30  ;;  %746 = vst [vmem:[%s1384_s3 + $0x198] sm:$0xff] %v682_v31 }
 0x11d   :  { %712 = vst [vmem:[%s1384_s3 + $0x88] sm:$0xff] %v648_v32  ;;  %744 = vst [vmem:[%s1384_s3 + $0x188] sm:$0xff] %v680_v33  ;;  %v882_v34 = vpop.f32.mrb[20].mxu0  ;;  %v914_v35 = vpop.f32.mrb[20].mxu1 }
 0x11e   :  { %v465_v36 = vadd.f32 %v882_v34, %v1123_v40  ;;  %v593_v37 = vadd.f32 %v914_v35, %v1123_v40  ;;  %v456_v38 = vpop.f32.mrb[21].mxu0  ;;  %v584_v39 = vpop.f32.mrb[21].mxu1 }
 0x11f   :  { %v457_v41 = vadd.f32 %v1123_v40, %v456_v38  ;;  %v585_v42 = vadd.f32 %v1123_v40, %v584_v39  ;;  %v883_v43 = vpop.f32.mrb[22].mxu0  ;;  %v915_v44 = vpop.f32.mrb[22].mxu1 }
 0x120   :  { %v653_v45 = vmax.f32 %v465_v36, 0.0  ;;  %v685_v46 = vmax.f32 %v593_v37, 0.0  ;;  %v468_v47 = vadd.f32 %v883_v43, %v1123_v40  ;;  %v596_v48 = vadd.f32 %v915_v44, %v1123_v40  ;;  %v459_v49 = vpop.f32.mrb[23].mxu0  ;;  %v587_v50 = vpop.f32.mrb[23].mxu1 }
 0x121   :  { %v651_v51 = vmax.f32 %v457_v41, 0.0  ;;  %v683_v52 = vmax.f32 %v585_v42, 0.0  ;;  %v460_v53 = vadd.f32 %v1123_v40, %v459_v49  ;;  %v588_v54 = vadd.f32 %v1123_v40, %v587_v50 }
 0x122   :  { %717 = vst [vmem:[%s1384_s3 + $0xb0] sm:$0xff] %v653_v45  ;;  %749 = vst [vmem:[%s1384_s3 + $0x1b0] sm:$0xff] %v685_v46  ;;  %v654_v55 = vmax.f32 %v468_v47, 0.0  ;;  %v686_v56 = vmax.f32 %v596_v48, 0.0 }
 0x123   :  { %715 = vst [vmem:[%s1384_s3 + $0xa0] sm:$0xff] %v651_v51  ;;  %747 = vst [vmem:[%s1384_s3 + $0x1a0] sm:$0xff] %v683_v52  ;;  %v652_v57 = vmax.f32 %v460_v53, 0.0  ;;  %v684_v58 = vmax.f32 %v588_v54, 0.0 }
 0x124   :  { %718 = vst [vmem:[%s1384_s3 + $0xb8] sm:$0xff] %v654_v55  ;;  %750 = vst [vmem:[%s1384_s3 + $0x1b8] sm:$0xff] %v686_v56 }
 0x125   :  { %716 = vst [vmem:[%s1384_s3 + $0xa8] sm:$0xff] %v652_v57  ;;  %748 = vst [vmem:[%s1384_s3 + $0x1a8] sm:$0xff] %v684_v58  ;;  %v886_v59 = vpop.f32.mrb[24].mxu0  ;;  %v918_v60 = vpop.f32.mrb[24].mxu1 }
 0x126   :  { %v481_v61 = vadd.f32 %v886_v59, %v1123_v40  ;;  %v609_v62 = vadd.f32 %v918_v60, %v1123_v40  ;;  %v472_v63 = vpop.f32.mrb[25].mxu0  ;;  %v600_v0 = vpop.f32.mrb[25].mxu1 }
 0x127   :  { %v473_v1 = vadd.f32 %v1123_v40, %v472_v63  ;;  %v601_v2 = vadd.f32 %v1123_v40, %v600_v0  ;;  %v887_v3 = vpop.f32.mrb[26].mxu0  ;;  %v919_v4 = vpop.f32.mrb[26].mxu1 }
 0x128   :  { %v657_v5 = vmax.f32 %v481_v61, 0.0  ;;  %v689_v6 = vmax.f32 %v609_v62, 0.0  ;;  %v484_v7 = vadd.f32 %v887_v3, %v1123_v40  ;;  %v612_v8 = vadd.f32 %v919_v4, %v1123_v40  ;;  %v475_v9 = vpop.f32.mrb[27].mxu0  ;;  %v603_v10 = vpop.f32.mrb[27].mxu1 }
 0x129   :  { %v655_v11 = vmax.f32 %v473_v1, 0.0  ;;  %v687_v12 = vmax.f32 %v601_v2, 0.0  ;;  %v476_v13 = vadd.f32 %v1123_v40, %v475_v9  ;;  %v604_v14 = vadd.f32 %v1123_v40, %v603_v10 }
 0x12a   :  { %721 = vst [vmem:[%s1384_s3 + $0xd0] sm:$0xff] %v657_v5  ;;  %753 = vst [vmem:[%s1384_s3 + $0x1d0] sm:$0xff] %v689_v6  ;;  %v658_v15 = vmax.f32 %v484_v7, 0.0  ;;  %v690_v16 = vmax.f32 %v612_v8, 0.0 }
 0x12b   :  { %719 = vst [vmem:[%s1384_s3 + $0xc0] sm:$0xff] %v655_v11  ;;  %751 = vst [vmem:[%s1384_s3 + $0x1c0] sm:$0xff] %v687_v12  ;;  %v656_v17 = vmax.f32 %v476_v13, 0.0  ;;  %v688_v18 = vmax.f32 %v604_v14, 0.0 }
 0x12c   :  { %722 = vst [vmem:[%s1384_s3 + $0xd8] sm:$0xff] %v658_v15  ;;  %754 = vst [vmem:[%s1384_s3 + $0x1d8] sm:$0xff] %v690_v16 }
 0x12d   :  { %720 = vst [vmem:[%s1384_s3 + $0xc8] sm:$0xff] %v656_v17  ;;  %752 = vst [vmem:[%s1384_s3 + $0x1c8] sm:$0xff] %v688_v18  ;;  %v890_v19 = vpop.f32.mrb[28].mxu0  ;;  %v922_v20 = vpop.f32.mrb[28].mxu1 }
 0x12e   :  { %v497_v21 = vadd.f32 %v890_v19, %v1123_v40  ;;  %v625_v22 = vadd.f32 %v922_v20, %v1123_v40  ;;  %v488_v23 = vpop.f32.mrb[29].mxu0  ;;  %v616_v24 = vpop.f32.mrb[29].mxu1 }
 0x12f   :  { %v489_v25 = vadd.f32 %v1123_v40, %v488_v23  ;;  %v617_v26 = vadd.f32 %v1123_v40, %v616_v24  ;;  %v891_v27 = vpop.f32.mrb[30].mxu0  ;;  %v923_v28 = vpop.f32.mrb[30].mxu1 }
 0x130   :  { %v661_v29 = vmax.f32 %v497_v21, 0.0  ;;  %v693_v30 = vmax.f32 %v625_v22, 0.0  ;;  %v500_v31 = vadd.f32 %v891_v27, %v1123_v40  ;;  %v628_v32 = vadd.f32 %v923_v28, %v1123_v40  ;;  %v491_v33 = vpop.f32.mrb[31].mxu0  ;;  %v619_v34 = vpop.f32.mrb[31].mxu1 }
 0x131   :  { %v659_v35 = vmax.f32 %v489_v25, 0.0  ;;  %v691_v36 = vmax.f32 %v617_v26, 0.0  ;;  %v492_v37 = vadd.f32 %v1123_v40, %v491_v33  ;;  %v620_v38 = vadd.f32 %v1123_v40, %v619_v34 }
 0x132   :  { %725 = vst [vmem:[%s1384_s3 + $0xf0] sm:$0xff] %v661_v29  ;;  %757 = vst [vmem:[%s1384_s3 + $0x1f0] sm:$0xff] %v693_v30  ;;  %v662_v39 = vmax.f32 %v500_v31, 0.0  ;;  %v694_v41 = vmax.f32 %v628_v32, 0.0 }
 0x133   :  { %723 = vst [vmem:[%s1384_s3 + $0xe0] sm:$0xff] %v659_v35  ;;  %755 = vst [vmem:[%s1384_s3 + $0x1e0] sm:$0xff] %v691_v36  ;;  %v660_v42 = vmax.f32 %v492_v37, 0.0  ;;  %v692_v40 = vmax.f32 %v620_v38, 0.0 }
 0x134   :  { %726 = vst [vmem:[%s1384_s3 + $0xf8] sm:$0xff] %v662_v39  ;;  %758 = vst [vmem:[%s1384_s3 + $0x1f8] sm:$0xff] %v694_v41 }
 0x135   :  { %724 = vst [vmem:[%s1384_s3 + $0xe8] sm:$0xff] %v660_v42  ;;  %756 = vst [vmem:[%s1384_s3 + $0x1e8] sm:$0xff] %v692_v40 }

// kernel: video_codec_forward.32
= control target key start
LH: loop header
LB: loop body
LE: loop exit
PB: predicated region body
PF: predicated region fallthrough
CT: control target
= control target key end

     0   :  { %v1181_v0 = vmov 0   ;;  %s1735_s1 = inlined_call_operand.vmem [shape: bf16[256,128], index: 1, kind: input, shape index: {}]   ;;  %s1736_s0 = inlined_call_operand.vmem [shape: bf16[512,256], index: 0, kind: input, shape index: {}]   ;;  %s1737_s2 = inlined_call_operand.vmem [shape: f32[1,128], index: 2, kind: input, shape index: {}]   ;;  %s1738_s3 = inlined_call_operand.vmem [shape: f32[512,128], index: 3, kind: output, shape index: {}]  }
   0x1   :  { %534 = vmatprep.subr.bf16.mxu0 %v1181_v0  ;;  %1036 = vmatprep.subr.bf16.mxu1 %v1181_v0  ;;  %v1069_v1 = vld [vmem:[%s1735_s1] sm:$0xff]   ;;  %v1070_v2 = vld [vmem:[%s1735_s1 + $0x8] sm:$0xff]   ;;  %v1071_v3 = vld [vmem:[%s1735_s1 + $0x10] sm:$0xff]  }
   0x2   :  { %535 = vmatpush1.bf16.msra.mxu0 %v1069_v1  ;;  %1052 = vmatpush1.bf16.msra.mxu1 %v1069_v1  ;;  %v1072_v4 = vld [vmem:[%s1735_s1 + $0x18] sm:$0xff]   ;;  %v1073_v5 = vld [vmem:[%s1735_s1 + $0x20] sm:$0xff]   ;;  %v1074_v7 = vld [vmem:[%s1735_s1 + $0x28] sm:$0xff]  }
   0x3   :  { %536 = vmatprep.subr.bf16.mxu0 %v1181_v0  ;;  %1037 = vmatprep.subr.bf16.mxu1 %v1181_v0  ;;  %v1087_v6 = vld [vmem:[%s1736_s0 + $0x4] ss:$8 sps:$4 sm:$0xff]   ;;  %v1075_v9 = vld [vmem:[%s1735_s1 + $0x30] sm:$0xff]   ;;  %v1076_v10 = vld [vmem:[%s1735_s1 + $0x38] sm:$0xff]  }
   0x4   :  { %v1090_v8 = vld [vmem:[%s1736_s0 + $0x104] ss:$8 sps:$4 sm:$0xff]   ;;  %566 = vmatprep.mubr.bf16.mxu0 %v1087_v6  ;;  %v1079_v13 = vld [vmem:[%s1735_s1 + $0x50] sm:$0xff]   ;;  %v1080_v14 = vld [vmem:[%s1735_s1 + $0x58] sm:$0xff]  }
   0x5   :  { %694 = vmatprep.mubr.bf16.mxu1 %v1090_v8  ;;  %v1077_v11 = vld [vmem:[%s1735_s1 + $0x40] sm:$0xff]   ;;  %v1078_v12 = vld [vmem:[%s1735_s1 + $0x48] sm:$0xff]   ;;  %v1083_v17 = vld [vmem:[%s1735_s1 + $0x70] sm:$0xff]  }
   0x6   :  { %537 = vmatpush1.bf16.msra.mxu0 %v1070_v2  ;;  %1053 = vmatpush1.bf16.msra.mxu1 %v1070_v2  ;;  %v1081_v15 = vld [vmem:[%s1735_s1 + $0x60] sm:$0xff]   ;;  %v1082_v16 = vld [vmem:[%s1735_s1 + $0x68] sm:$0xff]   ;;  %v1084_v18 = vld [vmem:[%s1735_s1 + $0x78] sm:$0xff]  }
   0x7   :  { %538 = vmatprep.subr.bf16.mxu0 %v1181_v0  ;;  %1038 = vmatprep.subr.bf16.mxu1 %v1181_v0  ;;  %v1085_v19 = vld [vmem:[%s1736_s0] ss:$8 sps:$4 sm:$0xff]   ;;  %v1091_v21 = vld [vmem:[%s1736_s0 + $0x14] ss:$8 sps:$4 sm:$0xff]   ;;  %v1095_v23 = vld [vmem:[%s1736_s0 + $0x10] ss:$8 sps:$4 sm:$0xff]  }
   0x8   :  { %v1088_v20 = vld [vmem:[%s1736_s0 + $0x100] ss:$8 sps:$4 sm:$0xff]   ;;  %v1093_v22 = vld [vmem:[%s1736_s0 + $0x114] ss:$8 sps:$4 sm:$0xff]   ;;  %v1096_v24 = vld [vmem:[%s1736_s0 + $0x110] ss:$8 sps:$4 sm:$0xff]  }
   0x9   :  { %v1097_v25 = vld [vmem:[%s1736_s0 + $0x24] ss:$8 sps:$4 sm:$0xff]   ;;  %v1101_v27 = vld [vmem:[%s1736_s0 + $0x20] ss:$8 sps:$4 sm:$0xff]   ;;  %v1103_v29 = vld [vmem:[%s1736_s0 + $0x34] ss:$8 sps:$4 sm:$0xff]  }
   0xa   :  { %539 = vmatpush1.bf16.msra.mxu0 %v1071_v3  ;;  %1054 = vmatpush1.bf16.msra.mxu1 %v1071_v3  ;;  %v1099_v26 = vld [vmem:[%s1736_s0 + $0x124] ss:$8 sps:$4 sm:$0xff]   ;;  %v1102_v28 = vld [vmem:[%s1736_s0 + $0x120] ss:$8 sps:$4 sm:$0xff]   ;;  %v1105_v30 = vld [vmem:[%s1736_s0 + $0x134] ss:$8 sps:$4 sm:$0xff]  }
   0xb   :  { %540 = vmatprep.subr.bf16.mxu0 %v1181_v0  ;;  %1039 = vmatprep.subr.bf16.mxu1 %v1181_v0  ;;  %v1107_v31 = vld [vmem:[%s1736_s0 + $0x30] ss:$8 sps:$4 sm:$0xff]   ;;  %v1109_v33 = vld [vmem:[%s1736_s0 + $0x44] ss:$8 sps:$4 sm:$0xff]   ;;  %v1113_v35 = vld [vmem:[%s1736_s0 + $0x40] ss:$8 sps:$4 sm:$0xff]  }
   0xc   :  { %v1108_v32 = vld [vmem:[%s1736_s0 + $0x130] ss:$8 sps:$4 sm:$0xff]   ;;  %v1111_v34 = vld [vmem:[%s1736_s0 + $0x144] ss:$8 sps:$4 sm:$0xff]   ;;  %v1114_v36 = vld [vmem:[%s1736_s0 + $0x140] ss:$8 sps:$4 sm:$0xff]  }
   0xd   :  { %v1115_v37 = vld [vmem:[%s1736_s0 + $0x54] ss:$8 sps:$4 sm:$0xff]   ;;  %v1119_v39 = vld [vmem:[%s1736_s0 + $0x50] ss:$8 sps:$4 sm:$0xff]   ;;  %v1121_v41 = vld [vmem:[%s1736_s0 + $0x64] ss:$8 sps:$4 sm:$0xff]  }
   0xe   :  { %541 = vmatpush1.bf16.msra.mxu0 %v1072_v4  ;;  %1055 = vmatpush1.bf16.msra.mxu1 %v1072_v4  ;;  %v1117_v38 = vld [vmem:[%s1736_s0 + $0x154] ss:$8 sps:$4 sm:$0xff]   ;;  %v1120_v40 = vld [vmem:[%s1736_s0 + $0x150] ss:$8 sps:$4 sm:$0xff]   ;;  %v1123_v42 = vld [vmem:[%s1736_s0 + $0x164] ss:$8 sps:$4 sm:$0xff]  }
   0xf   :  { %542 = vmatprep.subr.bf16.mxu0 %v1181_v0  ;;  %1040 = vmatprep.subr.bf16.mxu1 %v1181_v0  ;;  %v1125_v43 = vld [vmem:[%s1736_s0 + $0x60] ss:$8 sps:$4 sm:$0xff]   ;;  %v1127_v45 = vld [vmem:[%s1736_s0 + $0x74] ss:$8 sps:$4 sm:$0xff]   ;;  %v1131_v47 = vld [vmem:[%s1736_s0 + $0x70] ss:$8 sps:$4 sm:$0xff]  }
  0x10   :  { %v1126_v44 = vld [vmem:[%s1736_s0 + $0x160] ss:$8 sps:$4 sm:$0xff]   ;;  %v1129_v46 = vld [vmem:[%s1736_s0 + $0x174] ss:$8 sps:$4 sm:$0xff]   ;;  %v1132_v48 = vld [vmem:[%s1736_s0 + $0x170] ss:$8 sps:$4 sm:$0xff]  }
  0x11   :  { %v1133_v49 = vld [vmem:[%s1736_s0 + $0x84] ss:$8 sps:$4 sm:$0xff]   ;;  %v1137_v51 = vld [vmem:[%s1736_s0 + $0x80] ss:$8 sps:$4 sm:$0xff]   ;;  %v1139_v53 = vld [vmem:[%s1736_s0 + $0x94] ss:$8 sps:$4 sm:$0xff]  }
  0x12   :  { %543 = vmatpush1.bf16.msra.mxu0 %v1073_v5  ;;  %1056 = vmatpush1.bf16.msra.mxu1 %v1073_v5  ;;  %v1135_v50 = vld [vmem:[%s1736_s0 + $0x184] ss:$8 sps:$4 sm:$0xff]   ;;  %v1138_v52 = vld [vmem:[%s1736_s0 + $0x180] ss:$8 sps:$4 sm:$0xff]   ;;  %v1141_v54 = vld [vmem:[%s1736_s0 + $0x194] ss:$8 sps:$4 sm:$0xff]  }
  0x13   :  { %544 = vmatprep.subr.bf16.mxu0 %v1181_v0  ;;  %1041 = vmatprep.subr.bf16.mxu1 %v1181_v0  ;;  %v1143_v55 = vld [vmem:[%s1736_s0 + $0x90] ss:$8 sps:$4 sm:$0xff]   ;;  %v1145_v57 = vld [vmem:[%s1736_s0 + $0xa4] ss:$8 sps:$4 sm:$0xff]   ;;  %v1149_v59 = vld [vmem:[%s1736_s0 + $0xa0] ss:$8 sps:$4 sm:$0xff]  }
  0x14   :  { %v1144_v56 = vld [vmem:[%s1736_s0 + $0x190] ss:$8 sps:$4 sm:$0xff]   ;;  %v1147_v58 = vld [vmem:[%s1736_s0 + $0x1a4] ss:$8 sps:$4 sm:$0xff]   ;;  %v1150_v60 = vld [vmem:[%s1736_s0 + $0x1a0] ss:$8 sps:$4 sm:$0xff]  }
  0x15   :  { %v1151_v61 = vld [vmem:[%s1736_s0 + $0xb4] ss:$8 sps:$4 sm:$0xff]   ;;  %v1155_v63 = vld [vmem:[%s1736_s0 + $0xb0] ss:$8 sps:$4 sm:$0xff]   ;;  %v1157_v1 = vld [vmem:[%s1736_s0 + $0xc4] ss:$8 sps:$4 sm:$0xff]  }
  0x16   :  { %545 = vmatpush1.bf16.msra.mxu0 %v1074_v7  ;;  %1057 = vmatpush1.bf16.msra.mxu1 %v1074_v7  ;;  %v1153_v62 = vld [vmem:[%s1736_s0 + $0x1b4] ss:$8 sps:$4 sm:$0xff]   ;;  %v1159_v2 = vld [vmem:[%s1736_s0 + $0x1c4] ss:$8 sps:$4 sm:$0xff]   ;;  %v1161_v3 = vld [vmem:[%s1736_s0 + $0xc0] ss:$8 sps:$4 sm:$0xff]  }
  0x17   :  { %546 = vmatprep.subr.bf16.mxu0 %v1181_v0  ;;  %1042 = vmatprep.subr.bf16.mxu1 %v1181_v0  ;;  %v1162_v4 = vld [vmem:[%s1736_s0 + $0x1c0] ss:$8 sps:$4 sm:$0xff]   ;;  %v1163_v5 = vld [vmem:[%s1736_s0 + $0xd4] ss:$8 sps:$4 sm:$0xff]   ;;  %v1167_v7 = vld [vmem:[%s1736_s0 + $0xd0] ss:$8 sps:$4 sm:$0xff]  }
  0x18   :  { %v1165_v6 = vld [vmem:[%s1736_s0 + $0x1d4] ss:$8 sps:$4 sm:$0xff]   ;;  %v1168_v8 = vld [vmem:[%s1736_s0 + $0x1d0] ss:$8 sps:$4 sm:$0xff]  }
  0x1a   :  { %547 = vmatpush1.bf16.msra.mxu0 %v1075_v9  ;;  %1058 = vmatpush1.bf16.msra.mxu1 %v1075_v9  ;;  %v1169_v9 = vld [vmem:[%s1736_s0 + $0xe4] ss:$8 sps:$4 sm:$0xff]  }
  0x1b   :  { %548 = vmatprep.subr.bf16.mxu0 %v1181_v0  ;;  %1043 = vmatprep.subr.bf16.mxu1 %v1181_v0 }
  0x1e   :  { %549 = vmatpush1.bf16.msra.mxu0 %v1076_v10  ;;  %1059 = vmatpush1.bf16.msra.mxu1 %v1076_v10  ;;  %v1171_v10 = vld [vmem:[%s1736_s0 + $0x1e4] ss:$8 sps:$4 sm:$0xff]  }
  0x1f   :  { %550 = vmatprep.subr.bf16.mxu0 %v1181_v0  ;;  %1044 = vmatprep.subr.bf16.mxu1 %v1181_v0 }
  0x22   :  { %551 = vmatpush1.bf16.msra.mxu0 %v1077_v11  ;;  %1060 = vmatpush1.bf16.msra.mxu1 %v1077_v11  ;;  %v1173_v11 = vld [vmem:[%s1736_s0 + $0xe0] ss:$8 sps:$4 sm:$0xff]  }
  0x23   :  { %552 = vmatprep.subr.bf16.mxu0 %v1181_v0  ;;  %1045 = vmatprep.subr.bf16.mxu1 %v1181_v0 }
  0x26   :  { %553 = vmatpush1.bf16.msra.mxu0 %v1078_v12  ;;  %1061 = vmatpush1.bf16.msra.mxu1 %v1078_v12  ;;  %v1174_v12 = vld [vmem:[%s1736_s0 + $0x1e0] ss:$8 sps:$4 sm:$0xff]  }
  0x27   :  { %554 = vmatprep.subr.bf16.mxu0 %v1181_v0  ;;  %1046 = vmatprep.subr.bf16.mxu1 %v1181_v0 }
  0x2a   :  { %555 = vmatpush1.bf16.msra.mxu0 %v1079_v13  ;;  %1062 = vmatpush1.bf16.msra.mxu1 %v1079_v13  ;;  %v1175_v13 = vld [vmem:[%s1736_s0 + $0xf4] ss:$8 sps:$4 sm:$0xff]  }
  0x2b   :  { %556 = vmatprep.subr.bf16.mxu0 %v1181_v0  ;;  %1047 = vmatprep.subr.bf16.mxu1 %v1181_v0 }
  0x2e   :  { %557 = vmatpush1.bf16.msra.mxu0 %v1080_v14  ;;  %1063 = vmatpush1.bf16.msra.mxu1 %v1080_v14  ;;  %v1177_v14 = vld [vmem:[%s1736_s0 + $0x1f4] ss:$8 sps:$4 sm:$0xff]  }
  0x2f   :  { %558 = vmatprep.subr.bf16.mxu0 %v1181_v0  ;;  %1048 = vmatprep.subr.bf16.mxu1 %v1181_v0 }
  0x32   :  { %559 = vmatpush1.bf16.msra.mxu0 %v1081_v15  ;;  %1064 = vmatpush1.bf16.msra.mxu1 %v1081_v15  ;;  %v1179_v15 = vld [vmem:[%s1736_s0 + $0xf0] ss:$8 sps:$4 sm:$0xff]  }
  0x33   :  { %560 = vmatprep.subr.bf16.mxu0 %v1181_v0  ;;  %1049 = vmatprep.subr.bf16.mxu1 %v1181_v0 }
  0x36   :  { %561 = vmatpush1.bf16.msra.mxu0 %v1082_v16  ;;  %1065 = vmatpush1.bf16.msra.mxu1 %v1082_v16  ;;  %v1180_v16 = vld [vmem:[%s1736_s0 + $0x1f0] ss:$8 sps:$4 sm:$0xff]  }
  0x37   :  { %562 = vmatprep.subr.bf16.mxu0 %v1181_v0  ;;  %1050 = vmatprep.subr.bf16.mxu1 %v1181_v0 }
  0x3a   :  { %563 = vmatpush1.bf16.msra.mxu0 %v1083_v17  ;;  %1066 = vmatpush1.bf16.msra.mxu1 %v1083_v17  ;;  %v1477_v17 = vld [vmem:[%s1737_s2] ss:$0 sm:$0xff] }
  0x3b   :  { %564 = vmatprep.subr.bf16.mxu0 %v1181_v0  ;;  %1051 = vmatprep.subr.bf16.mxu1 %v1181_v0  ;;  %v1156_v0 = vld [vmem:[%s1736_s0 + $0x1b0] ss:$8 sps:$4 sm:$0xff]  }
  0x3e   :  { %565 = vmatpush1.bf16.msra.mxu0 %v1084_v18  ;;  %1067 = vmatpush1.bf16.msra.mxu1 %v1084_v18 }
  0x41   :  { %567 = vmatmul.mubr.bf16.vlgmr.msra.gmra.mrb[0].mxu0 %v1085_v19  ;;  %695 = vmatmul.mubr.bf16.vlgmr.msra.gmra.mrb[0].mxu1 %v1088_v20 }
  0x42   :  { %574 = vmatprep.mubr.bf16.mxu0 %v1091_v21  ;;  %702 = vmatprep.mubr.bf16.mxu1 %v1093_v22 }
  0x49   :  { %575 = vmatmul.mubr.bf16.gmra.mrb[4].mxu0 %v1095_v23  ;;  %703 = vmatmul.mubr.bf16.gmra.mrb[4].mxu1 %v1096_v24 }
  0x4a   :  { %582 = vmatprep.mubr.bf16.mxu0 %v1097_v25  ;;  %710 = vmatprep.mubr.bf16.mxu1 %v1099_v26 }
  0x51   :  { %583 = vmatmul.mubr.bf16.gmra.mrb[8].mxu0 %v1101_v27  ;;  %711 = vmatmul.mubr.bf16.gmra.mrb[8].mxu1 %v1102_v28 }
  0x52   :  { %590 = vmatprep.mubr.bf16.mxu0 %v1103_v29  ;;  %718 = vmatprep.mubr.bf16.mxu1 %v1105_v30 }
  0x59   :  { %591 = vmatmul.mubr.bf16.gmra.mrb[12].mxu0 %v1107_v31  ;;  %719 = vmatmul.mubr.bf16.gmra.mrb[12].mxu1 %v1108_v32 }
  0x5a   :  { %598 = vmatprep.mubr.bf16.mxu0 %v1109_v33  ;;  %726 = vmatprep.mubr.bf16.mxu1 %v1111_v34 }
  0x61   :  { %599 = vmatmul.mubr.bf16.gmra.mrb[16].mxu0 %v1113_v35  ;;  %727 = vmatmul.mubr.bf16.gmra.mrb[16].mxu1 %v1114_v36 }
  0x62   :  { %606 = vmatprep.mubr.bf16.mxu0 %v1115_v37  ;;  %734 = vmatprep.mubr.bf16.mxu1 %v1117_v38 }
  0x69   :  { %607 = vmatmul.mubr.bf16.gmra.mrb[20].mxu0 %v1119_v39  ;;  %735 = vmatmul.mubr.bf16.gmra.mrb[20].mxu1 %v1120_v40 }
  0x6a   :  { %614 = vmatprep.mubr.bf16.mxu0 %v1121_v41  ;;  %742 = vmatprep.mubr.bf16.mxu1 %v1123_v42 }
  0x71   :  { %615 = vmatmul.mubr.bf16.gmra.mrb[24].mxu0 %v1125_v43  ;;  %743 = vmatmul.mubr.bf16.gmra.mrb[24].mxu1 %v1126_v44 }
  0x72   :  { %622 = vmatprep.mubr.bf16.mxu0 %v1127_v45  ;;  %750 = vmatprep.mubr.bf16.mxu1 %v1129_v46 }
  0x79   :  { %623 = vmatmul.mubr.bf16.gmra.mrb[28].mxu0 %v1131_v47  ;;  %751 = vmatmul.mubr.bf16.gmra.mrb[28].mxu1 %v1132_v48 }
  0x7a   :  { %630 = vmatprep.mubr.bf16.mxu0 %v1133_v49  ;;  %758 = vmatprep.mubr.bf16.mxu1 %v1135_v50 }
  0x81   :  { %631 = vmatmul.mubr.bf16.gmra.mrb[32].mxu0 %v1137_v51  ;;  %759 = vmatmul.mubr.bf16.gmra.mrb[32].mxu1 %v1138_v52 }
  0x82   :  { %638 = vmatprep.mubr.bf16.mxu0 %v1139_v53  ;;  %766 = vmatprep.mubr.bf16.mxu1 %v1141_v54 }
  0x89   :  { %639 = vmatmul.mubr.bf16.gmra.mrb[36].mxu0 %v1143_v55  ;;  %767 = vmatmul.mubr.bf16.gmra.mrb[36].mxu1 %v1144_v56 }
  0x8a   :  { %646 = vmatprep.mubr.bf16.mxu0 %v1145_v57  ;;  %774 = vmatprep.mubr.bf16.mxu1 %v1147_v58 }
  0x91   :  { %647 = vmatmul.mubr.bf16.gmra.mrb[40].mxu0 %v1149_v59  ;;  %775 = vmatmul.mubr.bf16.gmra.mrb[40].mxu1 %v1150_v60 }
  0x92   :  { %654 = vmatprep.mubr.bf16.mxu0 %v1151_v61  ;;  %782 = vmatprep.mubr.bf16.mxu1 %v1153_v62 }
  0x99   :  { %655 = vmatmul.mubr.bf16.gmra.mrb[44].mxu0 %v1155_v63  ;;  %783 = vmatmul.mubr.bf16.gmra.mrb[44].mxu1 %v1156_v0 }
  0x9a   :  { %662 = vmatprep.mubr.bf16.mxu0 %v1157_v1  ;;  %790 = vmatprep.mubr.bf16.mxu1 %v1159_v2 }
  0xa1   :  { %663 = vmatmul.mubr.bf16.gmra.mrb[48].mxu0 %v1161_v3  ;;  %791 = vmatmul.mubr.bf16.gmra.mrb[48].mxu1 %v1162_v4 }
  0xa2   :  { %670 = vmatprep.mubr.bf16.mxu0 %v1163_v5  ;;  %798 = vmatprep.mubr.bf16.mxu1 %v1165_v6 }
  0xa9   :  { %671 = vmatmul.mubr.bf16.gmra.mrb[52].mxu0 %v1167_v7  ;;  %799 = vmatmul.mubr.bf16.gmra.mrb[52].mxu1 %v1168_v8 }
  0xaa   :  { %678 = vmatprep.mubr.bf16.mxu0 %v1169_v9  ;;  %806 = vmatprep.mubr.bf16.mxu1 %v1171_v10 }
  0xb1   :  { %679 = vmatmul.mubr.bf16.gmra.mrb[56].mxu0 %v1173_v11  ;;  %807 = vmatmul.mubr.bf16.gmra.mrb[56].mxu1 %v1174_v12 }
  0xb2   :  { %686 = vmatprep.mubr.bf16.mxu0 %v1175_v13  ;;  %814 = vmatprep.mubr.bf16.mxu1 %v1177_v14 }
  0xb9   :  { %687 = vmatmul.mubr.bf16.gmra.mrb[60].mxu0 %v1179_v15  ;;  %815 = vmatmul.mubr.bf16.gmra.mrb[60].mxu1 %v1180_v16 }
 0x114   :  { %v568_v18 = vpop.f32.mrb[0].mxu0  ;;  %v696_v19 = vpop.f32.mrb[0].mxu1 }
 0x115   :  { %v569_v20 = vadd.f32 %v1477_v17, %v568_v18  ;;  %v697_v21 = vadd.f32 %v1477_v17, %v696_v19  ;;  %v570_v22 = vpop.f32.mrb[1].mxu0  ;;  %v698_v23 = vpop.f32.mrb[1].mxu1 }
 0x116   :  { %v571_v24 = vpop.f32.mrb[2].mxu0  ;;  %v699_v25 = vpop.f32.mrb[2].mxu1 }
 0x117   :  { %v823_v26 = vmax.f32 %v569_v20, 0.0  ;;  %v855_v27 = vmax.f32 %v697_v21, 0.0  ;;  %v572_v28 = vadd.f32 %v1477_v17, %v571_v24  ;;  %v700_v29 = vadd.f32 %v1477_v17, %v699_v25  ;;  %v573_v30 = vpop.f32.mrb[3].mxu0  ;;  %v701_v31 = vpop.f32.mrb[3].mxu1 }
 0x119   :  { %887 = vst [vmem:[%s1738_s3] sm:$0xff] %v823_v26  ;;  %919 = vst [vmem:[%s1738_s3 + $0x100] sm:$0xff] %v855_v27  ;;  %v824_v32 = vmax.f32 %v572_v28, 0.0  ;;  %v856_v33 = vmax.f32 %v700_v29, 0.0 }
 0x11b   :  { %888 = vst [vmem:[%s1738_s3 + $0x8] sm:$0xff] %v824_v32  ;;  %920 = vst [vmem:[%s1738_s3 + $0x108] sm:$0xff] %v856_v33 }
 0x11c   :  { %v576_v34 = vpop.f32.mrb[4].mxu0  ;;  %v704_v35 = vpop.f32.mrb[4].mxu1 }
 0x11d   :  { %v577_v36 = vadd.f32 %v1477_v17, %v576_v34  ;;  %v705_v37 = vadd.f32 %v1477_v17, %v704_v35  ;;  %v578_v38 = vpop.f32.mrb[5].mxu0  ;;  %v706_v39 = vpop.f32.mrb[5].mxu1 }
 0x11e   :  { %v579_v40 = vpop.f32.mrb[6].mxu0  ;;  %v707_v41 = vpop.f32.mrb[6].mxu1 }
 0x11f   :  { %v825_v42 = vmax.f32 %v577_v36, 0.0  ;;  %v857_v43 = vmax.f32 %v705_v37, 0.0  ;;  %v580_v44 = vadd.f32 %v1477_v17, %v579_v40  ;;  %v708_v45 = vadd.f32 %v1477_v17, %v707_v41  ;;  %v581_v46 = vpop.f32.mrb[7].mxu0  ;;  %v709_v47 = vpop.f32.mrb[7].mxu1 }
 0x121   :  { %889 = vst [vmem:[%s1738_s3 + $0x10] sm:$0xff] %v825_v42  ;;  %921 = vst [vmem:[%s1738_s3 + $0x110] sm:$0xff] %v857_v43  ;;  %v826_v48 = vmax.f32 %v580_v44, 0.0  ;;  %v858_v49 = vmax.f32 %v708_v45, 0.0 }
 0x123   :  { %890 = vst [vmem:[%s1738_s3 + $0x18] sm:$0xff] %v826_v48  ;;  %922 = vst [vmem:[%s1738_s3 + $0x118] sm:$0xff] %v858_v49 }
 0x124   :  { %v584_v50 = vpop.f32.mrb[8].mxu0  ;;  %v712_v51 = vpop.f32.mrb[8].mxu1 }
 0x125   :  { %v585_v52 = vadd.f32 %v1477_v17, %v584_v50  ;;  %v713_v53 = vadd.f32 %v1477_v17, %v712_v51  ;;  %v586_v54 = vpop.f32.mrb[9].mxu0  ;;  %v714_v55 = vpop.f32.mrb[9].mxu1 }
 0x126   :  { %v587_v56 = vpop.f32.mrb[10].mxu0  ;;  %v715_v57 = vpop.f32.mrb[10].mxu1 }
 0x127   :  { %v827_v58 = vmax.f32 %v585_v52, 0.0  ;;  %v859_v59 = vmax.f32 %v713_v53, 0.0  ;;  %v588_v60 = vadd.f32 %v1477_v17, %v587_v56  ;;  %v716_v61 = vadd.f32 %v1477_v17, %v715_v57  ;;  %v589_v62 = vpop.f32.mrb[11].mxu0  ;;  %v717_v63 = vpop.f32.mrb[11].mxu1 }
 0x129   :  { %891 = vst [vmem:[%s1738_s3 + $0x20] sm:$0xff] %v827_v58  ;;  %923 = vst [vmem:[%s1738_s3 + $0x120] sm:$0xff] %v859_v59  ;;  %v828_v0 = vmax.f32 %v588_v60, 0.0  ;;  %v860_v1 = vmax.f32 %v716_v61, 0.0 }
 0x12b   :  { %892 = vst [vmem:[%s1738_s3 + $0x28] sm:$0xff] %v828_v0  ;;  %924 = vst [vmem:[%s1738_s3 + $0x128] sm:$0xff] %v860_v1 }
 0x12c   :  { %v592_v2 = vpop.f32.mrb[12].mxu0  ;;  %v720_v3 = vpop.f32.mrb[12].mxu1 }
 0x12d   :  { %v593_v4 = vadd.f32 %v1477_v17, %v592_v2  ;;  %v721_v5 = vadd.f32 %v1477_v17, %v720_v3  ;;  %v594_v6 = vpop.f32.mrb[13].mxu0  ;;  %v722_v7 = vpop.f32.mrb[13].mxu1 }
 0x12e   :  { %v595_v8 = vpop.f32.mrb[14].mxu0  ;;  %v723_v9 = vpop.f32.mrb[14].mxu1 }
 0x12f   :  { %v829_v10 = vmax.f32 %v593_v4, 0.0  ;;  %v861_v11 = vmax.f32 %v721_v5, 0.0  ;;  %v596_v12 = vadd.f32 %v1477_v17, %v595_v8  ;;  %v724_v13 = vadd.f32 %v1477_v17, %v723_v9  ;;  %v597_v14 = vpop.f32.mrb[15].mxu0  ;;  %v725_v15 = vpop.f32.mrb[15].mxu1 }
 0x131   :  { %893 = vst [vmem:[%s1738_s3 + $0x30] sm:$0xff] %v829_v10  ;;  %925 = vst [vmem:[%s1738_s3 + $0x130] sm:$0xff] %v861_v11  ;;  %v830_v16 = vmax.f32 %v596_v12, 0.0  ;;  %v862_v18 = vmax.f32 %v724_v13, 0.0 }
 0x133   :  { %894 = vst [vmem:[%s1738_s3 + $0x38] sm:$0xff] %v830_v16  ;;  %926 = vst [vmem:[%s1738_s3 + $0x138] sm:$0xff] %v862_v18 }
 0x134   :  { %v600_v19 = vpop.f32.mrb[16].mxu0  ;;  %v728_v20 = vpop.f32.mrb[16].mxu1 }
 0x135   :  { %v601_v21 = vadd.f32 %v1477_v17, %v600_v19  ;;  %v729_v22 = vadd.f32 %v1477_v17, %v728_v20  ;;  %v602_v23 = vpop.f32.mrb[17].mxu0  ;;  %v730_v24 = vpop.f32.mrb[17].mxu1 }
 0x136   :  { %v603_v25 = vpop.f32.mrb[18].mxu0  ;;  %v731_v26 = vpop.f32.mrb[18].mxu1 }
 0x137   :  { %v831_v27 = vmax.f32 %v601_v21, 0.0  ;;  %v863_v28 = vmax.f32 %v729_v22, 0.0  ;;  %v604_v29 = vadd.f32 %v1477_v17, %v603_v25  ;;  %v732_v30 = vadd.f32 %v1477_v17, %v731_v26  ;;  %v605_v31 = vpop.f32.mrb[19].mxu0  ;;  %v733_v32 = vpop.f32.mrb[19].mxu1 }
 0x139   :  { %895 = vst [vmem:[%s1738_s3 + $0x40] sm:$0xff] %v831_v27  ;;  %927 = vst [vmem:[%s1738_s3 + $0x140] sm:$0xff] %v863_v28  ;;  %v832_v33 = vmax.f32 %v604_v29, 0.0  ;;  %v864_v34 = vmax.f32 %v732_v30, 0.0 }
 0x13b   :  { %896 = vst [vmem:[%s1738_s3 + $0x48] sm:$0xff] %v832_v33  ;;  %928 = vst [vmem:[%s1738_s3 + $0x148] sm:$0xff] %v864_v34 }
 0x13c   :  { %v608_v35 = vpop.f32.mrb[20].mxu0  ;;  %v736_v36 = vpop.f32.mrb[20].mxu1 }
 0x13d   :  { %v609_v37 = vadd.f32 %v1477_v17, %v608_v35  ;;  %v737_v38 = vadd.f32 %v1477_v17, %v736_v36  ;;  %v610_v39 = vpop.f32.mrb[21].mxu0  ;;  %v738_v40 = vpop.f32.mrb[21].mxu1 }
 0x13e   :  { %v611_v41 = vpop.f32.mrb[22].mxu0  ;;  %v739_v42 = vpop.f32.mrb[22].mxu1 }
 0x13f   :  { %v833_v43 = vmax.f32 %v609_v37, 0.0  ;;  %v865_v44 = vmax.f32 %v737_v38, 0.0  ;;  %v612_v45 = vadd.f32 %v1477_v17, %v611_v41  ;;  %v740_v46 = vadd.f32 %v1477_v17, %v739_v42  ;;  %v613_v47 = vpop.f32.mrb[23].mxu0  ;;  %v741_v48 = vpop.f32.mrb[23].mxu1 }
 0x141   :  { %897 = vst [vmem:[%s1738_s3 + $0x50] sm:$0xff] %v833_v43  ;;  %929 = vst [vmem:[%s1738_s3 + $0x150] sm:$0xff] %v865_v44  ;;  %v834_v49 = vmax.f32 %v612_v45, 0.0  ;;  %v866_v50 = vmax.f32 %v740_v46, 0.0 }
 0x143   :  { %898 = vst [vmem:[%s1738_s3 + $0x58] sm:$0xff] %v834_v49  ;;  %930 = vst [vmem:[%s1738_s3 + $0x158] sm:$0xff] %v866_v50 }
 0x144   :  { %v616_v51 = vpop.f32.mrb[24].mxu0  ;;  %v744_v52 = vpop.f32.mrb[24].mxu1 }
 0x145   :  { %v617_v53 = vadd.f32 %v1477_v17, %v616_v51  ;;  %v745_v54 = vadd.f32 %v1477_v17, %v744_v52  ;;  %v618_v55 = vpop.f32.mrb[25].mxu0  ;;  %v746_v56 = vpop.f32.mrb[25].mxu1 }
 0x146   :  { %v619_v57 = vpop.f32.mrb[26].mxu0  ;;  %v747_v58 = vpop.f32.mrb[26].mxu1 }
 0x147   :  { %v835_v59 = vmax.f32 %v617_v53, 0.0  ;;  %v867_v60 = vmax.f32 %v745_v54, 0.0  ;;  %v620_v61 = vadd.f32 %v1477_v17, %v619_v57  ;;  %v748_v62 = vadd.f32 %v1477_v17, %v747_v58  ;;  %v621_v63 = vpop.f32.mrb[27].mxu0  ;;  %v749_v0 = vpop.f32.mrb[27].mxu1 }
 0x149   :  { %899 = vst [vmem:[%s1738_s3 + $0x60] sm:$0xff] %v835_v59  ;;  %931 = vst [vmem:[%s1738_s3 + $0x160] sm:$0xff] %v867_v60  ;;  %v836_v1 = vmax.f32 %v620_v61, 0.0  ;;  %v868_v2 = vmax.f32 %v748_v62, 0.0 }
 0x14b   :  { %900 = vst [vmem:[%s1738_s3 + $0x68] sm:$0xff] %v836_v1  ;;  %932 = vst [vmem:[%s1738_s3 + $0x168] sm:$0xff] %v868_v2 }
 0x14c   :  { %v624_v3 = vpop.f32.mrb[28].mxu0  ;;  %v752_v4 = vpop.f32.mrb[28].mxu1 }
 0x14d   :  { %v625_v5 = vadd.f32 %v1477_v17, %v624_v3  ;;  %v753_v6 = vadd.f32 %v1477_v17, %v752_v4  ;;  %v626_v7 = vpop.f32.mrb[29].mxu0  ;;  %v754_v8 = vpop.f32.mrb[29].mxu1 }
 0x14e   :  { %v627_v9 = vpop.f32.mrb[30].mxu0  ;;  %v755_v10 = vpop.f32.mrb[30].mxu1 }
 0x14f   :  { %v837_v11 = vmax.f32 %v625_v5, 0.0  ;;  %v869_v12 = vmax.f32 %v753_v6, 0.0  ;;  %v628_v13 = vadd.f32 %v1477_v17, %v627_v9  ;;  %v756_v14 = vadd.f32 %v1477_v17, %v755_v10  ;;  %v629_v15 = vpop.f32.mrb[31].mxu0  ;;  %v757_v16 = vpop.f32.mrb[31].mxu1 }
 0x151   :  { %901 = vst [vmem:[%s1738_s3 + $0x70] sm:$0xff] %v837_v11  ;;  %933 = vst [vmem:[%s1738_s3 + $0x170] sm:$0xff] %v869_v12  ;;  %v838_v18 = vmax.f32 %v628_v13, 0.0  ;;  %v870_v19 = vmax.f32 %v756_v14, 0.0 }
 0x153   :  { %902 = vst [vmem:[%s1738_s3 + $0x78] sm:$0xff] %v838_v18  ;;  %934 = vst [vmem:[%s1738_s3 + $0x178] sm:$0xff] %v870_v19 }
 0x154   :  { %v632_v20 = vpop.f32.mrb[32].mxu0  ;;  %v760_v21 = vpop.f32.mrb[32].mxu1 }
 0x155   :  { %v633_v22 = vadd.f32 %v1477_v17, %v632_v20  ;;  %v761_v23 = vadd.f32 %v1477_v17, %v760_v21  ;;  %v634_v24 = vpop.f32.mrb[33].mxu0  ;;  %v762_v25 = vpop.f32.mrb[33].mxu1 }
 0x156   :  { %v635_v26 = vpop.f32.mrb[34].mxu0  ;;  %v763_v27 = vpop.f32.mrb[34].mxu1 }
 0x157   :  { %v839_v28 = vmax.f32 %v633_v22, 0.0  ;;  %v871_v29 = vmax.f32 %v761_v23, 0.0  ;;  %v636_v30 = vadd.f32 %v1477_v17, %v635_v26  ;;  %v764_v31 = vadd.f32 %v1477_v17, %v763_v27  ;;  %v637_v32 = vpop.f32.mrb[35].mxu0  ;;  %v765_v33 = vpop.f32.mrb[35].mxu1 }
 0x159   :  { %903 = vst [vmem:[%s1738_s3 + $0x80] sm:$0xff] %v839_v28  ;;  %935 = vst [vmem:[%s1738_s3 + $0x180] sm:$0xff] %v871_v29  ;;  %v840_v34 = vmax.f32 %v636_v30, 0.0  ;;  %v872_v35 = vmax.f32 %v764_v31, 0.0 }
 0x15b   :  { %904 = vst [vmem:[%s1738_s3 + $0x88] sm:$0xff] %v840_v34  ;;  %936 = vst [vmem:[%s1738_s3 + $0x188] sm:$0xff] %v872_v35 }
 0x15c   :  { %v640_v36 = vpop.f32.mrb[36].mxu0  ;;  %v768_v37 = vpop.f32.mrb[36].mxu1 }
 0x15d   :  { %v641_v38 = vadd.f32 %v1477_v17, %v640_v36  ;;  %v769_v39 = vadd.f32 %v1477_v17, %v768_v37  ;;  %v642_v40 = vpop.f32.mrb[37].mxu0  ;;  %v770_v41 = vpop.f32.mrb[37].mxu1 }
 0x15e   :  { %v643_v42 = vpop.f32.mrb[38].mxu0  ;;  %v771_v43 = vpop.f32.mrb[38].mxu1 }
 0x15f   :  { %v841_v44 = vmax.f32 %v641_v38, 0.0  ;;  %v873_v45 = vmax.f32 %v769_v39, 0.0  ;;  %v644_v46 = vadd.f32 %v1477_v17, %v643_v42  ;;  %v772_v47 = vadd.f32 %v1477_v17, %v771_v43  ;;  %v645_v48 = vpop.f32.mrb[39].mxu0  ;;  %v773_v49 = vpop.f32.mrb[39].mxu1 }
 0x161   :  { %905 = vst [vmem:[%s1738_s3 + $0x90] sm:$0xff] %v841_v44  ;;  %937 = vst [vmem:[%s1738_s3 + $0x190] sm:$0xff] %v873_v45  ;;  %v842_v50 = vmax.f32 %v644_v46, 0.0  ;;  %v874_v51 = vmax.f32 %v772_v47, 0.0 }
 0x163   :  { %906 = vst [vmem:[%s1738_s3 + $0x98] sm:$0xff] %v842_v50  ;;  %938 = vst [vmem:[%s1738_s3 + $0x198] sm:$0xff] %v874_v51 }
 0x164   :  { %v648_v52 = vpop.f32.mrb[40].mxu0  ;;  %v776_v53 = vpop.f32.mrb[40].mxu1 }
 0x165   :  { %v649_v54 = vadd.f32 %v1477_v17, %v648_v52  ;;  %v777_v55 = vadd.f32 %v1477_v17, %v776_v53  ;;  %v650_v56 = vpop.f32.mrb[41].mxu0  ;;  %v778_v57 = vpop.f32.mrb[41].mxu1 }
 0x166   :  { %v651_v58 = vpop.f32.mrb[42].mxu0  ;;  %v779_v59 = vpop.f32.mrb[42].mxu1 }
 0x167   :  { %v843_v60 = vmax.f32 %v649_v54, 0.0  ;;  %v875_v61 = vmax.f32 %v777_v55, 0.0  ;;  %v652_v62 = vadd.f32 %v1477_v17, %v651_v58  ;;  %v780_v63 = vadd.f32 %v1477_v17, %v779_v59  ;;  %v653_v0 = vpop.f32.mrb[43].mxu0  ;;  %v781_v1 = vpop.f32.mrb[43].mxu1 }
 0x169   :  { %907 = vst [vmem:[%s1738_s3 + $0xa0] sm:$0xff] %v843_v60  ;;  %939 = vst [vmem:[%s1738_s3 + $0x1a0] sm:$0xff] %v875_v61  ;;  %v844_v2 = vmax.f32 %v652_v62, 0.0  ;;  %v876_v3 = vmax.f32 %v780_v63, 0.0 }
 0x16b   :  { %908 = vst [vmem:[%s1738_s3 + $0xa8] sm:$0xff] %v844_v2  ;;  %940 = vst [vmem:[%s1738_s3 + $0x1a8] sm:$0xff] %v876_v3 }
 0x16c   :  { %v656_v4 = vpop.f32.mrb[44].mxu0  ;;  %v784_v5 = vpop.f32.mrb[44].mxu1 }
 0x16d   :  { %v657_v6 = vadd.f32 %v1477_v17, %v656_v4  ;;  %v785_v7 = vadd.f32 %v1477_v17, %v784_v5  ;;  %v658_v8 = vpop.f32.mrb[45].mxu0  ;;  %v786_v9 = vpop.f32.mrb[45].mxu1 }
 0x16e   :  { %v659_v10 = vpop.f32.mrb[46].mxu0  ;;  %v787_v11 = vpop.f32.mrb[46].mxu1 }
 0x16f   :  { %v845_v12 = vmax.f32 %v657_v6, 0.0  ;;  %v877_v13 = vmax.f32 %v785_v7, 0.0  ;;  %v660_v14 = vadd.f32 %v1477_v17, %v659_v10  ;;  %v788_v15 = vadd.f32 %v1477_v17, %v787_v11  ;;  %v661_v16 = vpop.f32.mrb[47].mxu0  ;;  %v789_v18 = vpop.f32.mrb[47].mxu1 }
 0x171   :  { %909 = vst [vmem:[%s1738_s3 + $0xb0] sm:$0xff] %v845_v12  ;;  %941 = vst [vmem:[%s1738_s3 + $0x1b0] sm:$0xff] %v877_v13  ;;  %v846_v19 = vmax.f32 %v660_v14, 0.0  ;;  %v878_v20 = vmax.f32 %v788_v15, 0.0 }
 0x173   :  { %910 = vst [vmem:[%s1738_s3 + $0xb8] sm:$0xff] %v846_v19  ;;  %942 = vst [vmem:[%s1738_s3 + $0x1b8] sm:$0xff] %v878_v20 }
 0x174   :  { %v664_v21 = vpop.f32.mrb[48].mxu0  ;;  %v792_v22 = vpop.f32.mrb[48].mxu1 }
 0x175   :  { %v665_v23 = vadd.f32 %v1477_v17, %v664_v21  ;;  %v793_v24 = vadd.f32 %v1477_v17, %v792_v22  ;;  %v666_v25 = vpop.f32.mrb[49].mxu0  ;;  %v794_v26 = vpop.f32.mrb[49].mxu1 }
 0x176   :  { %v667_v27 = vpop.f32.mrb[50].mxu0  ;;  %v795_v28 = vpop.f32.mrb[50].mxu1 }
 0x177   :  { %v847_v29 = vmax.f32 %v665_v23, 0.0  ;;  %v879_v30 = vmax.f32 %v793_v24, 0.0  ;;  %v668_v31 = vadd.f32 %v1477_v17, %v667_v27  ;;  %v796_v32 = vadd.f32 %v1477_v17, %v795_v28  ;;  %v669_v33 = vpop.f32.mrb[51].mxu0  ;;  %v797_v34 = vpop.f32.mrb[51].mxu1 }
 0x179   :  { %911 = vst [vmem:[%s1738_s3 + $0xc0] sm:$0xff] %v847_v29  ;;  %943 = vst [vmem:[%s1738_s3 + $0x1c0] sm:$0xff] %v879_v30  ;;  %v848_v35 = vmax.f32 %v668_v31, 0.0  ;;  %v880_v36 = vmax.f32 %v796_v32, 0.0 }
 0x17b   :  { %912 = vst [vmem:[%s1738_s3 + $0xc8] sm:$0xff] %v848_v35  ;;  %944 = vst [vmem:[%s1738_s3 + $0x1c8] sm:$0xff] %v880_v36 }
 0x17c   :  { %v672_v37 = vpop.f32.mrb[52].mxu0  ;;  %v800_v38 = vpop.f32.mrb[52].mxu1 }
 0x17d   :  { %v673_v39 = vadd.f32 %v1477_v17, %v672_v37  ;;  %v801_v40 = vadd.f32 %v1477_v17, %v800_v38  ;;  %v674_v41 = vpop.f32.mrb[53].mxu0  ;;  %v802_v42 = vpop.f32.mrb[53].mxu1 }
 0x17e   :  { %v675_v43 = vpop.f32.mrb[54].mxu0  ;;  %v803_v44 = vpop.f32.mrb[54].mxu1 }
 0x17f   :  { %v849_v45 = vmax.f32 %v673_v39, 0.0  ;;  %v881_v46 = vmax.f32 %v801_v40, 0.0  ;;  %v676_v47 = vadd.f32 %v1477_v17, %v675_v43  ;;  %v804_v48 = vadd.f32 %v1477_v17, %v803_v44  ;;  %v677_v49 = vpop.f32.mrb[55].mxu0  ;;  %v805_v50 = vpop.f32.mrb[55].mxu1 }
 0x181   :  { %913 = vst [vmem:[%s1738_s3 + $0xd0] sm:$0xff] %v849_v45  ;;  %945 = vst [vmem:[%s1738_s3 + $0x1d0] sm:$0xff] %v881_v46  ;;  %v850_v51 = vmax.f32 %v676_v47, 0.0  ;;  %v882_v52 = vmax.f32 %v804_v48, 0.0 }
 0x183   :  { %914 = vst [vmem:[%s1738_s3 + $0xd8] sm:$0xff] %v850_v51  ;;  %946 = vst [vmem:[%s1738_s3 + $0x1d8] sm:$0xff] %v882_v52 }
 0x184   :  { %v680_v53 = vpop.f32.mrb[56].mxu0  ;;  %v808_v54 = vpop.f32.mrb[56].mxu1 }
 0x185   :  { %v681_v55 = vadd.f32 %v1477_v17, %v680_v53  ;;  %v809_v56 = vadd.f32 %v1477_v17, %v808_v54  ;;  %v682_v57 = vpop.f32.mrb[57].mxu0  ;;  %v810_v58 = vpop.f32.mrb[57].mxu1 }
 0x186   :  { %v683_v59 = vpop.f32.mrb[58].mxu0  ;;  %v811_v60 = vpop.f32.mrb[58].mxu1 }
 0x187   :  { %v851_v61 = vmax.f32 %v681_v55, 0.0  ;;  %v883_v62 = vmax.f32 %v809_v56, 0.0  ;;  %v684_v63 = vadd.f32 %v1477_v17, %v683_v59  ;;  %v812_v0 = vadd.f32 %v1477_v17, %v811_v60  ;;  %v685_v1 = vpop.f32.mrb[59].mxu0  ;;  %v813_v2 = vpop.f32.mrb[59].mxu1 }
 0x189   :  { %915 = vst [vmem:[%s1738_s3 + $0xe0] sm:$0xff] %v851_v61  ;;  %947 = vst [vmem:[%s1738_s3 + $0x1e0] sm:$0xff] %v883_v62  ;;  %v852_v3 = vmax.f32 %v684_v63, 0.0  ;;  %v884_v4 = vmax.f32 %v812_v0, 0.0 }
 0x18b   :  { %916 = vst [vmem:[%s1738_s3 + $0xe8] sm:$0xff] %v852_v3  ;;  %948 = vst [vmem:[%s1738_s3 + $0x1e8] sm:$0xff] %v884_v4 }
 0x18c   :  { %v688_v5 = vpop.f32.mrb[60].mxu0  ;;  %v816_v6 = vpop.f32.mrb[60].mxu1 }
 0x18d   :  { %v689_v7 = vadd.f32 %v1477_v17, %v688_v5  ;;  %v817_v8 = vadd.f32 %v1477_v17, %v816_v6  ;;  %v690_v9 = vpop.f32.mrb[61].mxu0  ;;  %v818_v10 = vpop.f32.mrb[61].mxu1 }
 0x18e   :  { %v691_v11 = vpop.f32.mrb[62].mxu0  ;;  %v819_v12 = vpop.f32.mrb[62].mxu1 }
 0x18f   :  { %v853_v13 = vmax.f32 %v689_v7, 0.0  ;;  %v885_v14 = vmax.f32 %v817_v8, 0.0  ;;  %v692_v15 = vadd.f32 %v1477_v17, %v691_v11  ;;  %v820_v16 = vadd.f32 %v1477_v17, %v819_v12  ;;  %v693_v18 = vpop.f32.mrb[63].mxu0  ;;  %v821_v19 = vpop.f32.mrb[63].mxu1 }
 0x191   :  { %917 = vst [vmem:[%s1738_s3 + $0xf0] sm:$0xff] %v853_v13  ;;  %949 = vst [vmem:[%s1738_s3 + $0x1f0] sm:$0xff] %v885_v14  ;;  %v854_v20 = vmax.f32 %v692_v15, 0.0  ;;  %v886_v21 = vmax.f32 %v820_v16, 0.0 }
 0x193   :  { %918 = vst [vmem:[%s1738_s3 + $0xf8] sm:$0xff] %v854_v20  ;;  %950 = vst [vmem:[%s1738_s3 + $0x1f8] sm:$0xff] %v886_v21 }

// kernel: video_codec_forward.33
= control target key start
LH: loop header
LB: loop body
LE: loop exit
PB: predicated region body
PF: predicated region fallthrough
CT: control target
= control target key end

     0   :  { %v1117_v0 = vmov 0   ;;  %s1671_s1 = inlined_call_operand.vmem [shape: bf16[256,128], index: 1, kind: input, shape index: {}]   ;;  %s1672_s0 = inlined_call_operand.vmem [shape: bf16[512,256], index: 0, kind: input, shape index: {}]   ;;  %s1673_s2 = inlined_call_operand.vmem [shape: f32[1,128], index: 2, kind: input, shape index: {}]   ;;  %s1674_s3 = inlined_call_operand.vmem [shape: f32[512,128], index: 3, kind: output, shape index: {}]  }
   0x1   :  { %534 = vmatprep.subr.bf16.mxu0 %v1117_v0  ;;  %972 = vmatprep.subr.bf16.mxu1 %v1117_v0  ;;  %v1005_v1 = vld [vmem:[%s1671_s1] sm:$0xff]   ;;  %v1006_v2 = vld [vmem:[%s1671_s1 + $0x8] sm:$0xff]   ;;  %v1007_v3 = vld [vmem:[%s1671_s1 + $0x10] sm:$0xff]  }
   0x2   :  { %535 = vmatpush1.bf16.msra.mxu0 %v1005_v1  ;;  %988 = vmatpush1.bf16.msra.mxu1 %v1005_v1  ;;  %v1008_v4 = vld [vmem:[%s1671_s1 + $0x18] sm:$0xff]   ;;  %v1009_v5 = vld [vmem:[%s1671_s1 + $0x20] sm:$0xff]   ;;  %v1010_v7 = vld [vmem:[%s1671_s1 + $0x28] sm:$0xff]  }
   0x3   :  { %536 = vmatprep.subr.bf16.mxu0 %v1117_v0  ;;  %973 = vmatprep.subr.bf16.mxu1 %v1117_v0  ;;  %v1023_v6 = vld [vmem:[%s1672_s0 + $0x4] ss:$8 sps:$4 sm:$0xff]   ;;  %v1011_v9 = vld [vmem:[%s1671_s1 + $0x30] sm:$0xff]   ;;  %v1012_v10 = vld [vmem:[%s1671_s1 + $0x38] sm:$0xff]  }
   0x4   :  { %v1026_v8 = vld [vmem:[%s1672_s0 + $0x104] ss:$8 sps:$4 sm:$0xff]   ;;  %566 = vmatprep.mubr.bf16.mxu0 %v1023_v6  ;;  %v1015_v13 = vld [vmem:[%s1671_s1 + $0x50] sm:$0xff]   ;;  %v1016_v14 = vld [vmem:[%s1671_s1 + $0x58] sm:$0xff]  }
   0x5   :  { %694 = vmatprep.mubr.bf16.mxu1 %v1026_v8  ;;  %v1013_v11 = vld [vmem:[%s1671_s1 + $0x40] sm:$0xff]   ;;  %v1014_v12 = vld [vmem:[%s1671_s1 + $0x48] sm:$0xff]   ;;  %v1019_v17 = vld [vmem:[%s1671_s1 + $0x70] sm:$0xff]  }
   0x6   :  { %537 = vmatpush1.bf16.msra.mxu0 %v1006_v2  ;;  %989 = vmatpush1.bf16.msra.mxu1 %v1006_v2  ;;  %v1017_v15 = vld [vmem:[%s1671_s1 + $0x60] sm:$0xff]   ;;  %v1018_v16 = vld [vmem:[%s1671_s1 + $0x68] sm:$0xff]   ;;  %v1020_v18 = vld [vmem:[%s1671_s1 + $0x78] sm:$0xff]  }
   0x7   :  { %538 = vmatprep.subr.bf16.mxu0 %v1117_v0  ;;  %974 = vmatprep.subr.bf16.mxu1 %v1117_v0  ;;  %v1021_v19 = vld [vmem:[%s1672_s0] ss:$8 sps:$4 sm:$0xff]   ;;  %v1027_v21 = vld [vmem:[%s1672_s0 + $0x14] ss:$8 sps:$4 sm:$0xff]   ;;  %v1031_v23 = vld [vmem:[%s1672_s0 + $0x10] ss:$8 sps:$4 sm:$0xff]  }
   0x8   :  { %v1024_v20 = vld [vmem:[%s1672_s0 + $0x100] ss:$8 sps:$4 sm:$0xff]   ;;  %v1029_v22 = vld [vmem:[%s1672_s0 + $0x114] ss:$8 sps:$4 sm:$0xff]   ;;  %v1032_v24 = vld [vmem:[%s1672_s0 + $0x110] ss:$8 sps:$4 sm:$0xff]  }
   0x9   :  { %v1033_v25 = vld [vmem:[%s1672_s0 + $0x24] ss:$8 sps:$4 sm:$0xff]   ;;  %v1037_v27 = vld [vmem:[%s1672_s0 + $0x20] ss:$8 sps:$4 sm:$0xff]   ;;  %v1039_v29 = vld [vmem:[%s1672_s0 + $0x34] ss:$8 sps:$4 sm:$0xff]  }
   0xa   :  { %539 = vmatpush1.bf16.msra.mxu0 %v1007_v3  ;;  %990 = vmatpush1.bf16.msra.mxu1 %v1007_v3  ;;  %v1035_v26 = vld [vmem:[%s1672_s0 + $0x124] ss:$8 sps:$4 sm:$0xff]   ;;  %v1038_v28 = vld [vmem:[%s1672_s0 + $0x120] ss:$8 sps:$4 sm:$0xff]   ;;  %v1041_v30 = vld [vmem:[%s1672_s0 + $0x134] ss:$8 sps:$4 sm:$0xff]  }
   0xb   :  { %540 = vmatprep.subr.bf16.mxu0 %v1117_v0  ;;  %975 = vmatprep.subr.bf16.mxu1 %v1117_v0  ;;  %v1043_v31 = vld [vmem:[%s1672_s0 + $0x30] ss:$8 sps:$4 sm:$0xff]   ;;  %v1045_v33 = vld [vmem:[%s1672_s0 + $0x44] ss:$8 sps:$4 sm:$0xff]   ;;  %v1049_v35 = vld [vmem:[%s1672_s0 + $0x40] ss:$8 sps:$4 sm:$0xff]  }
   0xc   :  { %v1044_v32 = vld [vmem:[%s1672_s0 + $0x130] ss:$8 sps:$4 sm:$0xff]   ;;  %v1047_v34 = vld [vmem:[%s1672_s0 + $0x144] ss:$8 sps:$4 sm:$0xff]   ;;  %v1050_v36 = vld [vmem:[%s1672_s0 + $0x140] ss:$8 sps:$4 sm:$0xff]  }
   0xd   :  { %v1051_v37 = vld [vmem:[%s1672_s0 + $0x54] ss:$8 sps:$4 sm:$0xff]   ;;  %v1055_v39 = vld [vmem:[%s1672_s0 + $0x50] ss:$8 sps:$4 sm:$0xff]   ;;  %v1057_v41 = vld [vmem:[%s1672_s0 + $0x64] ss:$8 sps:$4 sm:$0xff]  }
   0xe   :  { %541 = vmatpush1.bf16.msra.mxu0 %v1008_v4  ;;  %991 = vmatpush1.bf16.msra.mxu1 %v1008_v4  ;;  %v1053_v38 = vld [vmem:[%s1672_s0 + $0x154] ss:$8 sps:$4 sm:$0xff]   ;;  %v1056_v40 = vld [vmem:[%s1672_s0 + $0x150] ss:$8 sps:$4 sm:$0xff]   ;;  %v1059_v42 = vld [vmem:[%s1672_s0 + $0x164] ss:$8 sps:$4 sm:$0xff]  }
   0xf   :  { %542 = vmatprep.subr.bf16.mxu0 %v1117_v0  ;;  %976 = vmatprep.subr.bf16.mxu1 %v1117_v0  ;;  %v1061_v43 = vld [vmem:[%s1672_s0 + $0x60] ss:$8 sps:$4 sm:$0xff]   ;;  %v1063_v45 = vld [vmem:[%s1672_s0 + $0x74] ss:$8 sps:$4 sm:$0xff]   ;;  %v1067_v47 = vld [vmem:[%s1672_s0 + $0x70] ss:$8 sps:$4 sm:$0xff]  }
  0x10   :  { %v1062_v44 = vld [vmem:[%s1672_s0 + $0x160] ss:$8 sps:$4 sm:$0xff]   ;;  %v1065_v46 = vld [vmem:[%s1672_s0 + $0x174] ss:$8 sps:$4 sm:$0xff]   ;;  %v1068_v48 = vld [vmem:[%s1672_s0 + $0x170] ss:$8 sps:$4 sm:$0xff]  }
  0x11   :  { %v1069_v49 = vld [vmem:[%s1672_s0 + $0x84] ss:$8 sps:$4 sm:$0xff]   ;;  %v1073_v51 = vld [vmem:[%s1672_s0 + $0x80] ss:$8 sps:$4 sm:$0xff]   ;;  %v1075_v53 = vld [vmem:[%s1672_s0 + $0x94] ss:$8 sps:$4 sm:$0xff]  }
  0x12   :  { %543 = vmatpush1.bf16.msra.mxu0 %v1009_v5  ;;  %992 = vmatpush1.bf16.msra.mxu1 %v1009_v5  ;;  %v1071_v50 = vld [vmem:[%s1672_s0 + $0x184] ss:$8 sps:$4 sm:$0xff]   ;;  %v1074_v52 = vld [vmem:[%s1672_s0 + $0x180] ss:$8 sps:$4 sm:$0xff]   ;;  %v1077_v54 = vld [vmem:[%s1672_s0 + $0x194] ss:$8 sps:$4 sm:$0xff]  }
  0x13   :  { %544 = vmatprep.subr.bf16.mxu0 %v1117_v0  ;;  %977 = vmatprep.subr.bf16.mxu1 %v1117_v0  ;;  %v1079_v55 = vld [vmem:[%s1672_s0 + $0x90] ss:$8 sps:$4 sm:$0xff]   ;;  %v1081_v57 = vld [vmem:[%s1672_s0 + $0xa4] ss:$8 sps:$4 sm:$0xff]   ;;  %v1085_v59 = vld [vmem:[%s1672_s0 + $0xa0] ss:$8 sps:$4 sm:$0xff]  }
  0x14   :  { %v1080_v56 = vld [vmem:[%s1672_s0 + $0x190] ss:$8 sps:$4 sm:$0xff]   ;;  %v1083_v58 = vld [vmem:[%s1672_s0 + $0x1a4] ss:$8 sps:$4 sm:$0xff]   ;;  %v1086_v60 = vld [vmem:[%s1672_s0 + $0x1a0] ss:$8 sps:$4 sm:$0xff]  }
  0x15   :  { %v1087_v61 = vld [vmem:[%s1672_s0 + $0xb4] ss:$8 sps:$4 sm:$0xff]   ;;  %v1091_v63 = vld [vmem:[%s1672_s0 + $0xb0] ss:$8 sps:$4 sm:$0xff]   ;;  %v1093_v1 = vld [vmem:[%s1672_s0 + $0xc4] ss:$8 sps:$4 sm:$0xff]  }
  0x16   :  { %545 = vmatpush1.bf16.msra.mxu0 %v1010_v7  ;;  %993 = vmatpush1.bf16.msra.mxu1 %v1010_v7  ;;  %v1089_v62 = vld [vmem:[%s1672_s0 + $0x1b4] ss:$8 sps:$4 sm:$0xff]   ;;  %v1095_v2 = vld [vmem:[%s1672_s0 + $0x1c4] ss:$8 sps:$4 sm:$0xff]   ;;  %v1097_v3 = vld [vmem:[%s1672_s0 + $0xc0] ss:$8 sps:$4 sm:$0xff]  }
  0x17   :  { %546 = vmatprep.subr.bf16.mxu0 %v1117_v0  ;;  %978 = vmatprep.subr.bf16.mxu1 %v1117_v0  ;;  %v1098_v4 = vld [vmem:[%s1672_s0 + $0x1c0] ss:$8 sps:$4 sm:$0xff]   ;;  %v1099_v5 = vld [vmem:[%s1672_s0 + $0xd4] ss:$8 sps:$4 sm:$0xff]   ;;  %v1103_v7 = vld [vmem:[%s1672_s0 + $0xd0] ss:$8 sps:$4 sm:$0xff]  }
  0x18   :  { %v1101_v6 = vld [vmem:[%s1672_s0 + $0x1d4] ss:$8 sps:$4 sm:$0xff]   ;;  %v1104_v8 = vld [vmem:[%s1672_s0 + $0x1d0] ss:$8 sps:$4 sm:$0xff]  }
  0x1a   :  { %547 = vmatpush1.bf16.msra.mxu0 %v1011_v9  ;;  %994 = vmatpush1.bf16.msra.mxu1 %v1011_v9  ;;  %v1105_v9 = vld [vmem:[%s1672_s0 + $0xe4] ss:$8 sps:$4 sm:$0xff]  }
  0x1b   :  { %548 = vmatprep.subr.bf16.mxu0 %v1117_v0  ;;  %979 = vmatprep.subr.bf16.mxu1 %v1117_v0 }
  0x1e   :  { %549 = vmatpush1.bf16.msra.mxu0 %v1012_v10  ;;  %995 = vmatpush1.bf16.msra.mxu1 %v1012_v10  ;;  %v1107_v10 = vld [vmem:[%s1672_s0 + $0x1e4] ss:$8 sps:$4 sm:$0xff]  }
  0x1f   :  { %550 = vmatprep.subr.bf16.mxu0 %v1117_v0  ;;  %980 = vmatprep.subr.bf16.mxu1 %v1117_v0 }
  0x22   :  { %551 = vmatpush1.bf16.msra.mxu0 %v1013_v11  ;;  %996 = vmatpush1.bf16.msra.mxu1 %v1013_v11  ;;  %v1109_v11 = vld [vmem:[%s1672_s0 + $0xe0] ss:$8 sps:$4 sm:$0xff]  }
  0x23   :  { %552 = vmatprep.subr.bf16.mxu0 %v1117_v0  ;;  %981 = vmatprep.subr.bf16.mxu1 %v1117_v0 }
  0x26   :  { %553 = vmatpush1.bf16.msra.mxu0 %v1014_v12  ;;  %997 = vmatpush1.bf16.msra.mxu1 %v1014_v12  ;;  %v1110_v12 = vld [vmem:[%s1672_s0 + $0x1e0] ss:$8 sps:$4 sm:$0xff]  }
  0x27   :  { %554 = vmatprep.subr.bf16.mxu0 %v1117_v0  ;;  %982 = vmatprep.subr.bf16.mxu1 %v1117_v0 }
  0x2a   :  { %555 = vmatpush1.bf16.msra.mxu0 %v1015_v13  ;;  %998 = vmatpush1.bf16.msra.mxu1 %v1015_v13  ;;  %v1111_v13 = vld [vmem:[%s1672_s0 + $0xf4] ss:$8 sps:$4 sm:$0xff]  }
  0x2b   :  { %556 = vmatprep.subr.bf16.mxu0 %v1117_v0  ;;  %983 = vmatprep.subr.bf16.mxu1 %v1117_v0 }
  0x2e   :  { %557 = vmatpush1.bf16.msra.mxu0 %v1016_v14  ;;  %999 = vmatpush1.bf16.msra.mxu1 %v1016_v14  ;;  %v1113_v14 = vld [vmem:[%s1672_s0 + $0x1f4] ss:$8 sps:$4 sm:$0xff]  }
  0x2f   :  { %558 = vmatprep.subr.bf16.mxu0 %v1117_v0  ;;  %984 = vmatprep.subr.bf16.mxu1 %v1117_v0 }
  0x32   :  { %559 = vmatpush1.bf16.msra.mxu0 %v1017_v15  ;;  %1000 = vmatpush1.bf16.msra.mxu1 %v1017_v15  ;;  %v1115_v15 = vld [vmem:[%s1672_s0 + $0xf0] ss:$8 sps:$4 sm:$0xff]  }
  0x33   :  { %560 = vmatprep.subr.bf16.mxu0 %v1117_v0  ;;  %985 = vmatprep.subr.bf16.mxu1 %v1117_v0 }
  0x36   :  { %561 = vmatpush1.bf16.msra.mxu0 %v1018_v16  ;;  %1001 = vmatpush1.bf16.msra.mxu1 %v1018_v16  ;;  %v1116_v16 = vld [vmem:[%s1672_s0 + $0x1f0] ss:$8 sps:$4 sm:$0xff]  }
  0x37   :  { %562 = vmatprep.subr.bf16.mxu0 %v1117_v0  ;;  %986 = vmatprep.subr.bf16.mxu1 %v1117_v0 }
  0x3a   :  { %563 = vmatpush1.bf16.msra.mxu0 %v1019_v17  ;;  %1002 = vmatpush1.bf16.msra.mxu1 %v1019_v17  ;;  %v1413_v17 = vld [vmem:[%s1673_s2] ss:$0 sm:$0xff] }
  0x3b   :  { %564 = vmatprep.subr.bf16.mxu0 %v1117_v0  ;;  %987 = vmatprep.subr.bf16.mxu1 %v1117_v0  ;;  %v1092_v0 = vld [vmem:[%s1672_s0 + $0x1b0] ss:$8 sps:$4 sm:$0xff]  }
  0x3e   :  { %565 = vmatpush1.bf16.msra.mxu0 %v1020_v18  ;;  %1003 = vmatpush1.bf16.msra.mxu1 %v1020_v18 }
  0x41   :  { %567 = vmatmul.mubr.bf16.vlgmr.msra.gmra.mrb[0].mxu0 %v1021_v19  ;;  %695 = vmatmul.mubr.bf16.vlgmr.msra.gmra.mrb[0].mxu1 %v1024_v20 }
  0x42   :  { %574 = vmatprep.mubr.bf16.mxu0 %v1027_v21  ;;  %702 = vmatprep.mubr.bf16.mxu1 %v1029_v22 }
  0x49   :  { %575 = vmatmul.mubr.bf16.gmra.mrb[4].mxu0 %v1031_v23  ;;  %703 = vmatmul.mubr.bf16.gmra.mrb[4].mxu1 %v1032_v24 }
  0x4a   :  { %582 = vmatprep.mubr.bf16.mxu0 %v1033_v25  ;;  %710 = vmatprep.mubr.bf16.mxu1 %v1035_v26 }
  0x51   :  { %583 = vmatmul.mubr.bf16.gmra.mrb[8].mxu0 %v1037_v27  ;;  %711 = vmatmul.mubr.bf16.gmra.mrb[8].mxu1 %v1038_v28 }
  0x52   :  { %590 = vmatprep.mubr.bf16.mxu0 %v1039_v29  ;;  %718 = vmatprep.mubr.bf16.mxu1 %v1041_v30 }
  0x59   :  { %591 = vmatmul.mubr.bf16.gmra.mrb[12].mxu0 %v1043_v31  ;;  %719 = vmatmul.mubr.bf16.gmra.mrb[12].mxu1 %v1044_v32 }
  0x5a   :  { %598 = vmatprep.mubr.bf16.mxu0 %v1045_v33  ;;  %726 = vmatprep.mubr.bf16.mxu1 %v1047_v34 }
  0x61   :  { %599 = vmatmul.mubr.bf16.gmra.mrb[16].mxu0 %v1049_v35  ;;  %727 = vmatmul.mubr.bf16.gmra.mrb[16].mxu1 %v1050_v36 }
  0x62   :  { %606 = vmatprep.mubr.bf16.mxu0 %v1051_v37  ;;  %734 = vmatprep.mubr.bf16.mxu1 %v1053_v38 }
  0x69   :  { %607 = vmatmul.mubr.bf16.gmra.mrb[20].mxu0 %v1055_v39  ;;  %735 = vmatmul.mubr.bf16.gmra.mrb[20].mxu1 %v1056_v40 }
  0x6a   :  { %614 = vmatprep.mubr.bf16.mxu0 %v1057_v41  ;;  %742 = vmatprep.mubr.bf16.mxu1 %v1059_v42 }
  0x71   :  { %615 = vmatmul.mubr.bf16.gmra.mrb[24].mxu0 %v1061_v43  ;;  %743 = vmatmul.mubr.bf16.gmra.mrb[24].mxu1 %v1062_v44 }
  0x72   :  { %622 = vmatprep.mubr.bf16.mxu0 %v1063_v45  ;;  %750 = vmatprep.mubr.bf16.mxu1 %v1065_v46 }
  0x79   :  { %623 = vmatmul.mubr.bf16.gmra.mrb[28].mxu0 %v1067_v47  ;;  %751 = vmatmul.mubr.bf16.gmra.mrb[28].mxu1 %v1068_v48 }
  0x7a   :  { %630 = vmatprep.mubr.bf16.mxu0 %v1069_v49  ;;  %758 = vmatprep.mubr.bf16.mxu1 %v1071_v50 }
  0x81   :  { %631 = vmatmul.mubr.bf16.gmra.mrb[32].mxu0 %v1073_v51  ;;  %759 = vmatmul.mubr.bf16.gmra.mrb[32].mxu1 %v1074_v52 }
  0x82   :  { %638 = vmatprep.mubr.bf16.mxu0 %v1075_v53  ;;  %766 = vmatprep.mubr.bf16.mxu1 %v1077_v54 }
  0x89   :  { %639 = vmatmul.mubr.bf16.gmra.mrb[36].mxu0 %v1079_v55  ;;  %767 = vmatmul.mubr.bf16.gmra.mrb[36].mxu1 %v1080_v56 }
  0x8a   :  { %646 = vmatprep.mubr.bf16.mxu0 %v1081_v57  ;;  %774 = vmatprep.mubr.bf16.mxu1 %v1083_v58 }
  0x91   :  { %647 = vmatmul.mubr.bf16.gmra.mrb[40].mxu0 %v1085_v59  ;;  %775 = vmatmul.mubr.bf16.gmra.mrb[40].mxu1 %v1086_v60 }
  0x92   :  { %654 = vmatprep.mubr.bf16.mxu0 %v1087_v61  ;;  %782 = vmatprep.mubr.bf16.mxu1 %v1089_v62 }
  0x99   :  { %655 = vmatmul.mubr.bf16.gmra.mrb[44].mxu0 %v1091_v63  ;;  %783 = vmatmul.mubr.bf16.gmra.mrb[44].mxu1 %v1092_v0 }
  0x9a   :  { %662 = vmatprep.mubr.bf16.mxu0 %v1093_v1  ;;  %790 = vmatprep.mubr.bf16.mxu1 %v1095_v2 }
  0xa1   :  { %663 = vmatmul.mubr.bf16.gmra.mrb[48].mxu0 %v1097_v3  ;;  %791 = vmatmul.mubr.bf16.gmra.mrb[48].mxu1 %v1098_v4 }
  0xa2   :  { %670 = vmatprep.mubr.bf16.mxu0 %v1099_v5  ;;  %798 = vmatprep.mubr.bf16.mxu1 %v1101_v6 }
  0xa9   :  { %671 = vmatmul.mubr.bf16.gmra.mrb[52].mxu0 %v1103_v7  ;;  %799 = vmatmul.mubr.bf16.gmra.mrb[52].mxu1 %v1104_v8 }
  0xaa   :  { %678 = vmatprep.mubr.bf16.mxu0 %v1105_v9  ;;  %806 = vmatprep.mubr.bf16.mxu1 %v1107_v10 }
  0xb1   :  { %679 = vmatmul.mubr.bf16.gmra.mrb[56].mxu0 %v1109_v11  ;;  %807 = vmatmul.mubr.bf16.gmra.mrb[56].mxu1 %v1110_v12 }
  0xb2   :  { %686 = vmatprep.mubr.bf16.mxu0 %v1111_v13  ;;  %814 = vmatprep.mubr.bf16.mxu1 %v1113_v14 }
  0xb9   :  { %687 = vmatmul.mubr.bf16.gmra.mrb[60].mxu0 %v1115_v15  ;;  %815 = vmatmul.mubr.bf16.gmra.mrb[60].mxu1 %v1116_v16 }
 0x114   :  { %v568_v18 = vpop.f32.mrb[0].mxu0  ;;  %v696_v19 = vpop.f32.mrb[0].mxu1 }
 0x115   :  { %v569_v20 = vadd.f32 %v1413_v17, %v568_v18  ;;  %v697_v21 = vadd.f32 %v1413_v17, %v696_v19  ;;  %v570_v22 = vpop.f32.mrb[1].mxu0  ;;  %v698_v23 = vpop.f32.mrb[1].mxu1 }
 0x116   :  { %v571_v24 = vpop.f32.mrb[2].mxu0  ;;  %v699_v25 = vpop.f32.mrb[2].mxu1 }
 0x117   :  { %823 = vst [vmem:[%s1674_s3] sm:$0xff] %v569_v20  ;;  %855 = vst [vmem:[%s1674_s3 + $0x100] sm:$0xff] %v697_v21  ;;  %v572_v26 = vadd.f32 %v1413_v17, %v571_v24  ;;  %v700_v27 = vadd.f32 %v1413_v17, %v699_v25  ;;  %v573_v28 = vpop.f32.mrb[3].mxu0  ;;  %v701_v29 = vpop.f32.mrb[3].mxu1 }
 0x119   :  { %824 = vst [vmem:[%s1674_s3 + $0x8] sm:$0xff] %v572_v26  ;;  %856 = vst [vmem:[%s1674_s3 + $0x108] sm:$0xff] %v700_v27 }
 0x11c   :  { %v576_v30 = vpop.f32.mrb[4].mxu0  ;;  %v704_v31 = vpop.f32.mrb[4].mxu1 }
 0x11d   :  { %v577_v32 = vadd.f32 %v1413_v17, %v576_v30  ;;  %v705_v33 = vadd.f32 %v1413_v17, %v704_v31  ;;  %v578_v34 = vpop.f32.mrb[5].mxu0  ;;  %v706_v35 = vpop.f32.mrb[5].mxu1 }
 0x11e   :  { %v579_v36 = vpop.f32.mrb[6].mxu0  ;;  %v707_v37 = vpop.f32.mrb[6].mxu1 }
 0x11f   :  { %825 = vst [vmem:[%s1674_s3 + $0x10] sm:$0xff] %v577_v32  ;;  %857 = vst [vmem:[%s1674_s3 + $0x110] sm:$0xff] %v705_v33  ;;  %v580_v38 = vadd.f32 %v1413_v17, %v579_v36  ;;  %v708_v39 = vadd.f32 %v1413_v17, %v707_v37  ;;  %v581_v40 = vpop.f32.mrb[7].mxu0  ;;  %v709_v41 = vpop.f32.mrb[7].mxu1 }
 0x121   :  { %826 = vst [vmem:[%s1674_s3 + $0x18] sm:$0xff] %v580_v38  ;;  %858 = vst [vmem:[%s1674_s3 + $0x118] sm:$0xff] %v708_v39 }
 0x124   :  { %v584_v42 = vpop.f32.mrb[8].mxu0  ;;  %v712_v43 = vpop.f32.mrb[8].mxu1 }
 0x125   :  { %v585_v44 = vadd.f32 %v1413_v17, %v584_v42  ;;  %v713_v45 = vadd.f32 %v1413_v17, %v712_v43  ;;  %v586_v46 = vpop.f32.mrb[9].mxu0  ;;  %v714_v47 = vpop.f32.mrb[9].mxu1 }
 0x126   :  { %v587_v48 = vpop.f32.mrb[10].mxu0  ;;  %v715_v49 = vpop.f32.mrb[10].mxu1 }
 0x127   :  { %827 = vst [vmem:[%s1674_s3 + $0x20] sm:$0xff] %v585_v44  ;;  %859 = vst [vmem:[%s1674_s3 + $0x120] sm:$0xff] %v713_v45  ;;  %v588_v50 = vadd.f32 %v1413_v17, %v587_v48  ;;  %v716_v51 = vadd.f32 %v1413_v17, %v715_v49  ;;  %v589_v52 = vpop.f32.mrb[11].mxu0  ;;  %v717_v53 = vpop.f32.mrb[11].mxu1 }
 0x129   :  { %828 = vst [vmem:[%s1674_s3 + $0x28] sm:$0xff] %v588_v50  ;;  %860 = vst [vmem:[%s1674_s3 + $0x128] sm:$0xff] %v716_v51 }
 0x12c   :  { %v592_v54 = vpop.f32.mrb[12].mxu0  ;;  %v720_v55 = vpop.f32.mrb[12].mxu1 }
 0x12d   :  { %v593_v56 = vadd.f32 %v1413_v17, %v592_v54  ;;  %v721_v57 = vadd.f32 %v1413_v17, %v720_v55  ;;  %v594_v58 = vpop.f32.mrb[13].mxu0  ;;  %v722_v59 = vpop.f32.mrb[13].mxu1 }
 0x12e   :  { %v595_v60 = vpop.f32.mrb[14].mxu0  ;;  %v723_v61 = vpop.f32.mrb[14].mxu1 }
 0x12f   :  { %829 = vst [vmem:[%s1674_s3 + $0x30] sm:$0xff] %v593_v56  ;;  %861 = vst [vmem:[%s1674_s3 + $0x130] sm:$0xff] %v721_v57  ;;  %v596_v62 = vadd.f32 %v1413_v17, %v595_v60  ;;  %v724_v63 = vadd.f32 %v1413_v17, %v723_v61  ;;  %v597_v0 = vpop.f32.mrb[15].mxu0  ;;  %v725_v1 = vpop.f32.mrb[15].mxu1 }
 0x131   :  { %830 = vst [vmem:[%s1674_s3 + $0x38] sm:$0xff] %v596_v62  ;;  %862 = vst [vmem:[%s1674_s3 + $0x138] sm:$0xff] %v724_v63 }
 0x134   :  { %v600_v2 = vpop.f32.mrb[16].mxu0  ;;  %v728_v3 = vpop.f32.mrb[16].mxu1 }
 0x135   :  { %v601_v4 = vadd.f32 %v1413_v17, %v600_v2  ;;  %v729_v5 = vadd.f32 %v1413_v17, %v728_v3  ;;  %v602_v6 = vpop.f32.mrb[17].mxu0  ;;  %v730_v7 = vpop.f32.mrb[17].mxu1 }
 0x136   :  { %v603_v8 = vpop.f32.mrb[18].mxu0  ;;  %v731_v9 = vpop.f32.mrb[18].mxu1 }
 0x137   :  { %831 = vst [vmem:[%s1674_s3 + $0x40] sm:$0xff] %v601_v4  ;;  %863 = vst [vmem:[%s1674_s3 + $0x140] sm:$0xff] %v729_v5  ;;  %v604_v10 = vadd.f32 %v1413_v17, %v603_v8  ;;  %v732_v11 = vadd.f32 %v1413_v17, %v731_v9  ;;  %v605_v12 = vpop.f32.mrb[19].mxu0  ;;  %v733_v13 = vpop.f32.mrb[19].mxu1 }
 0x139   :  { %832 = vst [vmem:[%s1674_s3 + $0x48] sm:$0xff] %v604_v10  ;;  %864 = vst [vmem:[%s1674_s3 + $0x148] sm:$0xff] %v732_v11 }
 0x13c   :  { %v608_v14 = vpop.f32.mrb[20].mxu0  ;;  %v736_v15 = vpop.f32.mrb[20].mxu1 }
 0x13d   :  { %v609_v16 = vadd.f32 %v1413_v17, %v608_v14  ;;  %v737_v18 = vadd.f32 %v1413_v17, %v736_v15  ;;  %v610_v19 = vpop.f32.mrb[21].mxu0  ;;  %v738_v20 = vpop.f32.mrb[21].mxu1 }
 0x13e   :  { %v611_v21 = vpop.f32.mrb[22].mxu0  ;;  %v739_v22 = vpop.f32.mrb[22].mxu1 }
 0x13f   :  { %833 = vst [vmem:[%s1674_s3 + $0x50] sm:$0xff] %v609_v16  ;;  %865 = vst [vmem:[%s1674_s3 + $0x150] sm:$0xff] %v737_v18  ;;  %v612_v23 = vadd.f32 %v1413_v17, %v611_v21  ;;  %v740_v24 = vadd.f32 %v1413_v17, %v739_v22  ;;  %v613_v25 = vpop.f32.mrb[23].mxu0  ;;  %v741_v26 = vpop.f32.mrb[23].mxu1 }
 0x141   :  { %834 = vst [vmem:[%s1674_s3 + $0x58] sm:$0xff] %v612_v23  ;;  %866 = vst [vmem:[%s1674_s3 + $0x158] sm:$0xff] %v740_v24 }
 0x144   :  { %v616_v27 = vpop.f32.mrb[24].mxu0  ;;  %v744_v28 = vpop.f32.mrb[24].mxu1 }
 0x145   :  { %v617_v29 = vadd.f32 %v1413_v17, %v616_v27  ;;  %v745_v30 = vadd.f32 %v1413_v17, %v744_v28  ;;  %v618_v31 = vpop.f32.mrb[25].mxu0  ;;  %v746_v32 = vpop.f32.mrb[25].mxu1 }
 0x146   :  { %v619_v33 = vpop.f32.mrb[26].mxu0  ;;  %v747_v34 = vpop.f32.mrb[26].mxu1 }
 0x147   :  { %835 = vst [vmem:[%s1674_s3 + $0x60] sm:$0xff] %v617_v29  ;;  %867 = vst [vmem:[%s1674_s3 + $0x160] sm:$0xff] %v745_v30  ;;  %v620_v35 = vadd.f32 %v1413_v17, %v619_v33  ;;  %v748_v36 = vadd.f32 %v1413_v17, %v747_v34  ;;  %v621_v37 = vpop.f32.mrb[27].mxu0  ;;  %v749_v38 = vpop.f32.mrb[27].mxu1 }
 0x149   :  { %836 = vst [vmem:[%s1674_s3 + $0x68] sm:$0xff] %v620_v35  ;;  %868 = vst [vmem:[%s1674_s3 + $0x168] sm:$0xff] %v748_v36 }
 0x14c   :  { %v624_v39 = vpop.f32.mrb[28].mxu0  ;;  %v752_v40 = vpop.f32.mrb[28].mxu1 }
 0x14d   :  { %v625_v41 = vadd.f32 %v1413_v17, %v624_v39  ;;  %v753_v42 = vadd.f32 %v1413_v17, %v752_v40  ;;  %v626_v43 = vpop.f32.mrb[29].mxu0  ;;  %v754_v44 = vpop.f32.mrb[29].mxu1 }
 0x14e   :  { %v627_v45 = vpop.f32.mrb[30].mxu0  ;;  %v755_v46 = vpop.f32.mrb[30].mxu1 }
 0x14f   :  { %837 = vst [vmem:[%s1674_s3 + $0x70] sm:$0xff] %v625_v41  ;;  %869 = vst [vmem:[%s1674_s3 + $0x170] sm:$0xff] %v753_v42  ;;  %v628_v47 = vadd.f32 %v1413_v17, %v627_v45  ;;  %v756_v48 = vadd.f32 %v1413_v17, %v755_v46  ;;  %v629_v49 = vpop.f32.mrb[31].mxu0  ;;  %v757_v50 = vpop.f32.mrb[31].mxu1 }
 0x151   :  { %838 = vst [vmem:[%s1674_s3 + $0x78] sm:$0xff] %v628_v47  ;;  %870 = vst [vmem:[%s1674_s3 + $0x178] sm:$0xff] %v756_v48 }
 0x154   :  { %v632_v51 = vpop.f32.mrb[32].mxu0  ;;  %v760_v52 = vpop.f32.mrb[32].mxu1 }
 0x155   :  { %v633_v53 = vadd.f32 %v1413_v17, %v632_v51  ;;  %v761_v54 = vadd.f32 %v1413_v17, %v760_v52  ;;  %v634_v55 = vpop.f32.mrb[33].mxu0  ;;  %v762_v56 = vpop.f32.mrb[33].mxu1 }
 0x156   :  { %v635_v57 = vpop.f32.mrb[34].mxu0  ;;  %v763_v58 = vpop.f32.mrb[34].mxu1 }
 0x157   :  { %839 = vst [vmem:[%s1674_s3 + $0x80] sm:$0xff] %v633_v53  ;;  %871 = vst [vmem:[%s1674_s3 + $0x180] sm:$0xff] %v761_v54  ;;  %v636_v59 = vadd.f32 %v1413_v17, %v635_v57  ;;  %v764_v60 = vadd.f32 %v1413_v17, %v763_v58  ;;  %v637_v61 = vpop.f32.mrb[35].mxu0  ;;  %v765_v62 = vpop.f32.mrb[35].mxu1 }
 0x159   :  { %840 = vst [vmem:[%s1674_s3 + $0x88] sm:$0xff] %v636_v59  ;;  %872 = vst [vmem:[%s1674_s3 + $0x188] sm:$0xff] %v764_v60 }
 0x15c   :  { %v640_v63 = vpop.f32.mrb[36].mxu0  ;;  %v768_v0 = vpop.f32.mrb[36].mxu1 }
 0x15d   :  { %v641_v1 = vadd.f32 %v1413_v17, %v640_v63  ;;  %v769_v2 = vadd.f32 %v1413_v17, %v768_v0  ;;  %v642_v3 = vpop.f32.mrb[37].mxu0  ;;  %v770_v4 = vpop.f32.mrb[37].mxu1 }
 0x15e   :  { %v643_v5 = vpop.f32.mrb[38].mxu0  ;;  %v771_v6 = vpop.f32.mrb[38].mxu1 }
 0x15f   :  { %841 = vst [vmem:[%s1674_s3 + $0x90] sm:$0xff] %v641_v1  ;;  %873 = vst [vmem:[%s1674_s3 + $0x190] sm:$0xff] %v769_v2  ;;  %v644_v7 = vadd.f32 %v1413_v17, %v643_v5  ;;  %v772_v8 = vadd.f32 %v1413_v17, %v771_v6  ;;  %v645_v9 = vpop.f32.mrb[39].mxu0  ;;  %v773_v10 = vpop.f32.mrb[39].mxu1 }
 0x161   :  { %842 = vst [vmem:[%s1674_s3 + $0x98] sm:$0xff] %v644_v7  ;;  %874 = vst [vmem:[%s1674_s3 + $0x198] sm:$0xff] %v772_v8 }
 0x164   :  { %v648_v11 = vpop.f32.mrb[40].mxu0  ;;  %v776_v12 = vpop.f32.mrb[40].mxu1 }
 0x165   :  { %v649_v13 = vadd.f32 %v1413_v17, %v648_v11  ;;  %v777_v14 = vadd.f32 %v1413_v17, %v776_v12  ;;  %v650_v15 = vpop.f32.mrb[41].mxu0  ;;  %v778_v16 = vpop.f32.mrb[41].mxu1 }
 0x166   :  { %v651_v18 = vpop.f32.mrb[42].mxu0  ;;  %v779_v19 = vpop.f32.mrb[42].mxu1 }
 0x167   :  { %843 = vst [vmem:[%s1674_s3 + $0xa0] sm:$0xff] %v649_v13  ;;  %875 = vst [vmem:[%s1674_s3 + $0x1a0] sm:$0xff] %v777_v14  ;;  %v652_v20 = vadd.f32 %v1413_v17, %v651_v18  ;;  %v780_v21 = vadd.f32 %v1413_v17, %v779_v19  ;;  %v653_v22 = vpop.f32.mrb[43].mxu0  ;;  %v781_v23 = vpop.f32.mrb[43].mxu1 }
 0x169   :  { %844 = vst [vmem:[%s1674_s3 + $0xa8] sm:$0xff] %v652_v20  ;;  %876 = vst [vmem:[%s1674_s3 + $0x1a8] sm:$0xff] %v780_v21 }
 0x16c   :  { %v656_v24 = vpop.f32.mrb[44].mxu0  ;;  %v784_v25 = vpop.f32.mrb[44].mxu1 }
 0x16d   :  { %v657_v26 = vadd.f32 %v1413_v17, %v656_v24  ;;  %v785_v27 = vadd.f32 %v1413_v17, %v784_v25  ;;  %v658_v28 = vpop.f32.mrb[45].mxu0  ;;  %v786_v29 = vpop.f32.mrb[45].mxu1 }
 0x16e   :  { %v659_v30 = vpop.f32.mrb[46].mxu0  ;;  %v787_v31 = vpop.f32.mrb[46].mxu1 }
 0x16f   :  { %845 = vst [vmem:[%s1674_s3 + $0xb0] sm:$0xff] %v657_v26  ;;  %877 = vst [vmem:[%s1674_s3 + $0x1b0] sm:$0xff] %v785_v27  ;;  %v660_v32 = vadd.f32 %v1413_v17, %v659_v30  ;;  %v788_v33 = vadd.f32 %v1413_v17, %v787_v31  ;;  %v661_v34 = vpop.f32.mrb[47].mxu0  ;;  %v789_v35 = vpop.f32.mrb[47].mxu1 }
 0x171   :  { %846 = vst [vmem:[%s1674_s3 + $0xb8] sm:$0xff] %v660_v32  ;;  %878 = vst [vmem:[%s1674_s3 + $0x1b8] sm:$0xff] %v788_v33 }
 0x174   :  { %v664_v36 = vpop.f32.mrb[48].mxu0  ;;  %v792_v37 = vpop.f32.mrb[48].mxu1 }
 0x175   :  { %v665_v38 = vadd.f32 %v1413_v17, %v664_v36  ;;  %v793_v39 = vadd.f32 %v1413_v17, %v792_v37  ;;  %v666_v40 = vpop.f32.mrb[49].mxu0  ;;  %v794_v41 = vpop.f32.mrb[49].mxu1 }
 0x176   :  { %v667_v42 = vpop.f32.mrb[50].mxu0  ;;  %v795_v43 = vpop.f32.mrb[50].mxu1 }
 0x177   :  { %847 = vst [vmem:[%s1674_s3 + $0xc0] sm:$0xff] %v665_v38  ;;  %879 = vst [vmem:[%s1674_s3 + $0x1c0] sm:$0xff] %v793_v39  ;;  %v668_v44 = vadd.f32 %v1413_v17, %v667_v42  ;;  %v796_v45 = vadd.f32 %v1413_v17, %v795_v43  ;;  %v669_v46 = vpop.f32.mrb[51].mxu0  ;;  %v797_v47 = vpop.f32.mrb[51].mxu1 }
 0x179   :  { %848 = vst [vmem:[%s1674_s3 + $0xc8] sm:$0xff] %v668_v44  ;;  %880 = vst [vmem:[%s1674_s3 + $0x1c8] sm:$0xff] %v796_v45 }
 0x17c   :  { %v672_v48 = vpop.f32.mrb[52].mxu0  ;;  %v800_v49 = vpop.f32.mrb[52].mxu1 }
 0x17d   :  { %v673_v50 = vadd.f32 %v1413_v17, %v672_v48  ;;  %v801_v51 = vadd.f32 %v1413_v17, %v800_v49  ;;  %v674_v52 = vpop.f32.mrb[53].mxu0  ;;  %v802_v53 = vpop.f32.mrb[53].mxu1 }
 0x17e   :  { %v675_v54 = vpop.f32.mrb[54].mxu0  ;;  %v803_v55 = vpop.f32.mrb[54].mxu1 }
 0x17f   :  { %849 = vst [vmem:[%s1674_s3 + $0xd0] sm:$0xff] %v673_v50  ;;  %881 = vst [vmem:[%s1674_s3 + $0x1d0] sm:$0xff] %v801_v51  ;;  %v676_v56 = vadd.f32 %v1413_v17, %v675_v54  ;;  %v804_v57 = vadd.f32 %v1413_v17, %v803_v55  ;;  %v677_v58 = vpop.f32.mrb[55].mxu0  ;;  %v805_v59 = vpop.f32.mrb[55].mxu1 }
 0x181   :  { %850 = vst [vmem:[%s1674_s3 + $0xd8] sm:$0xff] %v676_v56  ;;  %882 = vst [vmem:[%s1674_s3 + $0x1d8] sm:$0xff] %v804_v57 }
 0x184   :  { %v680_v60 = vpop.f32.mrb[56].mxu0  ;;  %v808_v61 = vpop.f32.mrb[56].mxu1 }
 0x185   :  { %v681_v62 = vadd.f32 %v1413_v17, %v680_v60  ;;  %v809_v63 = vadd.f32 %v1413_v17, %v808_v61  ;;  %v682_v0 = vpop.f32.mrb[57].mxu0  ;;  %v810_v1 = vpop.f32.mrb[57].mxu1 }
 0x186   :  { %v683_v2 = vpop.f32.mrb[58].mxu0  ;;  %v811_v3 = vpop.f32.mrb[58].mxu1 }
 0x187   :  { %851 = vst [vmem:[%s1674_s3 + $0xe0] sm:$0xff] %v681_v62  ;;  %883 = vst [vmem:[%s1674_s3 + $0x1e0] sm:$0xff] %v809_v63  ;;  %v684_v4 = vadd.f32 %v1413_v17, %v683_v2  ;;  %v812_v5 = vadd.f32 %v1413_v17, %v811_v3  ;;  %v685_v6 = vpop.f32.mrb[59].mxu0  ;;  %v813_v7 = vpop.f32.mrb[59].mxu1 }
 0x189   :  { %852 = vst [vmem:[%s1674_s3 + $0xe8] sm:$0xff] %v684_v4  ;;  %884 = vst [vmem:[%s1674_s3 + $0x1e8] sm:$0xff] %v812_v5 }
 0x18c   :  { %v688_v8 = vpop.f32.mrb[60].mxu0  ;;  %v816_v9 = vpop.f32.mrb[60].mxu1 }
 0x18d   :  { %v689_v10 = vadd.f32 %v1413_v17, %v688_v8  ;;  %v817_v11 = vadd.f32 %v1413_v17, %v816_v9  ;;  %v690_v12 = vpop.f32.mrb[61].mxu0  ;;  %v818_v13 = vpop.f32.mrb[61].mxu1 }
 0x18e   :  { %v691_v14 = vpop.f32.mrb[62].mxu0  ;;  %v819_v15 = vpop.f32.mrb[62].mxu1 }
 0x18f   :  { %853 = vst [vmem:[%s1674_s3 + $0xf0] sm:$0xff] %v689_v10  ;;  %885 = vst [vmem:[%s1674_s3 + $0x1f0] sm:$0xff] %v817_v11  ;;  %v692_v16 = vadd.f32 %v1413_v17, %v691_v14  ;;  %v820_v18 = vadd.f32 %v1413_v17, %v819_v15  ;;  %v693_v19 = vpop.f32.mrb[63].mxu0  ;;  %v821_v20 = vpop.f32.mrb[63].mxu1 }
 0x191   :  { %854 = vst [vmem:[%s1674_s3 + $0xf8] sm:$0xff] %v692_v16  ;;  %886 = vst [vmem:[%s1674_s3 + $0x1f8] sm:$0xff] %v820_v18 }

// kernel: video_codec_forward.34
= control target key start
LH: loop header
LB: loop body
LE: loop exit
PB: predicated region body
PF: predicated region fallthrough
CT: control target
= control target key end

     0   :  { %s56_s0 = inlined_call_operand.vmem [shape: f32[16,128], index: 0, kind: input, shape index: {}]   ;;  %s57_s1 = inlined_call_operand.vmem [shape: f32[16,128], index: 1, kind: input, shape index: {}]   ;;  %s58_s2 = inlined_call_operand.vmem [shape: f32[16,128], index: 2, kind: output, shape index: {}]  }
   0x1   :  { %v11_v0 = vld [vmem:[%s56_s0] sm:$0xff]  ;;  %v12_v2 = vld [vmem:[%s56_s0 + $0x8] sm:$0xff] }
   0x2   :  { %v13_v1 = vld [vmem:[%s57_s1] sm:$0xff]  ;;  %v14_v4 = vld [vmem:[%s57_s1 + $0x8] sm:$0xff] }
   0x3   :  { %v15_v3 = vsub.f32 %v11_v0, %v13_v1  ;;  %v16_v5 = vsub.f32 %v12_v2, %v14_v4 }
   0x5   :  { %17 = vst [vmem:[%s58_s2] sm:$0xff] %v15_v3  ;;  %18 = vst [vmem:[%s58_s2 + $0x8] sm:$0xff] %v16_v5 }

// kernel: video_codec_forward.43
= control target key start
LH: loop header
LB: loop body
LE: loop exit
PB: predicated region body
PF: predicated region fallthrough
CT: control target
= control target key end

     0   :  { %s60_s0 = inlined_call_operand.vmem [shape: f32[16,128], index: 0, kind: input, shape index: {}]   ;;  %s61_s1 = inlined_call_operand.vmem [shape: f32[16,128], index: 1, kind: input, shape index: {}]   ;;  %s62_s2 = inlined_call_operand.vmem [shape: f32[16,128], index: 2, kind: output, shape index: {}]  }
   0x1   :  { %v11_v0 = vld [vmem:[%s60_s0] sm:$0xff]  ;;  %v12_v2 = vld [vmem:[%s60_s0 + $0x8] sm:$0xff] }
   0x2   :  { %v13_v1 = vld [vmem:[%s61_s1] sm:$0xff]  ;;  %v14_v4 = vld [vmem:[%s61_s1 + $0x8] sm:$0xff] }
   0x3   :  { %v15_v3 = vadd.f32 %v13_v1, %v11_v0  ;;  %v16_v5 = vadd.f32 %v14_v4, %v12_v2 }
   0x5   :  { %v17_v6 = vmax.f32 %v15_v3, 0.0  ;;  %v18_v7 = vmax.f32 %v16_v5, 0.0 }
   0x7   :  { %v19_v8 = vmin.f32 %v17_v6, 1.0  ;;  %v20_v9 = vmin.f32 %v18_v7, 1.0 }
   0x9   :  { %21 = vst [vmem:[%s62_s2] sm:$0xff] %v19_v8  ;;  %22 = vst [vmem:[%s62_s2 + $0x8] sm:$0xff] %v20_v9 }

</bundles_post_ra>
